<compile_context>
chip_gen: v5e
topology: v5e:2x2
jax: 0.10.0
libtpu: 0.0.40
codegen_flags: <defaults>
</compile_context>

<pallas_src>
from typing import NamedTuple

import jax
import jax.numpy as jnp
from jax.experimental import pallas as pl
from jax.experimental.pallas import tpu as pltpu

INPUT_DIM = 6807        # hard-coded in AutoRecModel.__init__
HIDDEN_SIZE = 32        # args['hidden_size']
NUM_LAYERS = 2          # args['num_layers']
DROPOUT_RATE = 0.1      # args['dropout_rate'] (identity at inference)

_DEC_CHUNK = 2048       # decoder output lane-chunk (multiple of 128)


def _round_up(x, m):
    return (x + m - 1) // m * m


class PreparedParams(NamedTuple):
    flat: tuple          # alternating (w, b) 2-D arrays; decoder pre-folded
    num_enc: int
    input_dim: int


def prepare_params(enc_params, dec_params):
    """One-time parameter preparation (NOT part of the per-call forward path):
       - fold all decoder Linears ('none' activation) into one affine map,
       - store the two large weights (enc W1, folded dec W) in bf16,
       - reshape biases to (1, n) lane rows.
       No feature padding: the kernel works on the native D=6807 directly."""
    d_in = enc_params[0][0].shape[0]

    flat = []
    for i, (w, b) in enumerate(enc_params):
        w = jnp.asarray(w, jnp.float32)
        b = jnp.asarray(b, jnp.float32)
        if i == 0:
            w = w.astype(jnp.bfloat16)      # dominant weight bytes; MXU-native
        flat += [w, b.reshape(1, -1)]

    # Fold decoder: no nonlinearity between its Linear layers, so the whole
    # decoder is a single affine map  h @ W_fold + b_fold  (exact in f32).
    w_fold = jnp.asarray(dec_params[0][0], jnp.float32)
    b_fold = jnp.asarray(dec_params[0][1], jnp.float32)
    for (w, b) in dec_params[1:]:
        w = jnp.asarray(w, jnp.float32)
        b = jnp.asarray(b, jnp.float32)
        b_fold = b_fold @ w + b
        w_fold = w_fold @ w
    flat += [w_fold.astype(jnp.bfloat16), b_fold.reshape(1, -1)]

    return PreparedParams(flat=tuple(flat), num_enc=len(enc_params),
                          input_dim=d_in)


def make_autorec_kernel(num_enc, dec_chunk=_DEC_CHUNK):
    """Kernel: full encoder + folded decoder for one (TM, D) batch tile."""

    def kernel(x_ref, *refs):
        o_ref = refs[-1]
        params = refs[:-1]                 # alternating (w, b) refs
        h = x_ref[...]                     # bf16 (TM, D)
        idx = 0
        # ---- encoder: Linear -> Sigmoid; Dropout == identity at eval.
        for _ in range(num_enc):
            w = params[idx][...]           # layer 0: bf16 (matches bf16 h), rest f32
            b = params[idx + 1][...]       # f32 (1, n)
            idx += 2
            z = jnp.dot(h, w, preferred_element_type=jnp.float32) + b
            h = jax.nn.sigmoid(z)          # f32
        # ---- decoder: single folded affine map ('none' activation).
        w = params[idx][...]               # bf16 (H, D)
        b = params[idx + 1][...]           # f32 (1, D)
        h = h.astype(w.dtype)              # (TM, H) bf16 -> MXU-native operands
        n_out = o_ref.shape[1]
        # Lane-chunked output: never materialize a (TM, D) f32 temp in VMEM.
        for n0 in range(0, n_out, dec_chunk):
            nc = min(dec_chunk, n_out - n0)
            z = jnp.dot(h, w[:, n0:n0 + nc],
                        preferred_element_type=jnp.float32) + b[:, n0:n0 + nc]
            o_ref[:, n0:n0 + nc] = z.astype(o_ref.dtype)

    return kernel


def _device_config():
    """(max batch tile, scoped-VMEM limit bytes, min #grid steps for megacore)."""
    try:
        kind = jax.devices()[0].device_kind.lower()
    except Exception:
        kind = ""
    if "v6" in kind:    # 128 MiB VMEM, 1 TC, ~1.4 TB/s HBM
        return 1024, 110 << 20, 1
    if "v7" in kind:    # 64 MiB physical VMEM, 2 TCs -> want >=2 parallel steps
        return 512, 56 << 20, 2
    if "v5" in kind:    # 128 MiB VMEM, ~0.8 TB/s HBM
        return 512, 64 << 20, 1
    return 256, 48 << 20, 1


def _choose_tm(batch, tm_max, min_steps):
    """Largest batch tile within tm_max, split into >= min_steps grid steps when
    the batch is big enough (v7x megacore), and (8,128)-rule compliant."""
    if batch <= 8:
        return batch                       # block dim == full array dim (legal)
    cap = tm_max
    if min_steps > 1 and batch > 8 * min_steps:
        cap = min(cap, _round_up(-(-batch // min_steps), 8))
    if batch <= cap:
        return batch if batch % 8 == 0 else _round_up(batch, 8)
    return cap


def autorec_forward(x, prepared: PreparedParams, out_dtype=jnp.bfloat16):
    """x: (B, INPUT_DIM). Returns the (B, INPUT_DIM) reconstruction (bf16 by
    default; pass out_dtype=jnp.float32 if downstream needs full precision)."""
    B, D = x.shape
    assert D == prepared.input_dim
    flat = prepared.flat

    # Activations travel as bf16 (halves the dominant HBM bytes); all dots
    # still accumulate in f32 inside the kernel.
    # TODO(synk): ideally the upstream producer already emits bf16 so this
    #             cast never runs in the forward path.
    if x.dtype != jnp.bfloat16:
        x = x.astype(jnp.bfloat16)

    tm_max, vmem_limit, min_steps = _device_config()
    TM = _choose_tm(B, tm_max, min_steps)
    grid = (pl.cdiv(B, TM),)

    in_specs = [pl.BlockSpec((TM, D), lambda i: (i, 0))]
    # Weights/biases: whole-array blocks with constant index maps -> fetched
    # once and resident in VMEM across all batch grid steps (~0.7 MB bf16).
    in_specs += [pl.BlockSpec(p.shape, lambda i: (0, 0)) for p in flat]
    out_spec = pl.BlockSpec((TM, D), lambda i: (i, 0))

    weights = flat[0::2]
    flops = int(sum(2 * B * w.shape[0] * w.shape[1] for w in weights))
    transcend = int(B * sum(flat[2 * l].shape[1]
                            for l in range(prepared.num_enc)))
    bytes_acc = int(x.size * x.dtype.itemsize
                    + B * D * jnp.dtype(out_dtype).itemsize
                    + sum(p.size * p.dtype.itemsize for p in flat))

    return pl.pallas_call(
        make_autorec_kernel(prepared.num_enc),
        out_shape=jax.ShapeDtypeStruct((B, D), out_dtype),
        grid=grid,
        in_specs=in_specs,
        out_specs=out_spec,
        compiler_params=pltpu.CompilerParams(
            dimension_semantics=("parallel",),
            vmem_limit_bytes=vmem_limit,
        ),
        cost_estimate=pl.CostEstimate(
            flops=flops, transcendentals=transcend, bytes_accessed=bytes_acc),
    )(x, *flat)


def init_params(key):
    """Xavier-normal weights (stored as (in, out)), zero biases — matches
    torch.nn.init.xavier_normal_ + bias.zero_()."""
    enc_layers = [INPUT_DIM] + [HIDDEN_SIZE // 2 ** i for i in range(NUM_LAYERS)]
    dec_layers = enc_layers[::-1]

    def xavier(k, fan_in, fan_out):
        std = (2.0 / (fan_in + fan_out)) ** 0.5
        return std * jax.random.normal(k, (fan_in, fan_out), jnp.float32)

    enc_params, dec_params = [], []
    for i in range(NUM_LAYERS):
        key, sk = jax.random.split(key)
        enc_params.append(
            (xavier(sk, enc_layers[i], enc_layers[i + 1]),
             jnp.zeros((enc_layers[i + 1],), jnp.float32))
        )
    for i in range(NUM_LAYERS):
        key, sk = jax.random.split(key)
        dec_params.append(
            (xavier(sk, dec_layers[i], dec_layers[i + 1]),
             jnp.zeros((dec_layers[i + 1],), jnp.float32))
        )
    return enc_params, dec_params


def reference_forward(x, enc_params, dec_params):
    """Plain-JAX f32 reference of the original (unfolded) forward pass."""
    h = x
    for w, b in enc_params:
        h = jax.nn.sigmoid(h @ w + b)
    for w, b in dec_params:
        h = h @ w + b
    return h


if __name__ == "__main__":
    key = jax.random.PRNGKey(0)
    key, pkey, xkey = jax.random.split(key, 3)

    enc_params, dec_params = init_params(pkey)
    prepared = prepare_params(enc_params, dec_params)   # one-time prep (hoisted)

    batch = 2
    x = jax.random.normal(xkey, (batch, INPUT_DIM), jnp.float32)

    out = autorec_forward(x, prepared)
    out = jax.block_until_ready(out)

    ref = reference_forward(x, enc_params, dec_params)
    out_f32 = out.astype(jnp.float32)
    assert out.shape == (batch, INPUT_DIM), out.shape
    assert bool(jnp.all(jnp.isfinite(out_f32)))
    # bf16 activations/output + bf16 large weights + decoder folding shift the
    # rounding slightly vs the pure-f32 reference -> 5e-3 abs tolerance
    # (precision trade-off accepted per review, not a structural bug).
    err = float(jnp.max(jnp.abs(out_f32 - ref)))
    assert err < 5e-3, f"mismatch vs JAX reference: {err}"

    print("KERNEL_OK")
</pallas_src>

<mosaic_0001>
module attributes {stable_mosaic.version = 11 : i64} {
  func.func @kernel(%arg0: i32, %arg1: memref<2x6807xbf16, #tpu.memory_space<vmem>>, %arg2: memref<6807x32xbf16, #tpu.memory_space<vmem>>, %arg3: memref<1x32xf32, #tpu.memory_space<vmem>>, %arg4: memref<32x16xf32, #tpu.memory_space<vmem>>, %arg5: memref<1x16xf32, #tpu.memory_space<vmem>>, %arg6: memref<16x6807xbf16, #tpu.memory_space<vmem>>, %arg7: memref<1x6807xf32, #tpu.memory_space<vmem>>, %arg8: memref<2x6807xbf16, #tpu.memory_space<vmem>>) attributes {dimension_semantics = [#tpu.dimension_semantics<parallel>], iteration_bounds = array<i64: 1>, scalar_prefetch = 0 : i64, scratch_operands = 0 : i64, tpu.core_type = #tpu.core_type<tc>, window_params = [{transform_indices = @transform_0, window_bounds = array<i64: 2, 6807>}, {pipeline_mode = #tpu.pipeline_mode<synchronous>, transform_indices = @transform_1, window_bounds = array<i64: 6807, 32>}, {pipeline_mode = #tpu.pipeline_mode<synchronous>, transform_indices = @transform_2, window_bounds = array<i64: 1, 32>}, {pipeline_mode = #tpu.pipeline_mode<synchronous>, transform_indices = @transform_3, window_bounds = array<i64: 32, 16>}, {pipeline_mode = #tpu.pipeline_mode<synchronous>, transform_indices = @transform_4, window_bounds = array<i64: 1, 16>}, {pipeline_mode = #tpu.pipeline_mode<synchronous>, transform_indices = @transform_5, window_bounds = array<i64: 16, 6807>}, {pipeline_mode = #tpu.pipeline_mode<synchronous>, transform_indices = @transform_6, window_bounds = array<i64: 1, 6807>}, {transform_indices = @transform_7, window_bounds = array<i64: 2, 6807>}]} {
    %c0 = arith.constant 0 : index
    %c0_0 = arith.constant 0 : index
    %0 = vector.load %arg1[%c0, %c0_0] : memref<2x6807xbf16, #tpu.memory_space<vmem>>, vector<2x6807xbf16>
    %c0_1 = arith.constant 0 : index
    %c0_2 = arith.constant 0 : index
    %1 = vector.load %arg2[%c0_1, %c0_2] : memref<6807x32xbf16, #tpu.memory_space<vmem>>, vector<6807x32xbf16>
    %c0_3 = arith.constant 0 : index
    %c0_4 = arith.constant 0 : index
    %2 = vector.load %arg3[%c0_3, %c0_4] : memref<1x32xf32, #tpu.memory_space<vmem>>, vector<1x32xf32>
    %cst = arith.constant dense<0.000000e+00> : vector<2x32xf32>
    %3 = tpu.matmul %0, %1, %cst {dimension_numbers = #tpu.dot_dimension_numbers<[1], [0], [0], [1], [0, 0, 1, 1], [], []>} : vector<2x6807xbf16>, vector<6807x32xbf16>, vector<2x32xf32> -> vector<2x32xf32>
    %4 = vector.broadcast %2 : vector<1x32xf32> to vector<2x32xf32>
    %5 = arith.addf %3, %4 : vector<2x32xf32>
    %6 = arith.negf %5 : vector<2x32xf32>
    %7 = math.exp %6 : vector<2x32xf32>
    %cst_5 = arith.constant 1.000000e+00 : f32
    %8 = vector.broadcast %cst_5 : f32 to vector<2x32xf32>
    %9 = arith.addf %8, %7 : vector<2x32xf32>
    %10 = arith.divf %8, %9 : vector<2x32xf32>
    %c0_6 = arith.constant 0 : index
    %c0_7 = arith.constant 0 : index
    %11 = vector.load %arg4[%c0_6, %c0_7] : memref<32x16xf32, #tpu.memory_space<vmem>>, vector<32x16xf32>
    %c0_8 = arith.constant 0 : index
    %c0_9 = arith.constant 0 : index
    %12 = vector.load %arg5[%c0_8, %c0_9] : memref<1x16xf32, #tpu.memory_space<vmem>>, vector<1x16xf32>
    %cst_10 = arith.constant dense<0.000000e+00> : vector<2x16xf32>
    %13 = tpu.matmul %10, %11, %cst_10 {dimension_numbers = #tpu.dot_dimension_numbers<[1], [0], [0], [1], [0, 0, 1, 1], [], []>} : vector<2x32xf32>, vector<32x16xf32>, vector<2x16xf32> -> vector<2x16xf32>
    %14 = vector.broadcast %12 : vector<1x16xf32> to vector<2x16xf32>
    %15 = arith.addf %13, %14 : vector<2x16xf32>
    %16 = arith.negf %15 : vector<2x16xf32>
    %17 = math.exp %16 : vector<2x16xf32>
    %cst_11 = arith.constant 1.000000e+00 : f32
    %18 = vector.broadcast %cst_11 : f32 to vector<2x16xf32>
    %19 = arith.addf %18, %17 : vector<2x16xf32>
    %20 = arith.divf %18, %19 : vector<2x16xf32>
    %c0_12 = arith.constant 0 : index
    %c0_13 = arith.constant 0 : index
    %21 = vector.load %arg6[%c0_12, %c0_13] : memref<16x6807xbf16, #tpu.memory_space<vmem>>, vector<16x6807xbf16>
    %c0_14 = arith.constant 0 : index
    %c0_15 = arith.constant 0 : index
    %22 = vector.load %arg7[%c0_14, %c0_15] : memref<1x6807xf32, #tpu.memory_space<vmem>>, vector<1x6807xf32>
    %23 = arith.truncf %20 : vector<2x16xf32> to vector<2x16xbf16>
    %24 = vector.extract_strided_slice %21 {offsets = [0, 0], sizes = [16, 2048], strides = [1, 1]} : vector<16x6807xbf16> to vector<16x2048xbf16>
    %cst_16 = arith.constant dense<0.000000e+00> : vector<2x2048xf32>
    %25 = tpu.matmul %23, %24, %cst_16 {dimension_numbers = #tpu.dot_dimension_numbers<[1], [0], [0], [1], [0, 0, 1, 1], [], []>} : vector<2x16xbf16>, vector<16x2048xbf16>, vector<2x2048xf32> -> vector<2x2048xf32>
    %26 = vector.extract_strided_slice %22 {offsets = [0, 0], sizes = [1, 2048], strides = [1, 1]} : vector<1x6807xf32> to vector<1x2048xf32>
    %27 = vector.broadcast %26 : vector<1x2048xf32> to vector<2x2048xf32>
    %28 = arith.addf %25, %27 : vector<2x2048xf32>
    %29 = arith.truncf %28 : vector<2x2048xf32> to vector<2x2048xbf16>
    %c0_17 = arith.constant 0 : index
    %c0_18 = arith.constant 0 : index
    %30 = vector.load %arg8[%c0_17, %c0_18] : memref<2x6807xbf16, #tpu.memory_space<vmem>>, vector<2x2048xbf16>
    tpu.vector_store %arg8[%c0_17, %c0_18], %29 {strides = array<i32>} : memref<2x6807xbf16, #tpu.memory_space<vmem>>, vector<2x2048xbf16>,
    %31 = vector.extract_strided_slice %21 {offsets = [0, 2048], sizes = [16, 2048], strides = [1, 1]} : vector<16x6807xbf16> to vector<16x2048xbf16>
    %cst_19 = arith.constant dense<0.000000e+00> : vector<2x2048xf32>
    %32 = tpu.matmul %23, %31, %cst_19 {dimension_numbers = #tpu.dot_dimension_numbers<[1], [0], [0], [1], [0, 0, 1, 1], [], []>} : vector<2x16xbf16>, vector<16x2048xbf16>, vector<2x2048xf32> -> vector<2x2048xf32>
    %33 = vector.extract_strided_slice %22 {offsets = [0, 2048], sizes = [1, 2048], strides = [1, 1]} : vector<1x6807xf32> to vector<1x2048xf32>
    %34 = vector.broadcast %33 : vector<1x2048xf32> to vector<2x2048xf32>
    %35 = arith.addf %32, %34 : vector<2x2048xf32>
    %36 = arith.truncf %35 : vector<2x2048xf32> to vector<2x2048xbf16>
    %c0_20 = arith.constant 0 : index
    %c2048 = arith.constant 2048 : index
    %37 = vector.load %arg8[%c0_20, %c2048] : memref<2x6807xbf16, #tpu.memory_space<vmem>>, vector<2x2048xbf16>
    tpu.vector_store %arg8[%c0_20, %c2048], %36 {strides = array<i32>} : memref<2x6807xbf16, #tpu.memory_space<vmem>>, vector<2x2048xbf16>,
    %38 = vector.extract_strided_slice %21 {offsets = [0, 4096], sizes = [16, 2048], strides = [1, 1]} : vector<16x6807xbf16> to vector<16x2048xbf16>
    %cst_21 = arith.constant dense<0.000000e+00> : vector<2x2048xf32>
    %39 = tpu.matmul %23, %38, %cst_21 {dimension_numbers = #tpu.dot_dimension_numbers<[1], [0], [0], [1], [0, 0, 1, 1], [], []>} : vector<2x16xbf16>, vector<16x2048xbf16>, vector<2x2048xf32> -> vector<2x2048xf32>
    %40 = vector.extract_strided_slice %22 {offsets = [0, 4096], sizes = [1, 2048], strides = [1, 1]} : vector<1x6807xf32> to vector<1x2048xf32>
    %41 = vector.broadcast %40 : vector<1x2048xf32> to vector<2x2048xf32>
    %42 = arith.addf %39, %41 : vector<2x2048xf32>
    %43 = arith.truncf %42 : vector<2x2048xf32> to vector<2x2048xbf16>
    %c0_22 = arith.constant 0 : index
    %c4096 = arith.constant 4096 : index
    %44 = vector.load %arg8[%c0_22, %c4096] : memref<2x6807xbf16, #tpu.memory_space<vmem>>, vector<2x2048xbf16>
    tpu.vector_store %arg8[%c0_22, %c4096], %43 {strides = array<i32>} : memref<2x6807xbf16, #tpu.memory_space<vmem>>, vector<2x2048xbf16>,
    %45 = vector.extract_strided_slice %21 {offsets = [0, 6144], sizes = [16, 663], strides = [1, 1]} : vector<16x6807xbf16> to vector<16x663xbf16>
    %cst_23 = arith.constant dense<0.000000e+00> : vector<2x663xf32>
    %46 = tpu.matmul %23, %45, %cst_23 {dimension_numbers = #tpu.dot_dimension_numbers<[1], [0], [0], [1], [0, 0, 1, 1], [], []>} : vector<2x16xbf16>, vector<16x663xbf16>, vector<2x663xf32> -> vector<2x663xf32>
    %47 = vector.extract_strided_slice %22 {offsets = [0, 6144], sizes = [1, 663], strides = [1, 1]} : vector<1x6807xf32> to vector<1x663xf32>
    %48 = vector.broadcast %47 : vector<1x663xf32> to vector<2x663xf32>
    %49 = arith.addf %46, %48 : vector<2x663xf32>
    %50 = arith.truncf %49 : vector<2x663xf32> to vector<2x663xbf16>
    %c0_24 = arith.constant 0 : index
    %c6144 = arith.constant 6144 : index
    %51 = vector.load %arg8[%c0_24, %c6144] : memref<2x6807xbf16, #tpu.memory_space<vmem>>, vector<2x663xbf16>
    tpu.vector_store %arg8[%c0_24, %c6144], %50 {strides = array<i32>} : memref<2x6807xbf16, #tpu.memory_space<vmem>>, vector<2x663xbf16>,
    return
  }
  func.func @transform_0(%arg0: i32) -> (i32, i32) {
    %c0_i32 = arith.constant 0 : i32
    %c0_i32_0 = arith.constant 0 : i32
    return %arg0, %c0_i32 : i32, i32
  }
  func.func @transform_1(%arg0: i32) -> (i32, i32) {
    %c0_i32 = arith.constant 0 : i32
    %c0_i32_0 = arith.constant 0 : i32
    %c0_i32_1 = arith.constant 0 : i32
    return %c0_i32, %c0_i32_0 : i32, i32
  }
  func.func @transform_2(%arg0: i32) -> (i32, i32) {
    %c0_i32 = arith.constant 0 : i32
    %c0_i32_0 = arith.constant 0 : i32
    %c0_i32_1 = arith.constant 0 : i32
    return %c0_i32, %c0_i32_0 : i32, i32
  }
  func.func @transform_3(%arg0: i32) -> (i32, i32) {
    %c0_i32 = arith.constant 0 : i32
    %c0_i32_0 = arith.constant 0 : i32
    %c0_i32_1 = arith.constant 0 : i32
    return %c0_i32, %c0_i32_0 : i32, i32
  }
  func.func @transform_4(%arg0: i32) -> (i32, i32) {
    %c0_i32 = arith.constant 0 : i32
    %c0_i32_0 = arith.constant 0 : i32
    %c0_i32_1 = arith.constant 0 : i32
    return %c0_i32, %c0_i32_0 : i32, i32
  }
  func.func @transform_5(%arg0: i32) -> (i32, i32) {
    %c0_i32 = arith.constant 0 : i32
    %c0_i32_0 = arith.constant 0 : i32
    %c0_i32_1 = arith.constant 0 : i32
    return %c0_i32, %c0_i32_0 : i32, i32
  }
  func.func @transform_6(%arg0: i32) -> (i32, i32) {
    %c0_i32 = arith.constant 0 : i32
    %c0_i32_0 = arith.constant 0 : i32
    %c0_i32_1 = arith.constant 0 : i32
    return %c0_i32, %c0_i32_0 : i32, i32
  }
  func.func @transform_7(%arg0: i32) -> (i32, i32) {
    %c0_i32 = arith.constant 0 : i32
    %c0_i32_0 = arith.constant 0 : i32
    return %arg0, %c0_i32 : i32, i32
  }
}

</mosaic_0001>

<bundles_post_ra>
// kernel: tpu_custom_call.1
= control target key start
LH: loop header
LB: loop body
LE: loop exit
PB: predicated region body
PF: predicated region fallthrough
CT: control target
= control target key end

     0   :  { %s10154_s0 = inlined_call_operand.vmem [shape: bf16[2,6807], index: 0, kind: input, shape index: {}]   ;;  %s10155_s1 = inlined_call_operand.vmem [shape: bf16[6807,32], index: 1, kind: input, shape index: {}]   ;;  %s10156_s2 = inlined_call_operand.vmem [shape: f32[1,32], index: 2, kind: input, shape index: {}]   ;;  %s10157_s3 = inlined_call_operand.vmem [shape: f32[32,16], index: 3, kind: input, shape index: {}]   ;;  %s10158_s4 = inlined_call_operand.vmem [shape: f32[1,16], index: 4, kind: input, shape index: {}]   ;;  %s10159_s5 = inlined_call_operand.vmem [shape: bf16[16,6807], index: 5, kind: input, shape index: {}]   ;;  %s10160_s6 = inlined_call_operand.vmem [shape: f32[1,6807], index: 6, kind: input, shape index: {}]   ;;  %s10161_s7 = inlined_call_operand.hbm [shape: bf16[2,6807], index: 7, kind: output, shape index: {}]  }
   0x1   :  { %v7727_v0 = vld [vmem:[%s10155_s1 + $0x38] sm:$0xff]  ;;  %v7726_v4 = vld [vmem:[%s10155_s1 + $0x30] sm:$0xff]  ;;  %v7725_v8 = vld [vmem:[%s10155_s1 + $0x28] sm:$0xff] }
   0x2   :  { %v7743_v1 = vld [vmem:[%s10155_s1 + $0xb8] sm:$0xff]  ;;  %3574 = vmatpush.bf16.msra.mxu0 %v7727_v0  ;;  %v7742_v5 = vld [vmem:[%s10155_s1 + $0xb0] sm:$0xff]  ;;  %v7741_v9 = vld [vmem:[%s10155_s1 + $0xa8] sm:$0xff] }
   0x3   :  { %v7735_v2 = vld [vmem:[%s10155_s1 + $0x78] sm:$0xff]  ;;  %3600 = vmatpush.bf16.msra.mxu2 %v7743_v1  ;;  %v7734_v6 = vld [vmem:[%s10155_s1 + $0x70] sm:$0xff]  ;;  %v7733_v10 = vld [vmem:[%s10155_s1 + $0x68] sm:$0xff] }
   0x4   :  { %v7751_v3 = vld [vmem:[%s10155_s1 + $0xf8] sm:$0xff]  ;;  %3587 = vmatpush.bf16.msra.mxu1 %v7735_v2  ;;  %v7750_v7 = vld [vmem:[%s10155_s1 + $0xf0] sm:$0xff]  ;;  %v7749_v11 = vld [vmem:[%s10155_s1 + $0xe8] sm:$0xff] }
   0x5   :  { %3613 = vmatpush.bf16.msra.mxu3 %v7751_v3  ;;  %v7724_v12 = vld [vmem:[%s10155_s1 + $0x20] sm:$0xff]  ;;  %v7723_v16 = vld [vmem:[%s10155_s1 + $0x18] sm:$0xff]  ;;  %v7722_v21 = vld [vmem:[%s10155_s1 + $0x10] sm:$0xff] }
   0x6   :  { %3575 = vmatpush.bf16.msra.mxu0 %v7726_v4  ;;  %v7740_v13 = vld [vmem:[%s10155_s1 + $0xa0] sm:$0xff]  ;;  %v7739_v17 = vld [vmem:[%s10155_s1 + $0x98] sm:$0xff]  ;;  %v7738_v22 = vld [vmem:[%s10155_s1 + $0x90] sm:$0xff] }
   0x7   :  { %3601 = vmatpush.bf16.msra.mxu2 %v7742_v5  ;;  %v7732_v14 = vld [vmem:[%s10155_s1 + $0x60] sm:$0xff]  ;;  %v7731_v18 = vld [vmem:[%s10155_s1 + $0x58] sm:$0xff]  ;;  %v7730_v23 = vld [vmem:[%s10155_s1 + $0x50] sm:$0xff] }
   0x8   :  { %3588 = vmatpush.bf16.msra.mxu1 %v7734_v6  ;;  %v7748_v15 = vld [vmem:[%s10155_s1 + $0xe0] sm:$0xff]  ;;  %v7747_v19 = vld [vmem:[%s10155_s1 + $0xd8] sm:$0xff]  ;;  %v7746_v24 = vld [vmem:[%s10155_s1 + $0xd0] sm:$0xff] }
   0x9   :  { %3614 = vmatpush.bf16.msra.mxu3 %v7750_v7  ;;  %v28_v20 = vld [vmem:[%s10154_s0] sm:$0xff] }
   0xa   :  { %3576 = vmatpush.bf16.msra.mxu0 %v7725_v8  ;;  %891 = vst [vmem:[#allocation1] ss:$9 sm:$0xff] %v28_v20 }
   0xb   :  { %3602 = vmatpush.bf16.msra.mxu2 %v7741_v9 }
   0xc   :  { %3589 = vmatpush.bf16.msra.mxu1 %v7733_v10 }
   0xd   :  { %3615 = vmatpush.bf16.msra.mxu3 %v7749_v11 }
   0xe   :  { %3577 = vmatpush.bf16.msra.mxu0 %v7724_v12 }
   0xf   :  { %3603 = vmatpush.bf16.msra.mxu2 %v7740_v13 }
  0x10   :  { %3590 = vmatpush.bf16.msra.mxu1 %v7732_v14 }
  0x11   :  { %3616 = vmatpush.bf16.msra.mxu3 %v7748_v15 }
  0x12   :  { %3578 = vmatpush.bf16.msra.mxu0 %v7723_v16 }
  0x13   :  { %3604 = vmatpush.bf16.msra.mxu2 %v7739_v17 }
  0x14   :  { %3591 = vmatpush.bf16.msra.mxu1 %v7731_v18 }
  0x15   :  { %3617 = vmatpush.bf16.msra.mxu3 %v7747_v19 }
  0x16   :  { %12 = vsyncpa [#allocation3], 0  ;;  %3579 = vmatpush.bf16.msra.mxu0 %v7722_v21  ;;  %v7721_v25 = vld [vmem:[%s10155_s1 + $0x8] sm:$0xff]  ;;  %v7720_v29 = vld [vmem:[%s10155_s1] sm:$0xff]  ;;  %vm3567_vm0 = vcmask 1042432   ;;  %vm3568_vm1 = vcmask 1043456  }
  0x17   :  { %3605 = vmatpush.bf16.msra.mxu2 %v7738_v22  ;;  %v7737_v26 = vld [vmem:[%s10155_s1 + $0x88] sm:$0xff]  ;;  %v7736_v30 = vld [vmem:[%s10155_s1 + $0x80] sm:$0xff]  ;;  %v7759_v31 = vld [vmem:[%s10155_s1 + $0x138] sm:$0xff]  ;;  %vm3564_vm2 = vcmask 187392   ;;  %vm4303_vm6 = vcmask 261120   ;;  %vm4522_vm12 = vcmask 130048  }
  0x18   :  { %3592 = vmatpush.bf16.msra.mxu1 %v7730_v23  ;;  %v7729_v27 = vld [vmem:[%s10155_s1 + $0x48] sm:$0xff]  ;;  %v7775_v32 = vld [vmem:[%s10155_s1 + $0x1b8] sm:$0xff]  ;;  %v7728_v33 = vld [vmem:[%s10155_s1 + $0x40] sm:$0xff]  ;;  %vm4768_vm13 = vcmask 1042434   ;;  %vm4764_vm14 = vcmask 1040384   ;;  %vm4772_vm15 = vcmask 1041408  }
  0x19   :  { %3618 = vmatpush.bf16.msra.mxu3 %v7746_v24  ;;  %v7745_v28 = vld [vmem:[%s10155_s1 + $0xc8] sm:$0xff]  ;;  %v7744_v34 = vld [vmem:[%s10155_s1 + $0xc0] sm:$0xff]  ;;  %v7767_v35 = vld [vmem:[%s10155_s1 + $0x178] sm:$0xff]  ;;  %s5737_s30 = sshll.u32 %s10161_s7, 4  ;;  %s5738_s30 = int_to_ptr.hbm [resolvable:$true] %s5737_s30 }
  0x1a   :  { %3580 = vmatpush.bf16.msra.mxu0 %v7721_v25  ;;  %v7783_v36 = vld [vmem:[%s10155_s1 + $0x1f8] sm:$0xff]  ;;  %v7758_v37 = vld [vmem:[%s10155_s1 + $0x130] sm:$0xff]  ;;  %v892_v40 = vld [vmem:[#allocation1] sm:$0xff] }
  0x1b   :  { %3606 = vmatpush.bf16.msra.mxu2 %v7737_v26  ;;  %v7774_v38 = vld [vmem:[%s10155_s1 + $0x1b0] sm:$0xff]  ;;  %v895_v43 = vld [vmem:[#allocation1 + $0x1b] sm:$0xff]  ;;  %v7757_v45 = vld [vmem:[%s10155_s1 + $0x128] sm:$0xff] }
  0x1c   :  { %3593 = vmatpush.bf16.msra.mxu1 %v7729_v27  ;;  %v894_v39 = vld [vmem:[#allocation1 + $0x12] sm:$0xff]  ;;  %v893_v44 = vld [vmem:[#allocation1 + $0x9] sm:$0xff]  ;;  %v8412_v49 = vld [vmem:[#allocation1 + $0x3f] sm:$0xff] }
  0x1d   :  { %3619 = vmatpush.bf16.msra.mxu3 %v7745_v28  ;;  %v7766_v41 = vld [vmem:[%s10155_s1 + $0x170] sm:$0xff]  ;;  %v7773_v46 = vld [vmem:[%s10155_s1 + $0x1a8] sm:$0xff]  ;;  %v7756_v54 = vld [vmem:[%s10155_s1 + $0x120] sm:$0xff] }
  0x1e   :  { %3581 = vmatpush.bf16.msra.mxu0 %v7720_v29  ;;  %v7782_v42 = vld [vmem:[%s10155_s1 + $0x1f0] sm:$0xff]  ;;  %v8410_v48 = vld [vmem:[#allocation1 + $0x24] sm:$0xff]  ;;  %v7755_v58 = vld [vmem:[%s10155_s1 + $0x118] sm:$0xff] }
  0x1f   :  { %3607 = vmatpush.bf16.msra.mxu2 %v7736_v30  ;;  %v8408_v47 = vld [vmem:[#allocation1 + $0x36] sm:$0xff]  ;;  %v29_v50 = vld [vmem:[%s10154_s0 + $0x8] sm:$0xff]  ;;  %v7772_v55 = vld [vmem:[%s10155_s1 + $0x1a0] sm:$0xff] }
  0x20   :  { %3594 = vmatpush.bf16.msra.mxu1 %v7728_v33  ;;  %v8417_v51 = vld [vmem:[#allocation1 + $0x2d] sm:$0xff]  ;;  %v7764_v56 = vld [vmem:[%s10155_s1 + $0x160] sm:$0xff]  ;;  %v7771_v59 = vld [vmem:[%s10155_s1 + $0x198] sm:$0xff] }
  0x21   :  { %3620 = vmatpush.bf16.msra.mxu3 %v7744_v34  ;;  %3582 = vmatmul.bf16.vlgmr.msra.gmra.mxu0 %v892_v40  ;;  %v7765_v52 = vld [vmem:[%s10155_s1 + $0x168] sm:$0xff]  ;;  %901 = vst [vmem:[#allocation1] ss:$9 sm:$0xff] %v29_v50  ;;  %v7780_v57 = vld [vmem:[%s10155_s1 + $0x1e0] sm:$0xff]  ;;  %v7763_v60 = vld [vmem:[%s10155_s1 + $0x158] sm:$0xff] }
  0x22   :  { %3626 = vmatpush.bf16.msrb.mxu0 %v7759_v31  ;;  %3608 = vmatmul.bf16.vlgmr.msra.gmra.mxu2 %v894_v39  ;;  %v7781_v53 = vld [vmem:[%s10155_s1 + $0x1e8] sm:$0xff]  ;;  %v7779_v61 = vld [vmem:[%s10155_s1 + $0x1d8] sm:$0xff]  ;;  %v7754_v62 = vld [vmem:[%s10155_s1 + $0x110] sm:$0xff] }
  0x23   :  { %3652 = vmatpush.bf16.msrb.mxu2 %v7775_v32  ;;  %3595 = vmatmul.bf16.vlgmr.msra.gmra.mxu1 %v893_v44  ;;  %v7770_v63 = vld [vmem:[%s10155_s1 + $0x190] sm:$0xff]  ;;  %v7753_v2 = vld [vmem:[%s10155_s1 + $0x108] sm:$0xff]  ;;  %v7752_v6 = vld [vmem:[%s10155_s1 + $0x100] sm:$0xff] }
  0x24   :  { %3639 = vmatpush.bf16.msrb.mxu1 %v7767_v35  ;;  %3621 = vmatmul.bf16.vlgmr.msra.gmra.mxu3 %v895_v43  ;;  %v7762_v0 = vld [vmem:[%s10155_s1 + $0x150] sm:$0xff]  ;;  %v7769_v3 = vld [vmem:[%s10155_s1 + $0x188] sm:$0xff]  ;;  %v7768_v7 = vld [vmem:[%s10155_s1 + $0x180] sm:$0xff] }
  0x25   :  { %3665 = vmatpush.bf16.msrb.mxu3 %v7783_v36  ;;  %v7778_v1 = vld [vmem:[%s10155_s1 + $0x1d0] sm:$0xff]  ;;  %v7761_v4 = vld [vmem:[%s10155_s1 + $0x148] sm:$0xff]  ;;  %v7791_v8 = vld [vmem:[%s10155_s1 + $0x238] sm:$0xff] }
  0x26   :  { %3627 = vmatpush.bf16.msrb.mxu0 %v7758_v37  ;;  %v7777_v5 = vld [vmem:[%s10155_s1 + $0x1c8] sm:$0xff]  ;;  %v7807_v9 = vld [vmem:[%s10155_s1 + $0x2b8] sm:$0xff]  ;;  %v7760_v10 = vld [vmem:[%s10155_s1 + $0x140] sm:$0xff] }
  0x27   :  { %3653 = vmatpush.bf16.msrb.mxu2 %v7774_v38  ;;  %v7776_v11 = vld [vmem:[%s10155_s1 + $0x1c0] sm:$0xff]  ;;  %v7799_v12 = vld [vmem:[%s10155_s1 + $0x278] sm:$0xff]  ;;  %v7790_v14 = vld [vmem:[%s10155_s1 + $0x230] sm:$0xff] }
  0x28   :  { %3640 = vmatpush.bf16.msrb.mxu1 %v7766_v41  ;;  %v7815_v13 = vld [vmem:[%s10155_s1 + $0x2f8] sm:$0xff]  ;;  %v7806_v15 = vld [vmem:[%s10155_s1 + $0x2b0] sm:$0xff]  ;;  %v7789_v18 = vld [vmem:[%s10155_s1 + $0x228] sm:$0xff] }
  0x29   :  { %3666 = vmatpush.bf16.msrb.mxu3 %v7782_v42  ;;  %v7798_v16 = vld [vmem:[%s10155_s1 + $0x270] sm:$0xff]  ;;  %v7805_v19 = vld [vmem:[%s10155_s1 + $0x2a8] sm:$0xff]  ;;  %v7788_v22 = vld [vmem:[%s10155_s1 + $0x220] sm:$0xff] }
  0x2a   :  { %3628 = vmatpush.bf16.msrb.mxu0 %v7757_v45  ;;  %v7814_v17 = vld [vmem:[%s10155_s1 + $0x2f0] sm:$0xff]  ;;  %v7797_v20 = vld [vmem:[%s10155_s1 + $0x268] sm:$0xff]  ;;  %v7804_v23 = vld [vmem:[%s10155_s1 + $0x2a0] sm:$0xff] }
  0x2b   :  { %3654 = vmatpush.bf16.msrb.mxu2 %v7773_v46  ;;  %v7813_v21 = vld [vmem:[%s10155_s1 + $0x2e8] sm:$0xff]  ;;  %v7796_v24 = vld [vmem:[%s10155_s1 + $0x260] sm:$0xff]  ;;  %v7787_v26 = vld [vmem:[%s10155_s1 + $0x218] sm:$0xff] }
  0x2c   :  { %3641 = vmatpush.bf16.msrb.mxu1 %v7765_v52  ;;  %v7812_v25 = vld [vmem:[%s10155_s1 + $0x2e0] sm:$0xff]  ;;  %v7803_v27 = vld [vmem:[%s10155_s1 + $0x298] sm:$0xff]  ;;  %v7786_v30 = vld [vmem:[%s10155_s1 + $0x210] sm:$0xff] }
  0x2d   :  { %3667 = vmatpush.bf16.msrb.mxu3 %v7781_v53  ;;  %v7795_v28 = vld [vmem:[%s10155_s1 + $0x258] sm:$0xff]  ;;  %v7802_v31 = vld [vmem:[%s10155_s1 + $0x290] sm:$0xff]  ;;  %v7785_v34 = vld [vmem:[%s10155_s1 + $0x208] sm:$0xff] }
  0x2e   :  { %3629 = vmatpush.bf16.msrb.mxu0 %v7756_v54  ;;  %v7811_v29 = vld [vmem:[%s10155_s1 + $0x2d8] sm:$0xff]  ;;  %v7794_v32 = vld [vmem:[%s10155_s1 + $0x250] sm:$0xff]  ;;  %v7801_v35 = vld [vmem:[%s10155_s1 + $0x288] sm:$0xff] }
  0x2f   :  { %3655 = vmatpush.bf16.msrb.mxu2 %v7772_v55  ;;  %v7810_v33 = vld [vmem:[%s10155_s1 + $0x2d0] sm:$0xff]  ;;  %v7793_v36 = vld [vmem:[%s10155_s1 + $0x248] sm:$0xff]  ;;  %v7784_v38 = vld [vmem:[%s10155_s1 + $0x200] sm:$0xff] }
  0x30   :  { %3642 = vmatpush.bf16.msrb.mxu1 %v7764_v56  ;;  %v7809_v37 = vld [vmem:[%s10155_s1 + $0x2c8] sm:$0xff]  ;;  %v7800_v39 = vld [vmem:[%s10155_s1 + $0x280] sm:$0xff]  ;;  %v7823_v40 = vld [vmem:[%s10155_s1 + $0x338] sm:$0xff] }
  0x31   :  { %3668 = vmatpush.bf16.msrb.mxu3 %v7780_v57  ;;  %v7839_v41 = vld [vmem:[%s10155_s1 + $0x3b8] sm:$0xff]  ;;  %v7792_v42 = vld [vmem:[%s10155_s1 + $0x240] sm:$0xff]  ;;  %v7822_v50 = vld [vmem:[%s10155_s1 + $0x330] sm:$0xff] }
  0x32   :  { %3630 = vmatpush.bf16.msrb.mxu0 %v7755_v58  ;;  %v7808_v43 = vld [vmem:[%s10155_s1 + $0x2c0] sm:$0xff]  ;;  %v7831_v44 = vld [vmem:[%s10155_s1 + $0x378] sm:$0xff]  ;;  %v7830_v52 = vld [vmem:[%s10155_s1 + $0x370] sm:$0xff] }
  0x33   :  { %3656 = vmatpush.bf16.msrb.mxu2 %v7771_v59  ;;  %v902_v45 = vld [vmem:[#allocation1] sm:$0xff]  ;;  %v904_v46 = vld [vmem:[#allocation1 + $0x12] sm:$0xff]  ;;  %v7821_v54 = vld [vmem:[%s10155_s1 + $0x328] sm:$0xff] }
  0x34   :  { %3643 = vmatpush.bf16.msrb.mxu1 %v7763_v60  ;;  %v7846_v53 = vld [vmem:[%s10155_s1 + $0x3f0] sm:$0xff]  ;;  %v7837_v55 = vld [vmem:[%s10155_s1 + $0x3a8] sm:$0xff]  ;;  %v7820_v58 = vld [vmem:[%s10155_s1 + $0x320] sm:$0xff] }
  0x35   :  { %3669 = vmatpush.bf16.msrb.mxu3 %v7779_v61  ;;  %v7829_v56 = vld [vmem:[%s10155_s1 + $0x368] sm:$0xff]  ;;  %v7836_v59 = vld [vmem:[%s10155_s1 + $0x3a0] sm:$0xff] }
  0x36   :  { %3631 = vmatpush.bf16.msrb.mxu0 %v7754_v62  ;;  %v7845_v57 = vld [vmem:[%s10155_s1 + $0x3e8] sm:$0xff]  ;;  %v7828_v60 = vld [vmem:[%s10155_s1 + $0x360] sm:$0xff]  ;;  %v7819_v62 = vld [vmem:[%s10155_s1 + $0x318] sm:$0xff] }
  0x37   :  { %3657 = vmatpush.bf16.msrb.mxu2 %v7770_v63  ;;  %v7844_v61 = vld [vmem:[%s10155_s1 + $0x3e0] sm:$0xff]  ;;  %v7835_v63 = vld [vmem:[%s10155_s1 + $0x398] sm:$0xff] }
  0x38   :  { %3644 = vmatpush.bf16.msrb.mxu1 %v7762_v0  ;;  %v7827_v0 = vld [vmem:[%s10155_s1 + $0x358] sm:$0xff] }
  0x39   :  { %3670 = vmatpush.bf16.msrb.mxu3 %v7778_v1  ;;  %v7843_v1 = vld [vmem:[%s10155_s1 + $0x3d8] sm:$0xff] }
  0x3a   :  { %3632 = vmatpush.bf16.msrb.mxu0 %v7753_v2  ;;  %v7818_v2 = vld [vmem:[%s10155_s1 + $0x310] sm:$0xff] }
  0x3b   :  { %3658 = vmatpush.bf16.msrb.mxu2 %v7769_v3  ;;  %v7834_v3 = vld [vmem:[%s10155_s1 + $0x390] sm:$0xff] }
  0x3c   :  { %3645 = vmatpush.bf16.msrb.mxu1 %v7761_v4  ;;  %v7826_v4 = vld [vmem:[%s10155_s1 + $0x350] sm:$0xff] }
  0x3d   :  { %3671 = vmatpush.bf16.msrb.mxu3 %v7777_v5  ;;  %v7842_v5 = vld [vmem:[%s10155_s1 + $0x3d0] sm:$0xff] }
  0x3e   :  { %3633 = vmatpush.bf16.msrb.mxu0 %v7752_v6  ;;  %v7817_v6 = vld [vmem:[%s10155_s1 + $0x308] sm:$0xff] }
  0x3f   :  { %3659 = vmatpush.bf16.msrb.mxu2 %v7768_v7  ;;  %v7833_v7 = vld [vmem:[%s10155_s1 + $0x388] sm:$0xff] }
  0x40   :  { %3646 = vmatpush.bf16.msrb.mxu1 %v7760_v10  ;;  %v907_v10 = vld [vmem:[#allocation1 + $0x2d] sm:$0xff] }
  0x41   :  { %3672 = vmatpush.bf16.msrb.mxu3 %v7776_v11  ;;  %3634 = vmatmul.bf16.vlgmr.msrb.gmra.mxu0 %v8410_v48  ;;  %v903_v48 = vld [vmem:[#allocation1 + $0x9] sm:$0xff]  ;;  %v909_v11 = vld [vmem:[#allocation1 + $0x3f] sm:$0xff] }
  0x42   :  { %3678 = vmatpush.bf16.msra.mxu0 %v7791_v8  ;;  %3660 = vmatmul.bf16.vlgmr.msrb.gmra.mxu2 %v8408_v47  ;;  %v7847_v47 = vld [vmem:[%s10155_s1 + $0x3f8] sm:$0xff]  ;;  %v906_v8 = vld [vmem:[#allocation1 + $0x24] sm:$0xff] }
  0x43   :  { %3704 = vmatpush.bf16.msra.mxu2 %v7807_v9  ;;  %3647 = vmatmul.bf16.vlgmr.msrb.gmra.mxu1 %v8417_v51  ;;  %v7838_v51 = vld [vmem:[%s10155_s1 + $0x3b0] sm:$0xff] }
  0x44   :  { %3691 = vmatpush.bf16.msra.mxu1 %v7799_v12  ;;  %3673 = vmatmul.bf16.vlgmr.msrb.gmra.mxu3 %v8412_v49  ;;  %v905_v49 = vld [vmem:[#allocation1 + $0x1b] sm:$0xff]  ;;  %v30_v12 = vld [vmem:[%s10154_s0 + $0x10] sm:$0xff] }
  0x45   :  { %3717 = vmatpush.bf16.msra.mxu3 %v7815_v13  ;;  %v908_v9 = vld [vmem:[#allocation1 + $0x36] sm:$0xff]  ;;  %v7825_v13 = vld [vmem:[%s10155_s1 + $0x348] sm:$0xff] }
  0x46   :  { %3679 = vmatpush.bf16.msra.mxu0 %v7790_v14  ;;  %911 = vst [vmem:[#allocation1] ss:$9 sm:$0xff] %v30_v12  ;;  %v7841_v14 = vld [vmem:[%s10155_s1 + $0x3c8] sm:$0xff]  ;;  %v7899_v12 = vld [vmem:[%s10155_s1 + $0x598] sm:$0xff] }
  0x47   :  { %3705 = vmatpush.bf16.msra.mxu2 %v7806_v15  ;;  %v7816_v15 = vld [vmem:[%s10155_s1 + $0x300] sm:$0xff] }
  0x48   :  { %3692 = vmatpush.bf16.msra.mxu1 %v7798_v16  ;;  %v7832_v16 = vld [vmem:[%s10155_s1 + $0x380] sm:$0xff] }
  0x49   :  { %3718 = vmatpush.bf16.msra.mxu3 %v7814_v17  ;;  %v7855_v17 = vld [vmem:[%s10155_s1 + $0x438] sm:$0xff] }
  0x4a   :  { %3680 = vmatpush.bf16.msra.mxu0 %v7789_v18  ;;  %v7871_v18 = vld [vmem:[%s10155_s1 + $0x4b8] sm:$0xff] }
  0x4b   :  { %3706 = vmatpush.bf16.msra.mxu2 %v7805_v19  ;;  %v7824_v19 = vld [vmem:[%s10155_s1 + $0x340] sm:$0xff] }
  0x4c   :  { %3693 = vmatpush.bf16.msra.mxu1 %v7797_v20  ;;  %v7840_v20 = vld [vmem:[%s10155_s1 + $0x3c0] sm:$0xff] }
  0x4d   :  { %3719 = vmatpush.bf16.msra.mxu3 %v7813_v21  ;;  %v7863_v21 = vld [vmem:[%s10155_s1 + $0x478] sm:$0xff] }
  0x4e   :  { %3681 = vmatpush.bf16.msra.mxu0 %v7788_v22  ;;  %v7879_v22 = vld [vmem:[%s10155_s1 + $0x4f8] sm:$0xff] }
  0x4f   :  { %3707 = vmatpush.bf16.msra.mxu2 %v7804_v23  ;;  %v7854_v23 = vld [vmem:[%s10155_s1 + $0x430] sm:$0xff] }
  0x50   :  { %3694 = vmatpush.bf16.msra.mxu1 %v7796_v24  ;;  %v7870_v24 = vld [vmem:[%s10155_s1 + $0x4b0] sm:$0xff] }
  0x51   :  { %3720 = vmatpush.bf16.msra.mxu3 %v7812_v25  ;;  %v7862_v25 = vld [vmem:[%s10155_s1 + $0x470] sm:$0xff] }
  0x52   :  { %3682 = vmatpush.bf16.msra.mxu0 %v7787_v26  ;;  %v7878_v26 = vld [vmem:[%s10155_s1 + $0x4f0] sm:$0xff] }
  0x53   :  { %3708 = vmatpush.bf16.msra.mxu2 %v7803_v27  ;;  %v7853_v27 = vld [vmem:[%s10155_s1 + $0x428] sm:$0xff] }
  0x54   :  { %3695 = vmatpush.bf16.msra.mxu1 %v7795_v28  ;;  %v7869_v28 = vld [vmem:[%s10155_s1 + $0x4a8] sm:$0xff] }
  0x55   :  { %3721 = vmatpush.bf16.msra.mxu3 %v7811_v29  ;;  %v7861_v29 = vld [vmem:[%s10155_s1 + $0x468] sm:$0xff] }
  0x56   :  { %3683 = vmatpush.bf16.msra.mxu0 %v7786_v30  ;;  %v7877_v30 = vld [vmem:[%s10155_s1 + $0x4e8] sm:$0xff] }
  0x57   :  { %3709 = vmatpush.bf16.msra.mxu2 %v7802_v31  ;;  %v7852_v31 = vld [vmem:[%s10155_s1 + $0x420] sm:$0xff] }
  0x58   :  { %3696 = vmatpush.bf16.msra.mxu1 %v7794_v32  ;;  %v7868_v32 = vld [vmem:[%s10155_s1 + $0x4a0] sm:$0xff] }
  0x59   :  { %3722 = vmatpush.bf16.msra.mxu3 %v7810_v33  ;;  %v7860_v33 = vld [vmem:[%s10155_s1 + $0x460] sm:$0xff] }
  0x5a   :  { %3684 = vmatpush.bf16.msra.mxu0 %v7785_v34  ;;  %v7876_v34 = vld [vmem:[%s10155_s1 + $0x4e0] sm:$0xff] }
  0x5b   :  { %3710 = vmatpush.bf16.msra.mxu2 %v7801_v35  ;;  %v7851_v35 = vld [vmem:[%s10155_s1 + $0x418] sm:$0xff] }
  0x5c   :  { %3697 = vmatpush.bf16.msra.mxu1 %v7793_v36  ;;  %v7867_v36 = vld [vmem:[%s10155_s1 + $0x498] sm:$0xff] }
  0x5d   :  { %3723 = vmatpush.bf16.msra.mxu3 %v7809_v37  ;;  %v7859_v37 = vld [vmem:[%s10155_s1 + $0x458] sm:$0xff] }
  0x5e   :  { %3685 = vmatpush.bf16.msra.mxu0 %v7784_v38  ;;  %v7875_v38 = vld [vmem:[%s10155_s1 + $0x4d8] sm:$0xff] }
  0x5f   :  { %3711 = vmatpush.bf16.msra.mxu2 %v7800_v39  ;;  %v7850_v39 = vld [vmem:[%s10155_s1 + $0x410] sm:$0xff] }
  0x60   :  { %3698 = vmatpush.bf16.msra.mxu1 %v7792_v42  ;;  %v7874_v42 = vld [vmem:[%s10155_s1 + $0x4d0] sm:$0xff] }
  0x61   :  { %3724 = vmatpush.bf16.msra.mxu3 %v7808_v43  ;;  %3686 = vmatmul.bf16.vlgmr.msra.gmra.mxu0 %v902_v45  ;;  %v7849_v43 = vld [vmem:[%s10155_s1 + $0x408] sm:$0xff] }
  0x62   :  { %3730 = vmatpush.bf16.msrb.mxu0 %v7823_v40  ;;  %3712 = vmatmul.bf16.vlgmr.msra.gmra.mxu2 %v904_v46  ;;  %v7866_v40 = vld [vmem:[%s10155_s1 + $0x490] sm:$0xff]  ;;  %v7857_v45 = vld [vmem:[%s10155_s1 + $0x448] sm:$0xff] }
  0x63   :  { %3756 = vmatpush.bf16.msrb.mxu2 %v7839_v41  ;;  %3699 = vmatmul.bf16.vlgmr.msra.gmra.mxu1 %v903_v48  ;;  %v7858_v41 = vld [vmem:[%s10155_s1 + $0x450] sm:$0xff]  ;;  %v7873_v46 = vld [vmem:[%s10155_s1 + $0x4c8] sm:$0xff]  ;;  %v7864_v48 = vld [vmem:[%s10155_s1 + $0x480] sm:$0xff] }
  0x64   :  { %3743 = vmatpush.bf16.msrb.mxu1 %v7831_v44  ;;  %3725 = vmatmul.bf16.vlgmr.msra.gmra.mxu3 %v905_v49  ;;  %v7865_v44 = vld [vmem:[%s10155_s1 + $0x488] sm:$0xff]  ;;  %v7887_v49 = vld [vmem:[%s10155_s1 + $0x538] sm:$0xff] }
  0x65   :  { %3769 = vmatpush.bf16.msrb.mxu3 %v7847_v47  ;;  %v7848_v47 = vld [vmem:[%s10155_s1 + $0x400] sm:$0xff] }
  0x66   :  { %3731 = vmatpush.bf16.msrb.mxu0 %v7822_v50  ;;  %v7903_v50 = vld [vmem:[%s10155_s1 + $0x5b8] sm:$0xff] }
  0x67   :  { %3757 = vmatpush.bf16.msrb.mxu2 %v7838_v51  ;;  %v7856_v51 = vld [vmem:[%s10155_s1 + $0x440] sm:$0xff] }
  0x68   :  { %3744 = vmatpush.bf16.msrb.mxu1 %v7830_v52  ;;  %v7872_v52 = vld [vmem:[%s10155_s1 + $0x4c0] sm:$0xff] }
  0x69   :  { %3770 = vmatpush.bf16.msrb.mxu3 %v7846_v53  ;;  %v7895_v53 = vld [vmem:[%s10155_s1 + $0x578] sm:$0xff] }
  0x6a   :  { %3732 = vmatpush.bf16.msrb.mxu0 %v7821_v54  ;;  %v912_v54 = vld [vmem:[#allocation1] sm:$0xff] }
  0x6b   :  { %3758 = vmatpush.bf16.msrb.mxu2 %v7837_v55  ;;  %v914_v55 = vld [vmem:[#allocation1 + $0x12] sm:$0xff] }
  0x6c   :  { %3745 = vmatpush.bf16.msrb.mxu1 %v7829_v56  ;;  %v7911_v56 = vld [vmem:[%s10155_s1 + $0x5f8] sm:$0xff] }
  0x6d   :  { %3771 = vmatpush.bf16.msrb.mxu3 %v7845_v57  ;;  %v913_v57 = vld [vmem:[#allocation1 + $0x9] sm:$0xff] }
  0x6e   :  { %3733 = vmatpush.bf16.msrb.mxu0 %v7820_v58  ;;  %v915_v58 = vld [vmem:[#allocation1 + $0x1b] sm:$0xff] }
  0x6f   :  { %3759 = vmatpush.bf16.msrb.mxu2 %v7836_v59  ;;  %v7886_v59 = vld [vmem:[%s10155_s1 + $0x530] sm:$0xff] }
  0x70   :  { %3746 = vmatpush.bf16.msrb.mxu1 %v7828_v60  ;;  %v7902_v60 = vld [vmem:[%s10155_s1 + $0x5b0] sm:$0xff] }
  0x71   :  { %3772 = vmatpush.bf16.msrb.mxu3 %v7844_v61  ;;  %v7894_v61 = vld [vmem:[%s10155_s1 + $0x570] sm:$0xff] }
  0x72   :  { %3734 = vmatpush.bf16.msrb.mxu0 %v7819_v62  ;;  %v7910_v62 = vld [vmem:[%s10155_s1 + $0x5f0] sm:$0xff] }
  0x73   :  { %3760 = vmatpush.bf16.msrb.mxu2 %v7835_v63  ;;  %v7885_v63 = vld [vmem:[%s10155_s1 + $0x528] sm:$0xff] }
  0x74   :  { %3747 = vmatpush.bf16.msrb.mxu1 %v7827_v0  ;;  %v7901_v0 = vld [vmem:[%s10155_s1 + $0x5a8] sm:$0xff] }
  0x75   :  { %3773 = vmatpush.bf16.msrb.mxu3 %v7843_v1  ;;  %v7893_v1 = vld [vmem:[%s10155_s1 + $0x568] sm:$0xff] }
  0x76   :  { %3735 = vmatpush.bf16.msrb.mxu0 %v7818_v2  ;;  %v7909_v2 = vld [vmem:[%s10155_s1 + $0x5e8] sm:$0xff] }
  0x77   :  { %3761 = vmatpush.bf16.msrb.mxu2 %v7834_v3  ;;  %v8201_v3 = vld [vmem:[%s10156_s2] ss:$0 sm:$0xff] }
  0x78   :  { %3748 = vmatpush.bf16.msrb.mxu1 %v7826_v4  ;;  %v7884_v4 = vld [vmem:[%s10155_s1 + $0x520] sm:$0xff] }
  0x79   :  { %3774 = vmatpush.bf16.msrb.mxu3 %v7842_v5  ;;  %v7900_v5 = vld [vmem:[%s10155_s1 + $0x5a0] sm:$0xff] }
  0x7a   :  { %3736 = vmatpush.bf16.msrb.mxu0 %v7817_v6 }
  0x7b   :  { %3762 = vmatpush.bf16.msrb.mxu2 %v7833_v7  ;;  %v7892_v7 = vld [vmem:[%s10155_s1 + $0x560] sm:$0xff] }
  0x7c   :  { %3749 = vmatpush.bf16.msrb.mxu1 %v7825_v13 }
  0x7d   :  { %3775 = vmatpush.bf16.msrb.mxu3 %v7841_v14  ;;  %v7891_v14 = vld [vmem:[%s10155_s1 + $0x558] sm:$0xff] }
  0x7e   :  { %3737 = vmatpush.bf16.msrb.mxu0 %v7816_v15  ;;  %v7907_v15 = vld [vmem:[%s10155_s1 + $0x5d8] sm:$0xff] }
  0x7f   :  { %3763 = vmatpush.bf16.msrb.mxu2 %v7832_v16 }
  0x80   :  { %3750 = vmatpush.bf16.msrb.mxu1 %v7824_v19 }
  0x81   :  { %3776 = vmatpush.bf16.msrb.mxu3 %v7840_v20  ;;  %3738 = vmatmul.bf16.vlgmr.msrb.gmra.mxu0 %v906_v8  ;;  %v7908_v8 = vld [vmem:[%s10155_s1 + $0x5e0] sm:$0xff] }
  0x82   :  { %3782 = vmatpush.bf16.msra.mxu0 %v7855_v17  ;;  %3764 = vmatmul.bf16.vlgmr.msrb.gmra.mxu2 %v908_v9  ;;  %v7882_v17 = vld [vmem:[%s10155_s1 + $0x510] sm:$0xff] }
  0x83   :  { %3808 = vmatpush.bf16.msra.mxu2 %v7871_v18  ;;  %3751 = vmatmul.bf16.vlgmr.msrb.gmra.mxu1 %v907_v10  ;;  %v7898_v18 = vld [vmem:[%s10155_s1 + $0x590] sm:$0xff] }
  0x84   :  { %3795 = vmatpush.bf16.msra.mxu1 %v7863_v21  ;;  %3777 = vmatmul.bf16.vlgmr.msrb.gmra.mxu3 %v909_v11  ;;  %v7883_v11 = vld [vmem:[%s10155_s1 + $0x518] sm:$0xff] }
  0x85   :  { %3821 = vmatpush.bf16.msra.mxu3 %v7879_v22  ;;  %v7890_v22 = vld [vmem:[%s10155_s1 + $0x550] sm:$0xff] }
  0x86   :  { %3783 = vmatpush.bf16.msra.mxu0 %v7854_v23  ;;  %v7906_v23 = vld [vmem:[%s10155_s1 + $0x5d0] sm:$0xff] }
  0x87   :  { %3809 = vmatpush.bf16.msra.mxu2 %v7870_v24  ;;  %v7881_v24 = vld [vmem:[%s10155_s1 + $0x508] sm:$0xff] }
  0x88   :  { %3796 = vmatpush.bf16.msra.mxu1 %v7862_v25 }
  0x89   :  { %3822 = vmatpush.bf16.msra.mxu3 %v7878_v26  ;;  %v7897_v26 = vld [vmem:[%s10155_s1 + $0x588] sm:$0xff] }
  0x8a   :  { %3784 = vmatpush.bf16.msra.mxu0 %v7853_v27  ;;  %v916_v27 = vld [vmem:[#allocation1 + $0x24] sm:$0xff] }
  0x8b   :  { %3810 = vmatpush.bf16.msra.mxu2 %v7869_v28  ;;  %v918_v28 = vld [vmem:[#allocation1 + $0x36] sm:$0xff] }
  0x8c   :  { %3797 = vmatpush.bf16.msra.mxu1 %v7861_v29 }
  0x8d   :  { %3823 = vmatpush.bf16.msra.mxu3 %v7877_v30  ;;  %v917_v30 = vld [vmem:[#allocation1 + $0x2d] sm:$0xff] }
  0x8e   :  { %3785 = vmatpush.bf16.msra.mxu0 %v7852_v31  ;;  %v919_v31 = vld [vmem:[#allocation1 + $0x3f] sm:$0xff] }
  0x8f   :  { %3811 = vmatpush.bf16.msra.mxu2 %v7868_v32  ;;  %v31_v32 = vld [vmem:[%s10154_s0 + $0x18] sm:$0xff] }
  0x90   :  { %3798 = vmatpush.bf16.msra.mxu1 %v7860_v33  ;;  %921 = vst [vmem:[#allocation1] ss:$9 sm:$0xff] %v31_v32  ;;  %v7889_v33 = vld [vmem:[%s10155_s1 + $0x548] sm:$0xff]  ;;  %v7974_v32 = vld [vmem:[%s10155_s1 + $0x7f0] sm:$0xff] }
  0x91   :  { %3824 = vmatpush.bf16.msra.mxu3 %v7876_v34  ;;  %v7905_v34 = vld [vmem:[%s10155_s1 + $0x5c8] sm:$0xff] }
  0x92   :  { %3786 = vmatpush.bf16.msra.mxu0 %v7851_v35 }
  0x93   :  { %3812 = vmatpush.bf16.msra.mxu2 %v7867_v36  ;;  %v7880_v36 = vld [vmem:[%s10155_s1 + $0x500] sm:$0xff] }
  0x94   :  { %3799 = vmatpush.bf16.msra.mxu1 %v7859_v37  ;;  %v7896_v37 = vld [vmem:[%s10155_s1 + $0x580] sm:$0xff] }
  0x95   :  { %3825 = vmatpush.bf16.msra.mxu3 %v7875_v38  ;;  %v7919_v38 = vld [vmem:[%s10155_s1 + $0x638] sm:$0xff] }
  0x96   :  { %3787 = vmatpush.bf16.msra.mxu0 %v7850_v39  ;;  %v7935_v39 = vld [vmem:[%s10155_s1 + $0x6b8] sm:$0xff] }
  0x97   :  { %3813 = vmatpush.bf16.msra.mxu2 %v7866_v40 }
  0x98   :  { %3800 = vmatpush.bf16.msra.mxu1 %v7858_v41  ;;  %v7888_v41 = vld [vmem:[%s10155_s1 + $0x540] sm:$0xff] }
  0x99   :  { %3826 = vmatpush.bf16.msra.mxu3 %v7874_v42  ;;  %v7904_v42 = vld [vmem:[%s10155_s1 + $0x5c0] sm:$0xff] }
  0x9a   :  { %3788 = vmatpush.bf16.msra.mxu0 %v7849_v43  ;;  %v7927_v43 = vld [vmem:[%s10155_s1 + $0x678] sm:$0xff] }
  0x9b   :  { %3814 = vmatpush.bf16.msra.mxu2 %v7865_v44  ;;  %v7943_v44 = vld [vmem:[%s10155_s1 + $0x6f8] sm:$0xff] }
  0x9c   :  { %3801 = vmatpush.bf16.msra.mxu1 %v7857_v45  ;;  %v7918_v45 = vld [vmem:[%s10155_s1 + $0x630] sm:$0xff] }
  0x9d   :  { %3827 = vmatpush.bf16.msra.mxu3 %v7873_v46  ;;  %v7934_v46 = vld [vmem:[%s10155_s1 + $0x6b0] sm:$0xff] }
  0x9e   :  { %3789 = vmatpush.bf16.msra.mxu0 %v7848_v47  ;;  %v3583_v6 = vpop.f32.mrf.mxu0  ;;  %v7926_v47 = vld [vmem:[%s10155_s1 + $0x670] sm:$0xff] }
  0x9f   :  { %3815 = vmatpush.bf16.msra.mxu2 %v7864_v48  ;;  %v3584_v9 = vadd.f32 %v8201_v3, %v3583_v6  ;;  %v7942_v48 = vld [vmem:[%s10155_s1 + $0x6f0] sm:$0xff] }
  0xa0   :  { %3802 = vmatpush.bf16.msra.mxu1 %v7856_v51  ;;  %v3596_v10 = vpop.f32.mrf.mxu1  ;;  %v7925_v51 = vld [vmem:[%s10155_s1 + $0x668] sm:$0xff]  ;;  %v7914_v3 = vld [vmem:[%s10155_s1 + $0x610] sm:$0xff] }
  0xa1   :  { %3828 = vmatpush.bf16.msra.mxu3 %v7872_v52  ;;  %3790 = vmatmul.bf16.vlgmr.msra.gmra.mxu0 %v912_v54  ;;  %v3597_v13 = vadd.f32 %v3596_v10, %v3584_v9  ;;  %v7941_v52 = vld [vmem:[%s10155_s1 + $0x6e8] sm:$0xff]  ;;  %v7932_v54 = vld [vmem:[%s10155_s1 + $0x6a0] sm:$0xff]  ;;  %v7938_v9 = vld [vmem:[%s10155_s1 + $0x6d0] sm:$0xff] }
  0xa2   :  { %3834 = vmatpush.bf16.msrb.mxu0 %v7887_v49  ;;  %3816 = vmatmul.bf16.vlgmr.msra.gmra.mxu2 %v914_v55  ;;  %v7917_v49 = vld [vmem:[%s10155_s1 + $0x628] sm:$0xff] }
  0xa3   :  { %3860 = vmatpush.bf16.msrb.mxu2 %v7903_v50  ;;  %3803 = vmatmul.bf16.vlgmr.msra.gmra.mxu1 %v913_v57  ;;  %v7933_v50 = vld [vmem:[%s10155_s1 + $0x6a8] sm:$0xff]  ;;  %v7924_v57 = vld [vmem:[%s10155_s1 + $0x660] sm:$0xff] }
  0xa4   :  { %3847 = vmatpush.bf16.msrb.mxu1 %v7895_v53  ;;  %3829 = vmatmul.bf16.vlgmr.msra.gmra.mxu3 %v915_v58  ;;  %v7916_v53 = vld [vmem:[%s10155_s1 + $0x620] sm:$0xff] }
  0xa5   :  { %3873 = vmatpush.bf16.msrb.mxu3 %v7911_v56  ;;  %v3609_v16 = vpop.f32.mrf.mxu2  ;;  %v7940_v58 = vld [vmem:[%s10155_s1 + $0x6e0] sm:$0xff] }
  0xa6   :  { %3835 = vmatpush.bf16.msrb.mxu0 %v7886_v59  ;;  %v3610_v19 = vadd.f32 %v3609_v16, %v3597_v13  ;;  %v3585_v21 = vpop.f32.mrf.mxu0  ;;  %v7921_v13 = vld [vmem:[%s10155_s1 + $0x648] sm:$0xff]  ;;  %v7912_v16 = vld [vmem:[%s10155_s1 + $0x600] sm:$0xff] }
  0xa7   :  { %3861 = vmatpush.bf16.msrb.mxu2 %v7902_v60  ;;  %v3622_v20 = vpop.f32.mrf.mxu3  ;;  %v7920_v21 = vld [vmem:[%s10155_s1 + $0x640] sm:$0xff] }
  0xa8   :  { %3848 = vmatpush.bf16.msrb.mxu1 %v7894_v61  ;;  %v3623_v25 = vadd.f32 %v3622_v20, %v3610_v19  ;;  %v3598_v29 = vpop.f32.mrf.mxu1  ;;  %v7915_v61 = vld [vmem:[%s10155_s1 + $0x618] sm:$0xff] }
  0xa9   :  { %3874 = vmatpush.bf16.msrb.mxu3 %v7910_v62  ;;  %v7931_v62 = vld [vmem:[%s10155_s1 + $0x698] sm:$0xff]  ;;  %v7950_v29 = vld [vmem:[%s10155_s1 + $0x730] sm:$0xff] }
  0xaa   :  { %3836 = vmatpush.bf16.msrb.mxu0 %v7885_v63  ;;  %v7923_v63 = vld [vmem:[%s10155_s1 + $0x658] sm:$0xff] }
  0xab   :  { %3862 = vmatpush.bf16.msrb.mxu2 %v7901_v0  ;;  %v7939_v0 = vld [vmem:[%s10155_s1 + $0x6d8] sm:$0xff] }
  0xac   :  { %3849 = vmatpush.bf16.msrb.mxu1 %v7893_v1  ;;  %v7951_v19 = vld [vmem:[%s10155_s1 + $0x738] sm:$0xff] }
  0xad   :  { %3875 = vmatpush.bf16.msrb.mxu3 %v7909_v2  ;;  %v3611_v35 = vpop.f32.mrf.mxu2  ;;  %v7967_v20 = vld [vmem:[%s10155_s1 + $0x7b8] sm:$0xff] }
  0xae   :  { %3837 = vmatpush.bf16.msrb.mxu0 %v7884_v4  ;;  %v7930_v4 = vld [vmem:[%s10155_s1 + $0x690] sm:$0xff]  ;;  %v7957_v35 = vld [vmem:[%s10155_s1 + $0x768] sm:$0xff] }
  0xaf   :  { %3863 = vmatpush.bf16.msrb.mxu2 %v7900_v5  ;;  %v3624_v40 = vpop.f32.mrf.mxu3 }
  0xb0   :  { %3850 = vmatpush.bf16.msrb.mxu1 %v7892_v7  ;;  %v7964_v40 = vld [vmem:[%s10155_s1 + $0x7a0] sm:$0xff] }
  0xb1   :  { %3876 = vmatpush.bf16.msrb.mxu3 %v7908_v8  ;;  %v7922_v8 = vld [vmem:[%s10155_s1 + $0x650] sm:$0xff] }
  0xb2   :  { %3838 = vmatpush.bf16.msrb.mxu0 %v7883_v11  ;;  %v7913_v11 = vld [vmem:[%s10155_s1 + $0x608] sm:$0xff] }
  0xb3   :  { %3864 = vmatpush.bf16.msrb.mxu2 %v7899_v12  ;;  %v7929_v12 = vld [vmem:[%s10155_s1 + $0x688] sm:$0xff] }
  0xb4   :  { %3851 = vmatpush.bf16.msrb.mxu1 %v7891_v14  ;;  %v7937_v14 = vld [vmem:[%s10155_s1 + $0x6c8] sm:$0xff] }
  0xb5   :  { %3877 = vmatpush.bf16.msrb.mxu3 %v7907_v15 }
  0xb6   :  { %3839 = vmatpush.bf16.msrb.mxu0 %v7882_v17  ;;  %v7928_v17 = vld [vmem:[%s10155_s1 + $0x680] sm:$0xff] }
  0xb7   :  { %3865 = vmatpush.bf16.msrb.mxu2 %v7898_v18 }
  0xb8   :  { %3852 = vmatpush.bf16.msrb.mxu1 %v7890_v22  ;;  %v7936_v22 = vld [vmem:[%s10155_s1 + $0x6c0] sm:$0xff] }
  0xb9   :  { %3878 = vmatpush.bf16.msrb.mxu3 %v7906_v23  ;;  %v7959_v23 = vld [vmem:[%s10155_s1 + $0x778] sm:$0xff] }
  0xba   :  { %3840 = vmatpush.bf16.msrb.mxu0 %v7881_v24  ;;  %v922_v24 = vld [vmem:[#allocation1] sm:$0xff] }
  0xbb   :  { %3866 = vmatpush.bf16.msrb.mxu2 %v7897_v26  ;;  %v7975_v26 = vld [vmem:[%s10155_s1 + $0x7f8] sm:$0xff] }
  0xbc   :  { %3853 = vmatpush.bf16.msrb.mxu1 %v7889_v33  ;;  %v7949_v33 = vld [vmem:[%s10155_s1 + $0x728] sm:$0xff] }
  0xbd   :  { %3879 = vmatpush.bf16.msrb.mxu3 %v7905_v34  ;;  %v7965_v34 = vld [vmem:[%s10155_s1 + $0x7a8] sm:$0xff] }
  0xbe   :  { %3841 = vmatpush.bf16.msrb.mxu0 %v7880_v36  ;;  %v3635_v55 = vpop.f32.mrf.mxu0  ;;  %v7973_v36 = vld [vmem:[%s10155_s1 + $0x7e8] sm:$0xff] }
  0xbf   :  { %3867 = vmatpush.bf16.msrb.mxu2 %v7896_v37  ;;  %v3636_v56 = vadd.f32 %v3635_v55, %v3623_v25  ;;  %v924_v25 = vld [vmem:[#allocation1 + $0x12] sm:$0xff] }
  0xc0   :  { %3854 = vmatpush.bf16.msrb.mxu1 %v7888_v41  ;;  %v3648_v59 = vpop.f32.mrf.mxu1  ;;  %v7962_v55 = vld [vmem:[%s10155_s1 + $0x790] sm:$0xff] }
  0xc1   :  { %3880 = vmatpush.bf16.msrb.mxu3 %v7904_v42  ;;  %3842 = vmatmul.bf16.vlgmr.msrb.gmra.mxu0 %v916_v27  ;;  %v3649_v60 = vadd.f32 %v3648_v59, %v3636_v56  ;;  %v923_v27 = vld [vmem:[#allocation1 + $0x9] sm:$0xff] }
  0xc2   :  { %3886 = vmatpush.bf16.msra.mxu0 %v7919_v38  ;;  %3868 = vmatmul.bf16.vlgmr.msrb.gmra.mxu2 %v918_v28  ;;  %v925_v28 = vld [vmem:[#allocation1 + $0x1b] sm:$0xff]  ;;  %v7945_v59 = vld [vmem:[%s10155_s1 + $0x708] sm:$0xff] }
  0xc3   :  { %3912 = vmatpush.bf16.msra.mxu2 %v7935_v39  ;;  %3855 = vmatmul.bf16.vlgmr.msrb.gmra.mxu1 %v917_v30  ;;  %v7966_v30 = vld [vmem:[%s10155_s1 + $0x7b0] sm:$0xff]  ;;  %v7948_v39 = vld [vmem:[%s10155_s1 + $0x720] sm:$0xff] }
  0xc4   :  { %3899 = vmatpush.bf16.msra.mxu1 %v7927_v43  ;;  %3881 = vmatmul.bf16.vlgmr.msrb.gmra.mxu3 %v919_v31  ;;  %v7958_v31 = vld [vmem:[%s10155_s1 + $0x770] sm:$0xff]  ;;  %v7956_v43 = vld [vmem:[%s10155_s1 + $0x760] sm:$0xff] }
  0xc5   :  { %3925 = vmatpush.bf16.msra.mxu3 %v7943_v44  ;;  %v3661_v1 = vpop.f32.mrf.mxu2  ;;  %v7972_v44 = vld [vmem:[%s10155_s1 + $0x7e0] sm:$0xff] }
  0xc6   :  { %3887 = vmatpush.bf16.msra.mxu0 %v7918_v45  ;;  %v3662_v2 = vadd.f32 %v3661_v1, %v3649_v60  ;;  %v3637_v6 = vpop.f32.mrf.mxu0  ;;  %v7947_v45 = vld [vmem:[%s10155_s1 + $0x718] sm:$0xff]  ;;  %v7961_v60 = vld [vmem:[%s10155_s1 + $0x788] sm:$0xff] }
  0xc7   :  { %3913 = vmatpush.bf16.msra.mxu2 %v7934_v46  ;;  %v3674_v5 = vpop.f32.mrf.mxu3  ;;  %v7963_v46 = vld [vmem:[%s10155_s1 + $0x798] sm:$0xff]  ;;  %v7944_v6 = vld [vmem:[%s10155_s1 + $0x700] sm:$0xff] }
  0xc8   :  { %3900 = vmatpush.bf16.msra.mxu1 %v7926_v47  ;;  %v3675_v7 = vadd.f32 %v3674_v5, %v3662_v2  ;;  %v3650_v10 = vpop.f32.mrf.mxu1  ;;  %v32_v2 = vld [vmem:[%s10154_s0 + $0x20] sm:$0xff] }
  0xc9   :  { %3926 = vmatpush.bf16.msra.mxu3 %v7942_v48  ;;  %v7952_v10 = vld [vmem:[%s10155_s1 + $0x740] sm:$0xff] }
  0xca   :  { %3888 = vmatpush.bf16.msra.mxu0 %v7917_v49  ;;  %v7955_v49 = vld [vmem:[%s10155_s1 + $0x758] sm:$0xff] }
  0xcb   :  { %3914 = vmatpush.bf16.msra.mxu2 %v7933_v50  ;;  %v7971_v50 = vld [vmem:[%s10155_s1 + $0x7d8] sm:$0xff] }
  0xcc   :  { %3901 = vmatpush.bf16.msra.mxu1 %v7925_v51 }
  0xcd   :  { %3927 = vmatpush.bf16.msra.mxu3 %v7941_v52  ;;  %v3663_v15 = vpop.f32.mrf.mxu2 }
  0xce   :  { %3889 = vmatpush.bf16.msra.mxu0 %v7916_v53  ;;  %v7998_v15 = vld [vmem:[%s10155_s1 + $0x8b0] sm:$0xff] }
  0xcf   :  { %3915 = vmatpush.bf16.msra.mxu2 %v7932_v54  ;;  %v3676_v18 = vpop.f32.mrf.mxu3  ;;  %v7946_v54 = vld [vmem:[%s10155_s1 + $0x710] sm:$0xff] }
  0xd0   :  { %3902 = vmatpush.bf16.msra.mxu1 %v7924_v57  ;;  %v7954_v57 = vld [vmem:[%s10155_s1 + $0x750] sm:$0xff]  ;;  %v7981_v18 = vld [vmem:[%s10155_s1 + $0x828] sm:$0xff] }
  0xd1   :  { %3928 = vmatpush.bf16.msra.mxu3 %v7940_v58  ;;  %v7970_v58 = vld [vmem:[%s10155_s1 + $0x7d0] sm:$0xff] }
  0xd2   :  { %3890 = vmatpush.bf16.msra.mxu0 %v7915_v61  ;;  %v926_v61 = vld [vmem:[#allocation1 + $0x24] sm:$0xff] }
  0xd3   :  { %3916 = vmatpush.bf16.msra.mxu2 %v7931_v62  ;;  %v928_v62 = vld [vmem:[#allocation1 + $0x36] sm:$0xff] }
  0xd4   :  { %3903 = vmatpush.bf16.msra.mxu1 %v7923_v63  ;;  %v927_v63 = vld [vmem:[#allocation1 + $0x2d] sm:$0xff] }
  0xd5   :  { %3929 = vmatpush.bf16.msra.mxu3 %v7939_v0  ;;  %v929_v0 = vld [vmem:[#allocation1 + $0x3f] sm:$0xff] }
  0xd6   :  { %3891 = vmatpush.bf16.msra.mxu0 %v7914_v3  ;;  %931 = vst [vmem:[#allocation1] ss:$9 sm:$0xff] %v32_v2  ;;  %v7953_v3 = vld [vmem:[%s10155_s1 + $0x748] sm:$0xff] }
  0xd7   :  { %3917 = vmatpush.bf16.msra.mxu2 %v7930_v4  ;;  %v7969_v4 = vld [vmem:[%s10155_s1 + $0x7c8] sm:$0xff] }
  0xd8   :  { %3904 = vmatpush.bf16.msra.mxu1 %v7922_v8  ;;  %v7983_v8 = vld [vmem:[%s10155_s1 + $0x838] sm:$0xff]  ;;  %v8013_v2 = vld [vmem:[%s10155_s1 + $0x928] sm:$0xff] }
  0xd9   :  { %3930 = vmatpush.bf16.msra.mxu3 %v7938_v9  ;;  %v7999_v9 = vld [vmem:[%s10155_s1 + $0x8b8] sm:$0xff] }
  0xda   :  { %3892 = vmatpush.bf16.msra.mxu0 %v7913_v11  ;;  %v7968_v11 = vld [vmem:[%s10155_s1 + $0x7c0] sm:$0xff] }
  0xdb   :  { %3918 = vmatpush.bf16.msra.mxu2 %v7929_v12  ;;  %v7991_v12 = vld [vmem:[%s10155_s1 + $0x878] sm:$0xff] }
  0xdc   :  { %3905 = vmatpush.bf16.msra.mxu1 %v7921_v13  ;;  %v8007_v13 = vld [vmem:[%s10155_s1 + $0x8f8] sm:$0xff] }
  0xdd   :  { %3931 = vmatpush.bf16.msra.mxu3 %v7937_v14  ;;  %v7982_v14 = vld [vmem:[%s10155_s1 + $0x830] sm:$0xff] }
  0xde   :  { %3893 = vmatpush.bf16.msra.mxu0 %v7912_v16  ;;  %v3687_v37 = vpop.f32.mrf.mxu0  ;;  %v7990_v16 = vld [vmem:[%s10155_s1 + $0x870] sm:$0xff] }
  0xdf   :  { %3919 = vmatpush.bf16.msra.mxu2 %v7928_v17  ;;  %v3688_v38 = vadd.f32 %v3687_v37, %v3675_v7  ;;  %v7960_v7 = vld [vmem:[%s10155_s1 + $0x780] sm:$0xff]  ;;  %v8006_v17 = vld [vmem:[%s10155_s1 + $0x8f0] sm:$0xff] }
  0xe0   :  { %3906 = vmatpush.bf16.msra.mxu1 %v7920_v21  ;;  %v3700_v41 = vpop.f32.mrf.mxu1  ;;  %v8005_v21 = vld [vmem:[%s10155_s1 + $0x8e8] sm:$0xff] }
  0xe1   :  { %3932 = vmatpush.bf16.msra.mxu3 %v7936_v22  ;;  %3894 = vmatmul.bf16.vlgmr.msra.gmra.mxu0 %v922_v24  ;;  %v3701_v42 = vadd.f32 %v3700_v41, %v3688_v38  ;;  %v7980_v24 = vld [vmem:[%s10155_s1 + $0x820] sm:$0xff] }
  0xe2   :  { %3938 = vmatpush.bf16.msrb.mxu0 %v7951_v19  ;;  %3920 = vmatmul.bf16.vlgmr.msra.gmra.mxu2 %v924_v25  ;;  %v7997_v19 = vld [vmem:[%s10155_s1 + $0x8a8] sm:$0xff]  ;;  %v7996_v25 = vld [vmem:[%s10155_s1 + $0x8a0] sm:$0xff] }
  0xe3   :  { %3964 = vmatpush.bf16.msrb.mxu2 %v7967_v20  ;;  %3907 = vmatmul.bf16.vlgmr.msra.gmra.mxu1 %v923_v27  ;;  %v7989_v20 = vld [vmem:[%s10155_s1 + $0x868] sm:$0xff] }
  0xe4   :  { %3951 = vmatpush.bf16.msrb.mxu1 %v7959_v23  ;;  %3933 = vmatmul.bf16.vlgmr.msra.gmra.mxu3 %v925_v28  ;;  %v7988_v28 = vld [vmem:[%s10155_s1 + $0x860] sm:$0xff] }
  0xe5   :  { %3977 = vmatpush.bf16.msrb.mxu3 %v7975_v26  ;;  %v3713_v47 = vpop.f32.mrf.mxu2 }
  0xe6   :  { %3939 = vmatpush.bf16.msrb.mxu0 %v7950_v29  ;;  %v3714_v48 = vadd.f32 %v3713_v47, %v3701_v42  ;;  %v3689_v52 = vpop.f32.mrf.mxu0  ;;  %v8004_v29 = vld [vmem:[%s10155_s1 + $0x8e0] sm:$0xff]  ;;  %v7986_v42 = vld [vmem:[%s10155_s1 + $0x850] sm:$0xff]  ;;  %v7985_v47 = vld [vmem:[%s10155_s1 + $0x848] sm:$0xff] }
  0xe7   :  { %3965 = vmatpush.bf16.msrb.mxu2 %v7966_v30  ;;  %v3726_v51 = vpop.f32.mrf.mxu3  ;;  %v7979_v30 = vld [vmem:[%s10155_s1 + $0x818] sm:$0xff] }
  0xe8   :  { %3952 = vmatpush.bf16.msrb.mxu1 %v7958_v31  ;;  %v9038_v53 = vadd.f32 %v3726_v51, %v3714_v48  ;;  %v3702_v56 = vpop.f32.mrf.mxu1  ;;  %v7995_v31 = vld [vmem:[%s10155_s1 + $0x898] sm:$0xff]  ;;  %v8001_v48 = vld [vmem:[%s10155_s1 + $0x8c8] sm:$0xff]  ;;  %v7992_v51 = vld [vmem:[%s10155_s1 + $0x880] sm:$0xff] }
  0xe9   :  { %3978 = vmatpush.bf16.msrb.mxu3 %v7974_v32  ;;  %v8015_v52 = vld [vmem:[%s10155_s1 + $0x938] sm:$0xff] }
  0xea   :  { %3940 = vmatpush.bf16.msrb.mxu0 %v7949_v33  ;;  %v8023_v56 = vld [vmem:[%s10155_s1 + $0x978] sm:$0xff] }
  0xeb   :  { %3966 = vmatpush.bf16.msrb.mxu2 %v7965_v34  ;;  %v7987_v34 = vld [vmem:[%s10155_s1 + $0x858] sm:$0xff] }
  0xec   :  { %3953 = vmatpush.bf16.msrb.mxu1 %v7957_v35  ;;  %v8003_v35 = vld [vmem:[%s10155_s1 + $0x8d8] sm:$0xff] }
  0xed   :  { %3979 = vmatpush.bf16.msrb.mxu3 %v7973_v36  ;;  %v3715_v1 = vpop.f32.mrf.mxu2 }
  0xee   :  { %3941 = vmatpush.bf16.msrb.mxu0 %v7948_v39  ;;  %v7978_v39 = vld [vmem:[%s10155_s1 + $0x810] sm:$0xff] }
  0xef   :  { %3967 = vmatpush.bf16.msrb.mxu2 %v7964_v40  ;;  %v3728_v5 = vpop.f32.mrf.mxu3  ;;  %v7994_v40 = vld [vmem:[%s10155_s1 + $0x890] sm:$0xff] }
  0xf0   :  { %3954 = vmatpush.bf16.msrb.mxu1 %v7956_v43  ;;  %v8002_v43 = vld [vmem:[%s10155_s1 + $0x8d0] sm:$0xff]  ;;  %v8037_v5 = vld [vmem:[%s10155_s1 + $0x9e8] sm:$0xff] }
  0xf1   :  { %3980 = vmatpush.bf16.msrb.mxu3 %v7972_v44  ;;  %v7977_v44 = vld [vmem:[%s10155_s1 + $0x808] sm:$0xff]  ;;  %v8038_v1 = vld [vmem:[%s10155_s1 + $0x9f0] sm:$0xff] }
  0xf2   :  { %3942 = vmatpush.bf16.msrb.mxu0 %v7947_v45  ;;  %v7993_v45 = vld [vmem:[%s10155_s1 + $0x888] sm:$0xff] }
  0xf3   :  { %3968 = vmatpush.bf16.msrb.mxu2 %v7963_v46 }
  0xf4   :  { %3955 = vmatpush.bf16.msrb.mxu1 %v7955_v49 }
  0xf5   :  { %3981 = vmatpush.bf16.msrb.mxu3 %v7971_v50  ;;  %v7976_v50 = vld [vmem:[%s10155_s1 + $0x800] sm:$0xff] }
  0xf6   :  { %3943 = vmatpush.bf16.msrb.mxu0 %v7946_v54  ;;  %v7984_v54 = vld [vmem:[%s10155_s1 + $0x840] sm:$0xff] }
  0xf7   :  { %3969 = vmatpush.bf16.msrb.mxu2 %v7962_v55  ;;  %v8000_v55 = vld [vmem:[%s10155_s1 + $0x8c0] sm:$0xff] }
  0xf8   :  { %3956 = vmatpush.bf16.msrb.mxu1 %v7954_v57  ;;  %v932_v57 = vld [vmem:[#allocation1] sm:$0xff] }
  0xf9   :  { %3982 = vmatpush.bf16.msrb.mxu3 %v7970_v58  ;;  %v934_v58 = vld [vmem:[#allocation1 + $0x12] sm:$0xff] }
  0xfa   :  { %3944 = vmatpush.bf16.msrb.mxu0 %v7945_v59  ;;  %v8039_v59 = vld [vmem:[%s10155_s1 + $0x9f8] sm:$0xff] }
  0xfb   :  { %3970 = vmatpush.bf16.msrb.mxu2 %v7961_v60  ;;  %v933_v60 = vld [vmem:[#allocation1 + $0x9] sm:$0xff] }
  0xfc   :  { %3957 = vmatpush.bf16.msrb.mxu1 %v7953_v3  ;;  %v8029_v3 = vld [vmem:[%s10155_s1 + $0x9a8] sm:$0xff] }
  0xfd   :  { %3983 = vmatpush.bf16.msrb.mxu3 %v7969_v4  ;;  %v8021_v4 = vld [vmem:[%s10155_s1 + $0x968] sm:$0xff] }
  0xfe   :  { %3945 = vmatpush.bf16.msrb.mxu0 %v7944_v6  ;;  %v3739_v22 = vpop.f32.mrf.mxu0 }
  0xff   :  { %3971 = vmatpush.bf16.msrb.mxu2 %v7960_v7  ;;  %v3740_v23 = vadd.f32 %v3739_v22, %v9038_v53  ;;  %v8031_v53 = vld [vmem:[%s10155_s1 + $0x9b8] sm:$0xff] }
 0x100   :  { %3958 = vmatpush.bf16.msrb.mxu1 %v7952_v10  ;;  %v3752_v26 = vpop.f32.mrf.mxu1 }
 0x101   :  { %3984 = vmatpush.bf16.msrb.mxu3 %v7968_v11  ;;  %3946 = vmatmul.bf16.vlgmr.msrb.gmra.mxu0 %v926_v61  ;;  %v3753_v27 = vadd.f32 %v3752_v26, %v3740_v23  ;;  %v935_v61 = vld [vmem:[#allocation1 + $0x1b] sm:$0xff]  ;;  %v8010_v23 = vld [vmem:[%s10155_s1 + $0x910] sm:$0xff] }
 0x102   :  { %3990 = vmatpush.bf16.msra.mxu0 %v7983_v8  ;;  %3972 = vmatmul.bf16.vlgmr.msrb.gmra.mxu2 %v928_v62  ;;  %v8014_v62 = vld [vmem:[%s10155_s1 + $0x930] sm:$0xff]  ;;  %v8012_v8 = vld [vmem:[%s10155_s1 + $0x920] sm:$0xff] }
 0x103   :  { %4016 = vmatpush.bf16.msra.mxu2 %v7999_v9  ;;  %3959 = vmatmul.bf16.vlgmr.msrb.gmra.mxu1 %v927_v63  ;;  %v8030_v63 = vld [vmem:[%s10155_s1 + $0x9b0] sm:$0xff]  ;;  %v8028_v9 = vld [vmem:[%s10155_s1 + $0x9a0] sm:$0xff] }
 0x104   :  { %4003 = vmatpush.bf16.msra.mxu1 %v7991_v12  ;;  %3985 = vmatmul.bf16.vlgmr.msrb.gmra.mxu3 %v929_v0  ;;  %v8022_v0 = vld [vmem:[%s10155_s1 + $0x970] sm:$0xff]  ;;  %v8020_v12 = vld [vmem:[%s10155_s1 + $0x960] sm:$0xff] }
 0x105   :  { %4029 = vmatpush.bf16.msra.mxu3 %v8007_v13  ;;  %v3765_v32 = vpop.f32.mrf.mxu2  ;;  %v8036_v13 = vld [vmem:[%s10155_s1 + $0x9e0] sm:$0xff]  ;;  %v8018_v26 = vld [vmem:[%s10155_s1 + $0x950] sm:$0xff] }
 0x106   :  { %3991 = vmatpush.bf16.msra.mxu0 %v7982_v14  ;;  %v3766_v33 = vadd.f32 %v3765_v32, %v3753_v27  ;;  %v3741_v37 = vpop.f32.mrf.mxu0  ;;  %v8011_v14 = vld [vmem:[%s10155_s1 + $0x918] sm:$0xff]  ;;  %v8034_v27 = vld [vmem:[%s10155_s1 + $0x9d0] sm:$0xff] }
 0x107   :  { %4017 = vmatpush.bf16.msra.mxu2 %v7998_v15  ;;  %v3778_v36 = vpop.f32.mrf.mxu3  ;;  %v8027_v15 = vld [vmem:[%s10155_s1 + $0x998] sm:$0xff]  ;;  %v937_v32 = vld [vmem:[#allocation1 + $0x2d] sm:$0xff] }
 0x108   :  { %4004 = vmatpush.bf16.msra.mxu1 %v7990_v16  ;;  %v3779_v38 = vadd.f32 %v3778_v36, %v3766_v33  ;;  %v3754_v41 = vpop.f32.mrf.mxu1  ;;  %v939_v33 = vld [vmem:[#allocation1 + $0x3f] sm:$0xff]  ;;  %v8017_v36 = vld [vmem:[%s10155_s1 + $0x948] sm:$0xff] }
 0x109   :  { %4030 = vmatpush.bf16.msra.mxu3 %v8006_v17  ;;  %v8033_v37 = vld [vmem:[%s10155_s1 + $0x9c8] sm:$0xff]  ;;  %v8047_v41 = vld [vmem:[%s10155_s1 + $0xa38] sm:$0xff] }
 0x10a   :  { %3992 = vmatpush.bf16.msra.mxu0 %v7981_v18  ;;  %v8019_v18 = vld [vmem:[%s10155_s1 + $0x958] sm:$0xff] }
 0x10b   :  { %4018 = vmatpush.bf16.msra.mxu2 %v7997_v19  ;;  %v8035_v19 = vld [vmem:[%s10155_s1 + $0x9d8] sm:$0xff] }
 0x10c   :  { %4005 = vmatpush.bf16.msra.mxu1 %v7989_v20 }
 0x10d   :  { %4031 = vmatpush.bf16.msra.mxu3 %v8005_v21  ;;  %v3767_v46 = vpop.f32.mrf.mxu2 }
 0x10e   :  { %3993 = vmatpush.bf16.msra.mxu0 %v7980_v24  ;;  %v8026_v24 = vld [vmem:[%s10155_s1 + $0x990] sm:$0xff]  ;;  %v8071_v46 = vld [vmem:[%s10155_s1 + $0xaf8] sm:$0xff] }
 0x10f   :  { %4019 = vmatpush.bf16.msra.mxu2 %v7996_v25  ;;  %v3780_v49 = vpop.f32.mrf.mxu3 }
 0x110   :  { %4006 = vmatpush.bf16.msra.mxu1 %v7988_v28  ;;  %v8009_v28 = vld [vmem:[%s10155_s1 + $0x908] sm:$0xff]  ;;  %v8054_v49 = vld [vmem:[%s10155_s1 + $0xa70] sm:$0xff] }
 0x111   :  { %4032 = vmatpush.bf16.msra.mxu3 %v8004_v29  ;;  %v8025_v29 = vld [vmem:[%s10155_s1 + $0x988] sm:$0xff] }
 0x112   :  { %3994 = vmatpush.bf16.msra.mxu0 %v7979_v30  ;;  %v936_v30 = vld [vmem:[#allocation1 + $0x24] sm:$0xff] }
 0x113   :  { %4020 = vmatpush.bf16.msra.mxu2 %v7995_v31  ;;  %v938_v31 = vld [vmem:[#allocation1 + $0x36] sm:$0xff] }
 0x114   :  { %4007 = vmatpush.bf16.msra.mxu1 %v7987_v34 }
 0x115   :  { %4033 = vmatpush.bf16.msra.mxu3 %v8003_v35  ;;  %v33_v35 = vld [vmem:[%s10154_s0 + $0x28] sm:$0xff] }
 0x116   :  { %3995 = vmatpush.bf16.msra.mxu0 %v7978_v39  ;;  %941 = vst [vmem:[#allocation1] ss:$9 sm:$0xff] %v33_v35  ;;  %v8008_v39 = vld [vmem:[%s10155_s1 + $0x900] sm:$0xff]  ;;  %v8077_v35 = vld [vmem:[%s10155_s1 + $0xb28] sm:$0xff] }
 0x117   :  { %4021 = vmatpush.bf16.msra.mxu2 %v7994_v40  ;;  %v8024_v40 = vld [vmem:[%s10155_s1 + $0x980] sm:$0xff] }
 0x118   :  { %4008 = vmatpush.bf16.msra.mxu1 %v7986_v42  ;;  %v8063_v42 = vld [vmem:[%s10155_s1 + $0xab8] sm:$0xff] }
 0x119   :  { %4034 = vmatpush.bf16.msra.mxu3 %v8002_v43  ;;  %v8016_v43 = vld [vmem:[%s10155_s1 + $0x940] sm:$0xff] }
 0x11a   :  { %3996 = vmatpush.bf16.msra.mxu0 %v7977_v44  ;;  %v8032_v44 = vld [vmem:[%s10155_s1 + $0x9c0] sm:$0xff] }
 0x11b   :  { %4022 = vmatpush.bf16.msra.mxu2 %v7993_v45  ;;  %v8055_v45 = vld [vmem:[%s10155_s1 + $0xa78] sm:$0xff] }
 0x11c   :  { %4009 = vmatpush.bf16.msra.mxu1 %v7985_v47  ;;  %v8046_v47 = vld [vmem:[%s10155_s1 + $0xa30] sm:$0xff] }
 0x11d   :  { %4035 = vmatpush.bf16.msra.mxu3 %v8001_v48  ;;  %v8062_v48 = vld [vmem:[%s10155_s1 + $0xab0] sm:$0xff] }
 0x11e   :  { %3997 = vmatpush.bf16.msra.mxu0 %v7976_v50  ;;  %v3791_v6 = vpop.f32.mrf.mxu0  ;;  %v8070_v50 = vld [vmem:[%s10155_s1 + $0xaf0] sm:$0xff] }
 0x11f   :  { %4023 = vmatpush.bf16.msra.mxu2 %v7992_v51  ;;  %v3792_v7 = vadd.f32 %v3791_v6, %v3779_v38  ;;  %v8045_v51 = vld [vmem:[%s10155_s1 + $0xa28] sm:$0xff] }
 0x120   :  { %4010 = vmatpush.bf16.msra.mxu1 %v7984_v54  ;;  %v3804_v10 = vpop.f32.mrf.mxu1  ;;  %v8069_v54 = vld [vmem:[%s10155_s1 + $0xae8] sm:$0xff] }
 0x121   :  { %4036 = vmatpush.bf16.msra.mxu3 %v8000_v55  ;;  %3998 = vmatmul.bf16.vlgmr.msra.gmra.mxu0 %v932_v57  ;;  %v3805_v11 = vadd.f32 %v3804_v10, %v3792_v7  ;;  %v8044_v57 = vld [vmem:[%s10155_s1 + $0xa20] sm:$0xff] }
 0x122   :  { %4042 = vmatpush.bf16.msrb.mxu0 %v8015_v52  ;;  %4024 = vmatmul.bf16.vlgmr.msra.gmra.mxu2 %v934_v58  ;;  %v8061_v52 = vld [vmem:[%s10155_s1 + $0xaa8] sm:$0xff]  ;;  %v8060_v58 = vld [vmem:[%s10155_s1 + $0xaa0] sm:$0xff] }
 0x123   :  { %4068 = vmatpush.bf16.msrb.mxu2 %v8031_v53  ;;  %4011 = vmatmul.bf16.vlgmr.msra.gmra.mxu1 %v933_v60  ;;  %v8053_v53 = vld [vmem:[%s10155_s1 + $0xa68] sm:$0xff] }
 0x124   :  { %4055 = vmatpush.bf16.msrb.mxu1 %v8023_v56  ;;  %4037 = vmatmul.bf16.vlgmr.msra.gmra.mxu3 %v935_v61  ;;  %v8052_v61 = vld [vmem:[%s10155_s1 + $0xa60] sm:$0xff] }
 0x125   :  { %4081 = vmatpush.bf16.msrb.mxu3 %v8039_v59  ;;  %v3817_v16 = vpop.f32.mrf.mxu2 }
 0x126   :  { %4043 = vmatpush.bf16.msrb.mxu0 %v8014_v62  ;;  %v3818_v17 = vadd.f32 %v3817_v16, %v3805_v11  ;;  %v3793_v21 = vpop.f32.mrf.mxu0  ;;  %v8068_v62 = vld [vmem:[%s10155_s1 + $0xae0] sm:$0xff]  ;;  %v8050_v11 = vld [vmem:[%s10155_s1 + $0xa50] sm:$0xff]  ;;  %v8049_v16 = vld [vmem:[%s10155_s1 + $0xa48] sm:$0xff] }
 0x127   :  { %4069 = vmatpush.bf16.msrb.mxu2 %v8030_v63  ;;  %v3830_v20 = vpop.f32.mrf.mxu3  ;;  %v8043_v63 = vld [vmem:[%s10155_s1 + $0xa18] sm:$0xff] }
 0x128   :  { %4056 = vmatpush.bf16.msrb.mxu1 %v8022_v0  ;;  %v9236_v22 = vadd.f32 %v3830_v20, %v3818_v17  ;;  %v3806_v25 = vpop.f32.mrf.mxu1  ;;  %v8059_v0 = vld [vmem:[%s10155_s1 + $0xa98] sm:$0xff]  ;;  %v8065_v17 = vld [vmem:[%s10155_s1 + $0xac8] sm:$0xff]  ;;  %v8056_v20 = vld [vmem:[%s10155_s1 + $0xa80] sm:$0xff] }
 0x129   :  { %4082 = vmatpush.bf16.msrb.mxu3 %v8038_v1  ;;  %v8079_v21 = vld [vmem:[%s10155_s1 + $0xb38] sm:$0xff] }
 0x12a   :  { %4044 = vmatpush.bf16.msrb.mxu0 %v8013_v2  ;;  %v8087_v25 = vld [vmem:[%s10155_s1 + $0xb78] sm:$0xff] }
 0x12b   :  { %4070 = vmatpush.bf16.msrb.mxu2 %v8029_v3  ;;  %v8051_v3 = vld [vmem:[%s10155_s1 + $0xa58] sm:$0xff] }
 0x12c   :  { %4057 = vmatpush.bf16.msrb.mxu1 %v8021_v4  ;;  %v8067_v4 = vld [vmem:[%s10155_s1 + $0xad8] sm:$0xff] }
 0x12d   :  { %4083 = vmatpush.bf16.msrb.mxu3 %v8037_v5  ;;  %v3819_v34 = vpop.f32.mrf.mxu2 }
 0x12e   :  { %4045 = vmatpush.bf16.msrb.mxu0 %v8012_v8  ;;  %v8042_v8 = vld [vmem:[%s10155_s1 + $0xa10] sm:$0xff] }
 0x12f   :  { %4071 = vmatpush.bf16.msrb.mxu2 %v8028_v9  ;;  %v3832_v38 = vpop.f32.mrf.mxu3  ;;  %v8058_v9 = vld [vmem:[%s10155_s1 + $0xa90] sm:$0xff] }
 0x130   :  { %4058 = vmatpush.bf16.msrb.mxu1 %v8020_v12  ;;  %v8066_v12 = vld [vmem:[%s10155_s1 + $0xad0] sm:$0xff]  ;;  %v8101_v38 = vld [vmem:[%s10155_s1 + $0xbe8] sm:$0xff] }
 0x131   :  { %4084 = vmatpush.bf16.msrb.mxu3 %v8036_v13  ;;  %v8041_v13 = vld [vmem:[%s10155_s1 + $0xa08] sm:$0xff]  ;;  %v8102_v34 = vld [vmem:[%s10155_s1 + $0xbf0] sm:$0xff] }
 0x132   :  { %4046 = vmatpush.bf16.msrb.mxu0 %v8011_v14  ;;  %v8057_v14 = vld [vmem:[%s10155_s1 + $0xa88] sm:$0xff] }
 0x133   :  { %4072 = vmatpush.bf16.msrb.mxu2 %v8027_v15 }
 0x134   :  { %4059 = vmatpush.bf16.msrb.mxu1 %v8019_v18 }
 0x135   :  { %4085 = vmatpush.bf16.msrb.mxu3 %v8035_v19  ;;  %v8040_v19 = vld [vmem:[%s10155_s1 + $0xa00] sm:$0xff] }
 0x136   :  { %4047 = vmatpush.bf16.msrb.mxu0 %v8010_v23  ;;  %v8048_v23 = vld [vmem:[%s10155_s1 + $0xa40] sm:$0xff] }
 0x137   :  { %4073 = vmatpush.bf16.msrb.mxu2 %v8026_v24  ;;  %v8064_v24 = vld [vmem:[%s10155_s1 + $0xac0] sm:$0xff] }
 0x138   :  { %4060 = vmatpush.bf16.msrb.mxu1 %v8018_v26  ;;  %v942_v26 = vld [vmem:[#allocation1] sm:$0xff] }
 0x139   :  { %4086 = vmatpush.bf16.msrb.mxu3 %v8034_v27  ;;  %v944_v27 = vld [vmem:[#allocation1 + $0x12] sm:$0xff] }
 0x13a   :  { %4048 = vmatpush.bf16.msrb.mxu0 %v8009_v28  ;;  %v8103_v28 = vld [vmem:[%s10155_s1 + $0xbf8] sm:$0xff] }
 0x13b   :  { %4074 = vmatpush.bf16.msrb.mxu2 %v8025_v29  ;;  %v943_v29 = vld [vmem:[#allocation1 + $0x9] sm:$0xff] }
 0x13c   :  { %4061 = vmatpush.bf16.msrb.mxu1 %v8017_v36  ;;  %v8093_v36 = vld [vmem:[%s10155_s1 + $0xba8] sm:$0xff] }
 0x13d   :  { %4087 = vmatpush.bf16.msrb.mxu3 %v8033_v37  ;;  %v8085_v37 = vld [vmem:[%s10155_s1 + $0xb68] sm:$0xff] }
 0x13e   :  { %4049 = vmatpush.bf16.msrb.mxu0 %v8008_v39  ;;  %v3843_v55 = vpop.f32.mrf.mxu0 }
 0x13f   :  { %4075 = vmatpush.bf16.msrb.mxu2 %v8024_v40  ;;  %v3844_v56 = vadd.f32 %v3843_v55, %v9236_v22  ;;  %v8095_v22 = vld [vmem:[%s10155_s1 + $0xbb8] sm:$0xff] }
 0x140   :  { %4062 = vmatpush.bf16.msrb.mxu1 %v8016_v43  ;;  %v3856_v59 = vpop.f32.mrf.mxu1 }
 0x141   :  { %4088 = vmatpush.bf16.msrb.mxu3 %v8032_v44  ;;  %4050 = vmatmul.bf16.vlgmr.msrb.gmra.mxu0 %v936_v30  ;;  %v3857_v60 = vadd.f32 %v3856_v59, %v3844_v56  ;;  %v945_v30 = vld [vmem:[#allocation1 + $0x1b] sm:$0xff]  ;;  %v8074_v56 = vld [vmem:[%s10155_s1 + $0xb10] sm:$0xff] }
 0x142   :  { %4094 = vmatpush.bf16.msra.mxu0 %v8047_v41  ;;  %4076 = vmatmul.bf16.vlgmr.msrb.gmra.mxu2 %v938_v31  ;;  %v8078_v31 = vld [vmem:[%s10155_s1 + $0xb30] sm:$0xff]  ;;  %v8076_v41 = vld [vmem:[%s10155_s1 + $0xb20] sm:$0xff] }
 0x143   :  { %4120 = vmatpush.bf16.msra.mxu2 %v8063_v42  ;;  %4063 = vmatmul.bf16.vlgmr.msrb.gmra.mxu1 %v937_v32  ;;  %v8094_v32 = vld [vmem:[%s10155_s1 + $0xbb0] sm:$0xff]  ;;  %v8092_v42 = vld [vmem:[%s10155_s1 + $0xba0] sm:$0xff] }
 0x144   :  { %4107 = vmatpush.bf16.msra.mxu1 %v8055_v45  ;;  %4089 = vmatmul.bf16.vlgmr.msrb.gmra.mxu3 %v939_v33  ;;  %v8086_v33 = vld [vmem:[%s10155_s1 + $0xb70] sm:$0xff]  ;;  %v8084_v45 = vld [vmem:[%s10155_s1 + $0xb60] sm:$0xff] }
 0x145   :  { %4133 = vmatpush.bf16.msra.mxu3 %v8071_v46  ;;  %v3869_v1 = vpop.f32.mrf.mxu2  ;;  %v8100_v46 = vld [vmem:[%s10155_s1 + $0xbe0] sm:$0xff]  ;;  %v8082_v59 = vld [vmem:[%s10155_s1 + $0xb50] sm:$0xff] }
 0x146   :  { %4095 = vmatpush.bf16.msra.mxu0 %v8046_v47  ;;  %v3870_v2 = vadd.f32 %v3869_v1, %v3857_v60  ;;  %v3845_v6 = vpop.f32.mrf.mxu0  ;;  %v8075_v47 = vld [vmem:[%s10155_s1 + $0xb18] sm:$0xff]  ;;  %v8098_v60 = vld [vmem:[%s10155_s1 + $0xbd0] sm:$0xff] }
 0x147   :  { %4121 = vmatpush.bf16.msra.mxu2 %v8062_v48  ;;  %v3882_v5 = vpop.f32.mrf.mxu3  ;;  %v8091_v48 = vld [vmem:[%s10155_s1 + $0xb98] sm:$0xff]  ;;  %v947_v1 = vld [vmem:[#allocation1 + $0x2d] sm:$0xff] }
 0x148   :  { %4108 = vmatpush.bf16.msra.mxu1 %v8054_v49  ;;  %v3883_v7 = vadd.f32 %v3882_v5, %v3870_v2  ;;  %v3858_v10 = vpop.f32.mrf.mxu1  ;;  %v949_v2 = vld [vmem:[#allocation1 + $0x3f] sm:$0xff]  ;;  %v8081_v5 = vld [vmem:[%s10155_s1 + $0xb48] sm:$0xff] }
 0x149   :  { %4134 = vmatpush.bf16.msra.mxu3 %v8070_v50  ;;  %v8097_v6 = vld [vmem:[%s10155_s1 + $0xbc8] sm:$0xff]  ;;  %v8111_v10 = vld [vmem:[%s10155_s1 + $0xc38] sm:$0xff] }
 0x14a   :  { %4096 = vmatpush.bf16.msra.mxu0 %v8045_v51  ;;  %v8083_v51 = vld [vmem:[%s10155_s1 + $0xb58] sm:$0xff] }
 0x14b   :  { %4122 = vmatpush.bf16.msra.mxu2 %v8061_v52  ;;  %v8099_v52 = vld [vmem:[%s10155_s1 + $0xbd8] sm:$0xff] }
 0x14c   :  { %4109 = vmatpush.bf16.msra.mxu1 %v8053_v53 }
 0x14d   :  { %4135 = vmatpush.bf16.msra.mxu3 %v8069_v54  ;;  %v3871_v15 = vpop.f32.mrf.mxu2 }
 0x14e   :  { %4097 = vmatpush.bf16.msra.mxu0 %v8044_v57  ;;  %v8090_v57 = vld [vmem:[%s10155_s1 + $0xb90] sm:$0xff]  ;;  %v8135_v15 = vld [vmem:[%s10155_s1 + $0xcf8] sm:$0xff] }
 0x14f   :  { %4123 = vmatpush.bf16.msra.mxu2 %v8060_v58  ;;  %v3884_v18 = vpop.f32.mrf.mxu3 }
 0x150   :  { %4110 = vmatpush.bf16.msra.mxu1 %v8052_v61  ;;  %v8073_v61 = vld [vmem:[%s10155_s1 + $0xb08] sm:$0xff]  ;;  %v8118_v18 = vld [vmem:[%s10155_s1 + $0xc70] sm:$0xff] }
 0x151   :  { %4136 = vmatpush.bf16.msra.mxu3 %v8068_v62  ;;  %v8089_v62 = vld [vmem:[%s10155_s1 + $0xb88] sm:$0xff] }
 0x152   :  { %4098 = vmatpush.bf16.msra.mxu0 %v8043_v63  ;;  %v946_v63 = vld [vmem:[#allocation1 + $0x24] sm:$0xff] }
 0x153   :  { %4124 = vmatpush.bf16.msra.mxu2 %v8059_v0  ;;  %v948_v0 = vld [vmem:[#allocation1 + $0x36] sm:$0xff] }
 0x154   :  { %4111 = vmatpush.bf16.msra.mxu1 %v8051_v3 }
 0x155   :  { %4137 = vmatpush.bf16.msra.mxu3 %v8067_v4  ;;  %v34_v4 = vld [vmem:[%s10154_s0 + $0x30] sm:$0x3f] }
 0x156   :  { %4099 = vmatpush.bf16.msra.mxu0 %v8042_v8  ;;  %951 = vst [vmem:[#allocation1] ss:$9 sm:$0xff] %v34_v4  ;;  %v8072_v8 = vld [vmem:[%s10155_s1 + $0xb00] sm:$0xff]  ;;  %v8142_v4 = vld [vmem:[%s10155_s1 + $0xd30] sm:$0xff] }
 0x157   :  { %4125 = vmatpush.bf16.msra.mxu2 %v8058_v9  ;;  %v8088_v9 = vld [vmem:[%s10155_s1 + $0xb80] sm:$0xff] }
 0x158   :  { %4112 = vmatpush.bf16.msra.mxu1 %v8050_v11  ;;  %v8127_v11 = vld [vmem:[%s10155_s1 + $0xcb8] sm:$0xff] }
 0x159   :  { %4138 = vmatpush.bf16.msra.mxu3 %v8066_v12  ;;  %v8080_v12 = vld [vmem:[%s10155_s1 + $0xb40] sm:$0xff] }
 0x15a   :  { %4100 = vmatpush.bf16.msra.mxu0 %v8041_v13  ;;  %v8096_v13 = vld [vmem:[%s10155_s1 + $0xbc0] sm:$0xff] }
 0x15b   :  { %4126 = vmatpush.bf16.msra.mxu2 %v8057_v14  ;;  %v8119_v14 = vld [vmem:[%s10155_s1 + $0xc78] sm:$0xff] }
 0x15c   :  { %4113 = vmatpush.bf16.msra.mxu1 %v8049_v16  ;;  %v8110_v16 = vld [vmem:[%s10155_s1 + $0xc30] sm:$0xff] }
 0x15d   :  { %4139 = vmatpush.bf16.msra.mxu3 %v8065_v17  ;;  %v8126_v17 = vld [vmem:[%s10155_s1 + $0xcb0] sm:$0xff] }
 0x15e   :  { %4101 = vmatpush.bf16.msra.mxu0 %v8040_v19  ;;  %v3895_v39 = vpop.f32.mrf.mxu0  ;;  %v8134_v19 = vld [vmem:[%s10155_s1 + $0xcf0] sm:$0xff] }
 0x15f   :  { %4127 = vmatpush.bf16.msra.mxu2 %v8056_v20  ;;  %v3896_v40 = vadd.f32 %v3895_v39, %v3883_v7  ;;  %v8109_v20 = vld [vmem:[%s10155_s1 + $0xc28] sm:$0xff] }
 0x160   :  { %4114 = vmatpush.bf16.msra.mxu1 %v8048_v23  ;;  %v3908_v43 = vpop.f32.mrf.mxu1  ;;  %v8133_v23 = vld [vmem:[%s10155_s1 + $0xce8] sm:$0xff] }
 0x161   :  { %4140 = vmatpush.bf16.msra.mxu3 %v8064_v24  ;;  %4102 = vmatmul.bf16.vlgmr.msra.gmra.mxu0 %v942_v26  ;;  %v3909_v44 = vadd.f32 %v3908_v43, %v3896_v40  ;;  %v8108_v26 = vld [vmem:[%s10155_s1 + $0xc20] sm:$0xff] }
 0x162   :  { %4146 = vmatpush.bf16.msrb.mxu0 %v8079_v21  ;;  %4128 = vmatmul.bf16.vlgmr.msra.gmra.mxu2 %v944_v27  ;;  %v8125_v21 = vld [vmem:[%s10155_s1 + $0xca8] sm:$0xff]  ;;  %v8124_v27 = vld [vmem:[%s10155_s1 + $0xca0] sm:$0xff] }
 0x163   :  { %4172 = vmatpush.bf16.msrb.mxu2 %v8095_v22  ;;  %4115 = vmatmul.bf16.vlgmr.msra.gmra.mxu1 %v943_v29  ;;  %v8117_v22 = vld [vmem:[%s10155_s1 + $0xc68] sm:$0xff] }
 0x164   :  { %4159 = vmatpush.bf16.msrb.mxu1 %v8087_v25  ;;  %4141 = vmatmul.bf16.vlgmr.msra.gmra.mxu3 %v945_v30  ;;  %v8116_v30 = vld [vmem:[%s10155_s1 + $0xc60] sm:$0xff] }
 0x165   :  { %4185 = vmatpush.bf16.msrb.mxu3 %v8103_v28  ;;  %v3921_v49 = vpop.f32.mrf.mxu2 }
 0x166   :  { %4147 = vmatpush.bf16.msrb.mxu0 %v8078_v31  ;;  %v3922_v50 = vadd.f32 %v3921_v49, %v3909_v44  ;;  %v3897_v54 = vpop.f32.mrf.mxu0  ;;  %v8132_v31 = vld [vmem:[%s10155_s1 + $0xce0] sm:$0xff]  ;;  %v885_v44 = vld [vmem:[%s10155_s1 + $0xd48] sm:$0xf] }
 0x167   :  { %4173 = vmatpush.bf16.msrb.mxu2 %v8094_v32  ;;  %v3934_v53 = vpop.f32.mrf.mxu3  ;;  %v8107_v32 = vld [vmem:[%s10155_s1 + $0xc18] sm:$0xff]  ;;  %v8237_v54 = vmov 65535  }
 0x168   :  { %4160 = vmatpush.bf16.msrb.mxu1 %v8086_v33  ;;  %v9434_v55 = vadd.f32 %v3934_v53, %v3922_v50  ;;  %v3910_v58 = vpop.f32.mrf.mxu1  ;;  %v8123_v33 = vld [vmem:[%s10155_s1 + $0xc98] sm:$0xff]  ;;  %v2712_v50 = vunpack.c.l.b16 %v885_v44 }
 0x169   :  { %4186 = vmatpush.bf16.msrb.mxu3 %v8102_v34 }
 0x16a   :  { %4148 = vmatpush.bf16.msrb.mxu0 %v8077_v35  ;;  %v3138_v58 = vpack.c.b16 %v2712_v50, %v2712_v50 }
 0x16b   :  { %4174 = vmatpush.bf16.msrb.mxu2 %v8093_v36  ;;  %v8115_v36 = vld [vmem:[%s10155_s1 + $0xc58] sm:$0xff] }
 0x16c   :  { %4161 = vmatpush.bf16.msrb.mxu1 %v8085_v37  ;;  %v8131_v37 = vld [vmem:[%s10155_s1 + $0xcd8] sm:$0xff] }
 0x16d   :  { %4187 = vmatpush.bf16.msrb.mxu3 %v8101_v38  ;;  %v3923_v3 = vpop.f32.mrf.mxu2 }
 0x16e   :  { %4149 = vmatpush.bf16.msrb.mxu0 %v8076_v41  ;;  %v8106_v41 = vld [vmem:[%s10155_s1 + $0xc10] sm:$0xff]  ;;  %v955_v3 = vld [vmem:[#allocation1 + $0x1b] sm:$0xff] }
 0x16f   :  { %4175 = vmatpush.bf16.msrb.mxu2 %v8092_v42  ;;  %v3936_v7 = vpop.f32.mrf.mxu3  ;;  %v8122_v42 = vld [vmem:[%s10155_s1 + $0xc90] sm:$0xff] }
 0x170   :  { %4162 = vmatpush.bf16.msrb.mxu1 %v8084_v45  ;;  %v8114_v45 = vld [vmem:[%s10155_s1 + $0xc50] sm:$0xff] }
 0x171   :  { %4188 = vmatpush.bf16.msrb.mxu3 %v8100_v46  ;;  %v8130_v46 = vld [vmem:[%s10155_s1 + $0xcd0] sm:$0xff] }
 0x172   :  { %4150 = vmatpush.bf16.msrb.mxu0 %v8075_v47  ;;  %v8105_v47 = vld [vmem:[%s10155_s1 + $0xc08] sm:$0xff] }
 0x173   :  { %4176 = vmatpush.bf16.msrb.mxu2 %v8091_v48  ;;  %v8121_v48 = vld [vmem:[%s10155_s1 + $0xc88] sm:$0xff] }
 0x174   :  { %4163 = vmatpush.bf16.msrb.mxu1 %v8083_v51  ;;  %v8113_v51 = vld [vmem:[%s10155_s1 + $0xc48] sm:$0xff] }
 0x175   :  { %4189 = vmatpush.bf16.msrb.mxu3 %v8099_v52  ;;  %v8129_v52 = vld [vmem:[%s10155_s1 + $0xcc8] sm:$0xff] }
 0x176   :  { %4151 = vmatpush.bf16.msrb.mxu0 %v8074_v56  ;;  %v8104_v56 = vld [vmem:[%s10155_s1 + $0xc00] sm:$0xff] }
 0x177   :  { %4177 = vmatpush.bf16.msrb.mxu2 %v8090_v57  ;;  %v8120_v57 = vld [vmem:[%s10155_s1 + $0xc80] sm:$0xff] }
 0x178   :  { %4164 = vmatpush.bf16.msrb.mxu1 %v8082_v59  ;;  %v8143_v59 = vld [vmem:[%s10155_s1 + $0xd38] sm:$0xff] }
 0x179   :  { %4190 = vmatpush.bf16.msrb.mxu3 %v8098_v60 }
 0x17a   :  { %4152 = vmatpush.bf16.msrb.mxu0 %v8073_v61  ;;  %v8112_v61 = vld [vmem:[%s10155_s1 + $0xc40] sm:$0xff] }
 0x17b   :  { %4178 = vmatpush.bf16.msrb.mxu2 %v8089_v62  ;;  %v8128_v62 = vld [vmem:[%s10155_s1 + $0xcc0] sm:$0xff] }
 0x17c   :  { %4165 = vmatpush.bf16.msrb.mxu1 %v8081_v5  ;;  %v8144_v5 = vld [vmem:[%s10155_s1 + $0xd40] sm:$0xff] }
 0x17d   :  { %4191 = vmatpush.bf16.msrb.mxu3 %v8097_v6  ;;  %v8141_v6 = vld [vmem:[%s10155_s1 + $0xd28] sm:$0xff] }
 0x17e   :  { %4153 = vmatpush.bf16.msrb.mxu0 %v8072_v8  ;;  %v3947_v24 = vpop.f32.mrf.mxu0 }
 0x17f   :  { %4179 = vmatpush.bf16.msrb.mxu2 %v8088_v9  ;;  %v3948_v25 = vadd.f32 %v3947_v24, %v9434_v55  ;;  %v3569_v55 = vsel %vm3567_vm0, 4294967295, %v8237_v54  ;;  %v8140_v9 = vld [vmem:[%s10155_s1 + $0xd20] sm:$0xff] }
 0x180   :  { %4166 = vmatpush.bf16.msrb.mxu1 %v8080_v12  ;;  %v3960_v28 = vpop.f32.mrf.mxu1  ;;  %v3570_v60 = vsel %vm3568_vm1, %v3569_v55, 0  ;;  %v8139_v12 = vld [vmem:[%s10155_s1 + $0xd18] sm:$0xff]  ;;  %v8136_v24 = vld [vmem:[%s10155_s1 + $0xd00] sm:$0xff] }
 0x181   :  { %4192 = vmatpush.bf16.msrb.mxu3 %v8096_v13  ;;  %4154 = vmatmul.bf16.vlgmr.msrb.gmra.mxu0 %v946_v63  ;;  %v3961_v29 = vadd.f32 %v3960_v28, %v3948_v25  ;;  %v952_v63 = vld [vmem:[#allocation1] sm:$0xff] }
 0x182   :  { %4198 = vmatpush.bf16.msra.mxu0 %v8111_v10  ;;  %4180 = vmatmul.bf16.vlgmr.msrb.gmra.mxu2 %v948_v0  ;;  %v954_v0 = vld [vmem:[#allocation1 + $0x12] sm:$0xff]  ;;  %v956_v25 = vld [vmem:[#allocation1 + $0x24] sm:$0xff] }
 0x183   :  { %4224 = vmatpush.bf16.msra.mxu2 %v8127_v11  ;;  %4167 = vmatmul.bf16.vlgmr.msrb.gmra.mxu1 %v947_v1  ;;  %v3572_v1 = vand.u32 %v3570_v60, %v3138_v58 }
 0x184   :  { %4211 = vmatpush.bf16.msra.mxu1 %v8119_v14  ;;  %4193 = vmatmul.bf16.vlgmr.msrb.gmra.mxu3 %v949_v2  ;;  %v953_v2 = vld [vmem:[#allocation1 + $0x9] sm:$0xff] }
 0x185   :  { %4237 = vmatpush.bf16.msra.mxu3 %v8135_v15  ;;  %v3973_v34 = vpop.f32.mrf.mxu2 }
 0x186   :  { %4199 = vmatpush.bf16.msra.mxu0 %v8110_v16  ;;  %v3974_v35 = vadd.f32 %v3973_v34, %v3961_v29  ;;  %v3949_v39 = vpop.f32.mrf.mxu0 }
 0x187   :  { %4225 = vmatpush.bf16.msra.mxu2 %v8126_v17  ;;  %v3986_v38 = vpop.f32.mrf.mxu3 }
 0x188   :  { %4212 = vmatpush.bf16.msra.mxu1 %v8118_v18  ;;  %v3987_v40 = vadd.f32 %v3986_v38, %v3974_v35  ;;  %v3962_v43 = vpop.f32.mrf.mxu1  ;;  %v8138_v18 = vld [vmem:[%s10155_s1 + $0xd10] sm:$0xff] }
 0x189   :  { %4238 = vmatpush.bf16.msra.mxu3 %v8134_v19  ;;  %v957_v19 = vld [vmem:[#allocation1 + $0x2d] sm:$0xff] }
 0x18a   :  { %4200 = vmatpush.bf16.msra.mxu0 %v8109_v20 }
 0x18b   :  { %4226 = vmatpush.bf16.msra.mxu2 %v8125_v21  ;;  %v8137_v21 = vld [vmem:[%s10155_s1 + $0xd08] sm:$0xff] }
 0x18c   :  { %4213 = vmatpush.bf16.msra.mxu1 %v8117_v22 }
 0x18d   :  { %4239 = vmatpush.bf16.msra.mxu3 %v8133_v23  ;;  %v3975_v49 = vpop.f32.mrf.mxu2 }
 0x18e   :  { %4201 = vmatpush.bf16.msra.mxu0 %v8108_v26 }
 0x18f   :  { %4227 = vmatpush.bf16.msra.mxu2 %v8124_v27  ;;  %v3988_v53 = vpop.f32.mrf.mxu3 }
 0x190   :  { %4214 = vmatpush.bf16.msra.mxu1 %v8116_v30 }
 0x191   :  { %4240 = vmatpush.bf16.msra.mxu3 %v8132_v31 }
 0x192   :  { %4202 = vmatpush.bf16.msra.mxu0 %v8107_v32 }
 0x193   :  { %4228 = vmatpush.bf16.msra.mxu2 %v8123_v33 }
 0x194   :  { %4215 = vmatpush.bf16.msra.mxu1 %v8115_v36 }
 0x195   :  { %4241 = vmatpush.bf16.msra.mxu3 %v8131_v37 }
 0x196   :  { %4203 = vmatpush.bf16.msra.mxu0 %v8106_v41 }
 0x197   :  { %4229 = vmatpush.bf16.msra.mxu2 %v8122_v42 }
 0x198   :  { %4216 = vmatpush.bf16.msra.mxu1 %v8114_v45 }
 0x199   :  { %4242 = vmatpush.bf16.msra.mxu3 %v8130_v46 }
 0x19a   :  { %4204 = vmatpush.bf16.msra.mxu0 %v8105_v47 }
 0x19b   :  { %4230 = vmatpush.bf16.msra.mxu2 %v8121_v48 }
 0x19c   :  { %4217 = vmatpush.bf16.msra.mxu1 %v8113_v51 }
 0x19d   :  { %4243 = vmatpush.bf16.msra.mxu3 %v8129_v52 }
 0x19e   :  { %4205 = vmatpush.bf16.msra.mxu0 %v8104_v56  ;;  %v3999_v7 = vpop.f32.mrf.mxu0 }
 0x19f   :  { %4231 = vmatpush.bf16.msra.mxu2 %v8120_v57  ;;  %v4000_v8 = vadd.f32 %v3999_v7, %v3987_v40 }
 0x1a0   :  { %4218 = vmatpush.bf16.msra.mxu1 %v8112_v61  ;;  %v4012_v10 = vpop.f32.mrf.mxu1 }
 0x1a1   :  { %4244 = vmatpush.bf16.msra.mxu3 %v8128_v62  ;;  %4206 = vmatmul.bf16.vlgmr.msra.gmra.mxu0 %v952_v63  ;;  %v4013_v11 = vadd.f32 %v4012_v10, %v4000_v8  ;;  %v4297_v10 = vld [vmem:[%s10157_s3 + $0x10] sm:$0xff] }
 0x1a2   :  { %4250 = vmatpush.bf16.msrb.mxu0 %v8143_v59  ;;  %4232 = vmatmul.bf16.vlgmr.msra.gmra.mxu2 %v954_v0 }
 0x1a3   :  { %4219 = vmatmul.bf16.vlgmr.msra.gmra.mxu1 %v953_v2 }
 0x1a4   :  { %4269 = vmatpush.bf16.msrb.mxu1 %v3572_v1  ;;  %4245 = vmatmul.bf16.vlgmr.msra.gmra.mxu3 %v955_v3 }
 0x1a5   :  { %v4025_v13 = vpop.f32.mrf.mxu2 }
 0x1a6   :  { %4251 = vmatpush.bf16.msrb.mxu0 %v8142_v4  ;;  %v4026_v14 = vadd.f32 %v4025_v13, %v4013_v11  ;;  %v4001_v16 = vpop.f32.mrf.mxu0 }
 0x1a7   :  { %v4038_v15 = vpop.f32.mrf.mxu3 }
 0x1a8   :  { %4270 = vmatpush.bf16.msrb.mxu1 %v8144_v5  ;;  %v4039_v17 = vadd.f32 %v4038_v15, %v4026_v14  ;;  %v4014_v20 = vpop.f32.mrf.mxu1  ;;  %v4295_v14 = vld [vmem:[%s10157_s3] sm:$0xff] }
 0x1aa   :  { %4252 = vmatpush.bf16.msrb.mxu0 %v8141_v6 }
 0x1ad   :  { %v4027_v22 = vpop.f32.mrf.mxu2 }
 0x1ae   :  { %4253 = vmatpush.bf16.msrb.mxu0 %v8140_v9  ;;  %v4298_v9 = vld [vmem:[%s10157_s3 + $0x18] sm:$0xff] }
 0x1af   :  { %v4040_v23 = vpop.f32.mrf.mxu3  ;;  %4319 = vmatpush.msrb.mxu2 %v4298_v9 }
 0x1b1   :  { %4320 = vmatpush.msrb.mxu2 %v4297_v10  ;;  %v8176_v10 = vld [vmem:[%s10159_s5 + $0xf4] sm:$0xf0] }
 0x1b2   :  { %4254 = vmatpush.bf16.msrb.mxu0 %v8139_v12  ;;  %v4296_v12 = vld [vmem:[%s10157_s3 + $0x8] sm:$0xff] }
 0x1b3   :  { %7446 = vmatmul.msk.bf16.vlgmr.msrb.gmra.mxu1 %vm3564_vm2, %v957_v19  ;;  %4321 = vmatpush.msrb.mxu2 %v4296_v12  ;;  %vm4774_vm2 = vcmask 1044484  }
 0x1b5   :  { %4322 = vmatpush.msrb.mxu2 %v4295_v14  ;;  %v8151_v14 = vld [vmem:[%s10159_s5 + $0x34] sm:$0xf] }
 0x1b6   :  { %4255 = vmatpush.bf16.msrb.mxu0 %v8138_v18 }
 0x1ba   :  { %4256 = vmatpush.bf16.msrb.mxu0 %v8137_v21 }
 0x1be   :  { %4257 = vmatpush.bf16.msrb.mxu0 %v8136_v24  ;;  %v4051_v26 = vpop.f32.mrf.mxu0 }
 0x1bf   :  { %v4052_v27 = vadd.f32 %v4051_v26, %v4039_v17 }
 0x1c0   :  { %v4064_v28 = vpop.f32.mrf.mxu1 }
 0x1c1   :  { %4258 = vmatmul.bf16.vlgmr.msrb.gmra.mxu0 %v956_v25  ;;  %v4065_v29 = vadd.f32 %v4064_v28, %v4052_v27 }
 0x1c5   :  { %v4077_v30 = vpop.f32.mrf.mxu2 }
 0x1c6   :  { %v4078_v31 = vadd.f32 %v4077_v30, %v4065_v29  ;;  %v4053_v33 = vpop.f32.mrf.mxu0 }
 0x1c7   :  { %v4090_v32 = vpop.f32.mrf.mxu3  ;;  %v7452_v33 = vld [vmem:[%s10159_s5] sm:$0xf] }
 0x1c8   :  { %v4091_v34 = vadd.f32 %v4090_v32, %v4078_v31  ;;  %v4066_v35 = vpop.f32.mrf.mxu1 }
 0x1c9   :  { %v8145_v35 = vld [vmem:[%s10159_s5 + $0x4] sm:$0xf] }
 0x1cd   :  { %v4079_v36 = vpop.f32.mrf.mxu2 }
 0x1cf   :  { %v4092_v37 = vpop.f32.mrf.mxu3 }
 0x1d0   :  { %v7454_v37 = vld [vmem:[%s10159_s5 + $0xd8] sm:$0xf0] }
 0x1de   :  { %v4103_v38 = vpop.f32.mrf.mxu0 }
 0x1df   :  { %v4104_v39 = vadd.f32 %v4103_v38, %v4091_v34  ;;  %v8172_v34 = vld [vmem:[%s10159_s5 + $0xd4] sm:$0xf0]  ;;  %v7460_v38 = vld [vmem:[%s10159_s5 + $0x8] sm:$0xf] }
 0x1e0   :  { %v4116_v40 = vpop.f32.mrf.mxu1  ;;  %v7453_v36 = vor.u32 %v8172_v34, %v7452_v33  ;;  %v8152_v34 = vld [vmem:[%s10159_s5 + $0x3c] sm:$0xf] }
 0x1e1   :  { %v4117_v41 = vadd.f32 %v4116_v40, %v4104_v39  ;;  %v8173_v39 = vld [vmem:[%s10159_s5 + $0xdc] sm:$0xf0] }
 0x1e2   :  { %v8202_v40 = vld [vmem:[%s10158_s4] ss:$0 sm:$0xff]  ;;  %4533 = vmatpush.bf16.msrb.mxu3 %v7453_v36 }
 0x1e3   :  { %v7532_v36 = vld [vmem:[%s10159_s5 + $0x40] sm:$0xf] }
 0x1e5   :  { %v4129_v42 = vpop.f32.mrf.mxu2 }
 0x1e6   :  { %v4130_v43 = vadd.f32 %v4129_v42, %v4117_v41  ;;  %v4105_v45 = vpop.f32.mrf.mxu0  ;;  %v7457_v41 = vor.u32 %v8145_v35, %v7454_v37  ;;  %v7461_v42 = vor.u32 %v8173_v39, %v7460_v38  ;;  %v7510_v35 = vld [vmem:[%s10159_s5 + $0x110] sm:$0xf0]  ;;  %v8180_v37 = vld [vmem:[%s10159_s5 + $0x114] sm:$0xf0]  ;;  %v7540_v38 = vld [vmem:[%s10159_s5 + $0x48] sm:$0xf] }
 0x1e7   :  { %v4142_v44 = vpop.f32.mrf.mxu3  ;;  %v8181_v39 = vld [vmem:[%s10159_s5 + $0x11c] sm:$0xf0] }
 0x1e8   :  { %v4143_v46 = vadd.f32 %v4142_v44, %v4130_v43  ;;  %v4118_v47 = vpop.f32.mrf.mxu1  ;;  %v8147_v43 = vld [vmem:[%s10159_s5 + $0x14] sm:$0xf]  ;;  %v7470_v44 = vld [vmem:[%s10159_s5 + $0xe8] sm:$0xf0]  ;;  %4546 = vmatpush.bf16.msra.mxu2 %v7457_v41  ;;  %4559 = vmatpush.bf16.msra.mxu1 %v7461_v42  ;;  %v7513_v42 = vor.u32 %v8152_v34, %v7510_v35  ;;  %v8190_v34 = vld [vmem:[%s10159_s5 + $0x164] sm:$0xf0] }
 0x1e9   :  { %v7473_v45 = vor.u32 %v8147_v43, %v7470_v44  ;;  %v7550_v41 = vld [vmem:[%s10159_s5 + $0x128] sm:$0xf0]  ;;  %v7533_v43 = vor.u32 %v8180_v37, %v7532_v36  ;;  %v7541_v44 = vor.u32 %v8181_v39, %v7540_v38  ;;  %v7636_v35 = vld [vmem:[%s10159_s5 + $0x98] sm:$0xf]  ;;  %v8191_v36 = vld [vmem:[%s10159_s5 + $0x16c] sm:$0xf0] }
 0x1ea   :  { %v8165_v37 = vld [vmem:[%s10159_s5 + $0xa4] sm:$0xf]  ;;  %v7646_v38 = vld [vmem:[%s10159_s5 + $0x178] sm:$0xf0] }
 0x1eb   :  { %4598 = vmatpush.bf16.msra.mxu0 %v7473_v45 }
 0x1ed   :  { %v4131_v48 = vpop.f32.mrf.mxu2 }
 0x1ee   :  { %v8146_v48 = vld [vmem:[%s10159_s5 + $0xc] sm:$0xf] }
 0x1ef   :  { %v4144_v49 = vpop.f32.mrf.mxu3 }
 0x1f0   :  { %v7462_v49 = vld [vmem:[%s10159_s5 + $0xe0] sm:$0xf0] }
 0x1fe   :  { %v4155_v50 = vpop.f32.mrf.mxu0 }
 0x1ff   :  { %v4156_v61 = vadd.f32 %v4155_v50, %v4143_v46  ;;  %v7468_v50 = vld [vmem:[%s10159_s5 + $0x10] sm:$0xf] }
 0x200   :  { %v4168_v51 = vpop.f32.mrf.mxu1 }
 0x201   :  { %v4169_v1 = vadd.f32 %v4168_v51, %v4156_v61 }
 0x205   :  { %v4181_v52 = vpop.f32.mrf.mxu2 }
 0x206   :  { %v4157_v54 = vpop.f32.mrf.mxu0  ;;  %v4182_v2 = vadd.f32 %v4181_v52, %v4169_v1  ;;  %v7465_v52 = vor.u32 %v8146_v48, %v7462_v49  ;;  %v7548_v48 = vld [vmem:[%s10159_s5 + $0x50] sm:$0xf]  ;;  %v8182_v49 = vld [vmem:[%s10159_s5 + $0x124] sm:$0xf0] }
 0x207   :  { %v4194_v53 = vpop.f32.mrf.mxu3  ;;  %v7476_v54 = vld [vmem:[%s10159_s5 + $0x18] sm:$0xf] }
 0x208   :  { %v4170_v55 = vpop.f32.mrf.mxu1  ;;  %v4195_v5 = vadd.f32 %v4194_v53, %v4182_v2  ;;  %v8174_v53 = vld [vmem:[%s10159_s5 + $0xe4] sm:$0xf0]  ;;  %4572 = vmatpush.bf16.msra.mxu3 %v7465_v52  ;;  %v8157_v52 = vld [vmem:[%s10159_s5 + $0x64] sm:$0xf] }
 0x209   :  { %v7469_v55 = vor.u32 %v8174_v53, %v7468_v50  ;;  %v7556_v50 = vld [vmem:[%s10159_s5 + $0x58] sm:$0xf]  ;;  %v7566_v53 = vld [vmem:[%s10159_s5 + $0x138] sm:$0xf0] }
 0x20d   :  { %v4183_v56 = vpop.f32.mrf.mxu2 }
 0x20e   :  { %v8175_v56 = vld [vmem:[%s10159_s5 + $0xec] sm:$0xf0] }
 0x20f   :  { %v4196_v57 = vpop.f32.mrf.mxu3 }
 0x210   :  { %v8149_v57 = vld [vmem:[%s10159_s5 + $0x24] sm:$0xf] }
 0x21e   :  { %v4207_v58 = vpop.f32.mrf.mxu0 }
 0x21f   :  { %v4208_v7 = vadd.f32 %v4207_v58, %v4195_v5  ;;  %v7486_v58 = vld [vmem:[%s10159_s5 + $0xf8] sm:$0xf0] }
 0x220   :  { %v4220_v59 = vpop.f32.mrf.mxu1 }
 0x221   :  { %v4221_v8 = vadd.f32 %v4220_v59, %v4208_v7  ;;  %v7477_v59 = vor.u32 %v8175_v56, %v7476_v54  ;;  %v7478_v7 = vld [vmem:[%s10159_s5 + $0xf0] sm:$0xf0] }
 0x223   :  { %4611 = vmatpush.bf16.msrb.mxu1 %v7477_v59  ;;  %v7558_v59 = vld [vmem:[%s10159_s5 + $0x130] sm:$0xf0] }
 0x225   :  { %v4233_v60 = vpop.f32.mrf.mxu2 }
 0x226   :  { %v4209_v63 = vpop.f32.mrf.mxu0  ;;  %v4234_v11 = vadd.f32 %v4233_v60, %v4221_v8  ;;  %v7489_v60 = vor.u32 %v8149_v57, %v7486_v58  ;;  %v7484_v8 = vld [vmem:[%s10159_s5 + $0x20] sm:$0xf]  ;;  %v7569_v57 = vor.u32 %v8157_v52, %v7566_v53  ;;  %v8156_v58 = vld [vmem:[%s10159_s5 + $0x5c] sm:$0xf] }
 0x227   :  { %v4246_v62 = vpop.f32.mrf.mxu3 }
 0x228   :  { %v4222_v0 = vpop.f32.mrf.mxu1  ;;  %v4247_v15 = vadd.f32 %v4246_v62, %v4234_v11  ;;  %4650 = vmatpush.bf16.msrb.mxu0 %v7489_v60  ;;  %v7492_v11 = vld [vmem:[%s10159_s5 + $0x28] sm:$0xf]  ;;  %v7564_v60 = vld [vmem:[%s10159_s5 + $0x60] sm:$0xf] }
 0x22d   :  { %v4235_v3 = vpop.f32.mrf.mxu2 }
 0x22f   :  { %v4248_v4 = vpop.f32.mrf.mxu3 }
 0x230   :  { %v4272_v6 = vpop.f32.mrf.mxu1 }
 0x238   :  { %v4274_v13 = vpop.f32.mrf.mxu1 }
 0x239   :  { %v8177_v13 = vld [vmem:[%s10159_s5 + $0xfc] sm:$0xf0] }
 0x23e   :  { %v4259_v16 = vpop.f32.mrf.mxu0 }
 0x23f   :  { %v4260_v17 = vadd.f32 %v4259_v16, %v4247_v15  ;;  %v7502_v15 = vld [vmem:[%s10159_s5 + $0x108] sm:$0xf0] }
 0x241   :  { %v4273_v18 = vadd.f32 %v4272_v6, %v4260_v17  ;;  %v8148_v6 = vld [vmem:[%s10159_s5 + $0x1c] sm:$0xf] }
 0x243   :  { %v7447_v19 = vmul.f32 -1.442695, %v4273_v18  ;;  %v7481_v18 = vor.u32 %v8148_v6, %v7478_v7  ;;  %v8158_v6 = vld [vmem:[%s10159_s5 + $0x6c] sm:$0xf]  ;;  %v7574_v7 = vld [vmem:[%s10159_s5 + $0x140] sm:$0xf0] }
 0x245   :  { %8203 = vpow2.f32 %v7447_v19  ;;  %v7485_v19 = vor.u32 %v8176_v10, %v7484_v8  ;;  %v7580_v8 = vld [vmem:[%s10159_s5 + $0x70] sm:$0xf]  ;;  %v7588_v10 = vld [vmem:[%s10159_s5 + $0x78] sm:$0xf] }
 0x246   :  { %v4261_v20 = vpop.f32.mrf.mxu0 }
 0x247   :  { %v7493_v20 = vor.u32 %v8177_v13, %v7492_v11  ;;  %v8187_v11 = vld [vmem:[%s10159_s5 + $0x14c] sm:$0xf0]  ;;  %v7614_v13 = vld [vmem:[%s10159_s5 + $0x158] sm:$0xf0] }
 0x24b   :  { %v8204_v21 = vpop.eup %8203 }
 0x24c   :  { %v4279_v22 = vadd.f32 1.0, %v8204_v21  ;;  %v7505_v21 = vor.u32 %v8151_v14, %v7502_v15  ;;  %v7577_v14 = vor.u32 %v8158_v6, %v7574_v7  ;;  %v7694_v6 = vld [vmem:[%s10159_s5 + $0x198] sm:$0xf0] }
 0x24e   :  { %8205 = vrcp.f32 %v4279_v22  ;;  %v4291_v26 = vand.u32 2147483648, %v4279_v22  ;;  %v4289_v28 = vand.u32 2147483647, %v4279_v22  ;;  %vm4285_vm4 = vweird.f32 %v4279_v22 }
 0x250   :  { %v4292_v30 = vor.u32 1.1754944e-38, %v4291_v26  ;;  %vm4290_vm7 = vcmp.eq.f32.partialorder %v4289_v28, 8.507059e+37  ;;  %v7508_v26 = vld [vmem:[%s10159_s5 + $0x38] sm:$0xf]  ;;  %v8153_v28 = vld [vmem:[%s10159_s5 + $0x44] sm:$0xf] }
 0x254   :  { %v8206_v23 = vpop.eup %8205 }
 0x255   :  { %v4281_v24 = vmul.f32 %v8206_v23, %v4279_v22  ;;  %vm4286_vm3 = vweird.f32 %v8206_v23  ;;  %v8150_v22 = vld [vmem:[%s10159_s5 + $0x2c] sm:$0xf] }
 0x256   :  { %vm4287_vm5 = vmor %vm4285_vm4, %vm4286_vm3  ;;  %vm4778_vm3 = vcmask 1046534   ;;  %vm4782_vm4 = vcmask 1045508  }
 0x257   :  { %v4282_v25 = vsub.f32 1.0, %v4281_v24  ;;  %v7500_v24 = vld [vmem:[%s10159_s5 + $0x30] sm:$0xf] }
 0x259   :  { %v4283_v27 = vmul.f32 %v8206_v23, %v4282_v25  ;;  %v8178_v25 = vld [vmem:[%s10159_s5 + $0x104] sm:$0xf0] }
 0x25b   :  { %v4284_v29 = vadd.f32 %v8206_v23, %v4283_v27  ;;  %v8179_v27 = vld [vmem:[%s10159_s5 + $0x10c] sm:$0xf0] }
 0x25d   :  { %v4288_v31 = vsel %vm4287_vm5, %v8206_v23, %v4284_v29  ;;  %v7494_v23 = vld [vmem:[%s10159_s5 + $0x100] sm:$0xf0]  ;;  %v7534_v29 = vld [vmem:[%s10159_s5 + $0x118] sm:$0xf0]  ;;  %vm5722_vm5 = vcmask 1041409  }
 0x25e   :  { %v4293_v32 = vsel %vm4290_vm7, %v4292_v30, %v4288_v31  ;;  %v7497_v30 = vor.u32 %v8150_v22, %v7494_v23  ;;  %v7501_v31 = vor.u32 %v8178_v25, %v7500_v24  ;;  %v7537_v33 = vor.u32 %v8153_v28, %v7534_v29  ;;  %v8188_v22 = vld [vmem:[%s10159_s5 + $0x154] sm:$0xf0]  ;;  %v7620_v23 = vld [vmem:[%s10159_s5 + $0x88] sm:$0xf]  ;;  %v8189_v24 = vld [vmem:[%s10159_s5 + $0x15c] sm:$0xf0] }
 0x25f   :  { %7448 = vmatmul.msk.f32.vlgmr.msrb.gmra.mxu2 %vm4303_vm6, %v4293_v32  ;;  %v7509_v32 = vor.u32 %v8179_v27, %v7508_v26  ;;  %v8163_v25 = vld [vmem:[%s10159_s5 + $0x94] sm:$0xf]  ;;  %v7630_v26 = vld [vmem:[%s10159_s5 + $0x168] sm:$0xf0]  ;;  %v7621_v29 = vor.u32 %v8189_v24, %v7620_v23  ;;  %vm5723_vm6 = vmor %vm5722_vm5, %vm4764_vm14  ;;  %vm5713_vm7 = vcmask 1043459  }
 0x260   :  { %4585 = vmatpush.bf16.msrb.mxu2 %v7469_v55  ;;  %v7549_v55 = vor.u32 %v8182_v49, %v7548_v48  ;;  %v8193_v48 = vld [vmem:[%s10159_s5 + $0x17c] sm:$0xf0]  ;;  %v8167_v49 = vld [vmem:[%s10159_s5 + $0xb4] sm:$0xf] }
 0x2e2   :  { %v4324_v46 = vpop.f32.mrf.mxu2 }
 0x2e3   :  { %v4325_v47 = vadd.f32 %v8202_v40, %v4324_v46  ;;  %v8155_v40 = vld [vmem:[%s10159_s5 + $0x54] sm:$0xf]  ;;  %v8154_v46 = vld [vmem:[%s10159_s5 + $0x4c] sm:$0xf] }
 0x2e4   :  { %v7553_v45 = vor.u32 %v8155_v40, %v7550_v41  ;;  %v7637_v41 = vor.u32 %v8191_v36, %v7636_v35  ;;  %v7710_v35 = vld [vmem:[%s10159_s5 + $0x1a8] sm:$0xf0] }
 0x2e5   :  { %v7449_v51 = vmul.f32 -1.442695, %v4325_v47  ;;  %v7542_v47 = vld [vmem:[%s10159_s5 + $0x120] sm:$0xf0] }
 0x2e6   :  { %v7545_v54 = vor.u32 %v8154_v46, %v7542_v47  ;;  %v8192_v46 = vld [vmem:[%s10159_s5 + $0x174] sm:$0xf0]  ;;  %v7652_v47 = vld [vmem:[%s10159_s5 + $0xa8] sm:$0xf] }
 0x2e7   :  { %8207 = vpow2.f32 %v7449_v51  ;;  %v8183_v51 = vld [vmem:[%s10159_s5 + $0x12c] sm:$0xf0] }
 0x2e8   :  { %v7557_v56 = vor.u32 %v8183_v51, %v7556_v50  ;;  %v7662_v50 = vld [vmem:[%s10159_s5 + $0x188] sm:$0xf0] }
 0x2ed   :  { %v8208_v61 = vpop.eup %8207 }
 0x2ee   :  { %v4330_v62 = vadd.f32 1.0, %v8208_v61  ;;  %v8184_v61 = vld [vmem:[%s10159_s5 + $0x134] sm:$0xf0] }
 0x2f0   :  { %8209 = vrcp.f32 %v4330_v62  ;;  %v4340_v2 = vand.u32 2147483647, %v4330_v62  ;;  %v4342_v3 = vand.u32 2147483648, %v4330_v62  ;;  %vm4336_vm9 = vweird.f32 %v4330_v62 }
 0x2f2   :  { %vm4341_vm11 = vcmp.eq.f32.partialorder %v4340_v2, 8.507059e+37  ;;  %v4343_v9 = vor.u32 1.1754944e-38, %v4342_v3  ;;  %v7561_v2 = vor.u32 %v8156_v58, %v7558_v59  ;;  %v7565_v3 = vor.u32 %v8184_v61, %v7564_v60  ;;  %v8166_v61 = vld [vmem:[%s10159_s5 + $0xac] sm:$0xf] }
 0x2f6   :  { %v8210_v63 = vpop.eup %8209 }
 0x2f7   :  { %v4332_v0 = vmul.f32 %v8210_v63, %v4330_v62  ;;  %vm4337_vm8 = vweird.f32 %v8210_v63  ;;  %v7572_v62 = vld [vmem:[%s10159_s5 + $0x68] sm:$0xf] }
 0x2f8   :  { %vm4338_vm10 = vmor %vm4336_vm9, %vm4337_vm8  ;;  %vm5717_vm9 = vcmask 1044483  }
 0x2f9   :  { %v4333_v1 = vsub.f32 1.0, %v4332_v0  ;;  %v8159_v0 = vld [vmem:[%s10159_s5 + $0x74] sm:$0xf]  ;;  %vm5724_vm8 = vmor %vm4768_vm13, %vm5723_vm6 }
 0x2fb   :  { %v4334_v4 = vmul.f32 %v8210_v63, %v4333_v1  ;;  %v7582_v1 = vld [vmem:[%s10159_s5 + $0x148] sm:$0xf0] }
 0x2fd   :  { %v4335_v5 = vadd.f32 %v8210_v63, %v4334_v4 }
 0x2ff   :  { %v4339_v12 = vsel %vm4338_vm10, %v8210_v63, %v4335_v5  ;;  %v8185_v63 = vld [vmem:[%s10159_s5 + $0x13c] sm:$0xf0]  ;;  %v7585_v5 = vor.u32 %v8159_v0, %v7582_v1  ;;  %v7660_v1 = vld [vmem:[%s10159_s5 + $0xb0] sm:$0xf] }
 0x300   :  { %v4344_v16 = vsel %vm4341_vm11, %v4343_v9, %v4339_v12  ;;  %v7573_v4 = vor.u32 %v8185_v63, %v7572_v62  ;;  %v8186_v9 = vld [vmem:[%s10159_s5 + $0x144] sm:$0xf0]  ;;  %v8161_v12 = vld [vmem:[%s10159_s5 + $0x84] sm:$0xf]  ;;  %vm5727_vm11 = vcmask 185349  }
 0x301   :  { %v9691_v17 = vpack.c.bf16 %v4344_v16, %v4344_v16  ;;  %v7581_v15 = vor.u32 %v8186_v9, %v7580_v8  ;;  %v7589_v16 = vor.u32 %v8187_v11, %v7588_v10  ;;  %v7654_v62 = vld [vmem:[%s10159_s5 + $0x180] sm:$0xf0] }
 0x302   :  { %v7657_v9 = vor.u32 %v8166_v61, %v7654_v62 }
 0x303   :  { %7514 = vmatmul.msk.bf16.vlgmr.msrb.gmra.mxu3 %vm4522_vm12, %v9691_v17  ;;  %7515 = vmatmul.msk.bf16.vlgmr.msra.gmra.mxu2 %vm4522_vm12, %v9691_v17 }
 0x304   :  { %7516 = vmatmul.msk.bf16.vlgmr.msra.gmra.mxu1 %vm4522_vm12, %v9691_v17  ;;  %7519 = vmatmul.msk.bf16.vlgmr.msra.gmra.mxu0 %vm4522_vm12, %v9691_v17 }
 0x305   :  { %4624 = vmatpush.bf16.msrb.mxu3 %v7481_v18  ;;  %4637 = vmatpush.bf16.msra.mxu2 %v7485_v19  ;;  %v7617_v18 = vor.u32 %v8161_v12, %v7614_v13  ;;  %v8160_v19 = vld [vmem:[%s10159_s5 + $0x7c] sm:$0xf] }
 0x306   :  { %4663 = vmatpush.bf16.msra.mxu1 %v7493_v20  ;;  %4702 = vmatpush.bf16.msra.mxu0 %v7505_v21  ;;  %v7590_v20 = vld [vmem:[%s10159_s5 + $0x150] sm:$0xf0]  ;;  %v7612_v21 = vld [vmem:[%s10159_s5 + $0x80] sm:$0xf] }
 0x307   :  { %v7593_v27 = vor.u32 %v8160_v19, %v7590_v20  ;;  %v7613_v28 = vor.u32 %v8188_v22, %v7612_v21 }
 0x313   :  { %7517 = vmatmul.msk.bf16.vlgmr.msra.gmra.mxu3 %vm4522_vm12, %v9691_v17  ;;  %7518 = vmatmul.msk.bf16.vlgmr.msrb.gmra.mxu2 %vm4522_vm12, %v9691_v17 }
 0x314   :  { %7520 = vmatmul.msk.bf16.vlgmr.msrb.gmra.mxu1 %vm4522_vm12, %v9691_v17  ;;  %7523 = vmatmul.msk.bf16.vlgmr.msrb.gmra.mxu0 %vm4522_vm12, %v9691_v17 }
 0x315   :  { %4676 = vmatpush.bf16.msra.mxu3 %v7497_v30  ;;  %4689 = vmatpush.bf16.msrb.mxu2 %v7501_v31  ;;  %v7633_v30 = vor.u32 %v8163_v25, %v7630_v26  ;;  %v8162_v31 = vld [vmem:[%s10159_s5 + $0x8c] sm:$0xf]  ;;  %v8168_v25 = vld [vmem:[%s10159_s5 + $0xbc] sm:$0xf]  ;;  %v7670_v26 = vld [vmem:[%s10159_s5 + $0x190] sm:$0xf0] }
 0x316   :  { %4715 = vmatpush.bf16.msrb.mxu1 %v7509_v32  ;;  %4938 = vmatpush.bf16.msrb.mxu0 %v7537_v33  ;;  %v7622_v32 = vld [vmem:[%s10159_s5 + $0x160] sm:$0xf0]  ;;  %v7628_v33 = vld [vmem:[%s10159_s5 + $0x90] sm:$0xf] }
 0x317   :  { %v7625_v39 = vor.u32 %v8162_v31, %v7622_v32  ;;  %v7629_v40 = vor.u32 %v8190_v34, %v7628_v33  ;;  %v7700_v31 = vld [vmem:[%s10159_s5 + $0xc8] sm:$0xf]  ;;  %v8197_v33 = vld [vmem:[%s10159_s5 + $0x19c] sm:$0xf0]  ;;  %v8171_v34 = vld [vmem:[%s10159_s5 + $0xd4] sm:$0xf] }
 0x323   :  { %7521 = vmatmul.msk.bf16.vlgmr.msrb.gmra.mxu3 %vm4522_vm12, %v9691_v17  ;;  %7522 = vmatmul.msk.bf16.vlgmr.msra.gmra.mxu2 %vm4522_vm12, %v9691_v17 }
 0x324   :  { %7524 = vmatmul.msk.bf16.vlgmr.msra.gmra.mxu1 %vm4522_vm12, %v9691_v17  ;;  %7527 = vmatmul.msk.bf16.vlgmr.msra.gmra.mxu0 %vm4522_vm12, %v9691_v17 }
 0x325   :  { %4728 = vmatpush.bf16.msrb.mxu3 %v7513_v42  ;;  %4925 = vmatpush.bf16.msra.mxu2 %v7533_v43  ;;  %v7649_v42 = vor.u32 %v8165_v37, %v7646_v38  ;;  %v8164_v43 = vld [vmem:[%s10159_s5 + $0x9c] sm:$0xf] }
 0x326   :  { %4951 = vmatpush.bf16.msra.mxu1 %v7541_v44  ;;  %4990 = vmatpush.bf16.msra.mxu0 %v7553_v45  ;;  %v7638_v44 = vld [vmem:[%s10159_s5 + $0x170] sm:$0xf0]  ;;  %v7644_v45 = vld [vmem:[%s10159_s5 + $0xa0] sm:$0xf] }
 0x327   :  { %v7641_v53 = vor.u32 %v8164_v43, %v7638_v44  ;;  %v7701_v44 = vor.u32 %v8197_v33, %v7700_v31 }
 0x333   :  { %7525 = vmatmul.msk.bf16.vlgmr.msra.gmra.mxu3 %vm4522_vm12, %v9691_v17  ;;  %7526 = vmatmul.msk.bf16.vlgmr.msrb.gmra.mxu2 %vm4522_vm12, %v9691_v17 }
 0x334   :  { %7528 = vmatmul.msk.bf16.vlgmr.msrb.gmra.mxu1 %vm4522_vm12, %v9691_v17  ;;  %7595 = vmatmul.msk.bf16.vlgmr.msrb.gmra.mxu0 %vm4522_vm12, %v9691_v17 }
 0x335   :  { %4964 = vmatpush.bf16.msra.mxu3 %v7545_v54  ;;  %4977 = vmatpush.bf16.msrb.mxu2 %v7549_v55  ;;  %v7645_v54 = vor.u32 %v8192_v46, %v7644_v45  ;;  %v7653_v55 = vor.u32 %v8193_v48, %v7652_v47  ;;  %v7713_v45 = vor.u32 %v8171_v34, %v7710_v35 }
 0x336   :  { %5003 = vmatpush.bf16.msrb.mxu1 %v7557_v56  ;;  %5042 = vmatpush.bf16.msrb.mxu0 %v7569_v57  ;;  %v7665_v56 = vor.u32 %v8167_v49, %v7662_v50 }
 0x343   :  { %7529 = vmatmul.msk.bf16.vlgmr.msrb.gmra.mxu3 %vm4522_vm12, %v9691_v17  ;;  %7594 = vmatmul.msk.bf16.vlgmr.msra.gmra.mxu2 %vm4522_vm12, %v9691_v17 }
 0x344   :  { %7596 = vmatmul.msk.bf16.vlgmr.msra.gmra.mxu1 %vm4522_vm12, %v9691_v17  ;;  %7599 = vmatmul.msk.bf16.vlgmr.msra.gmra.mxu0 %vm4522_vm12, %v9691_v17 }
 0x345   :  { %5016 = vmatpush.bf16.msrb.mxu3 %v7561_v2  ;;  %5029 = vmatpush.bf16.msra.mxu2 %v7565_v3  ;;  %v8194_v2 = vld [vmem:[%s10159_s5 + $0x184] sm:$0xf0]  ;;  %v7668_v3 = vld [vmem:[%s10159_s5 + $0xb8] sm:$0xf] }
 0x346   :  { %5055 = vmatpush.bf16.msra.mxu1 %v7573_v4  ;;  %5094 = vmatpush.bf16.msra.mxu0 %v7585_v5  ;;  %v8195_v4 = vld [vmem:[%s10159_s5 + $0x18c] sm:$0xf0]  ;;  %v8169_v5 = vld [vmem:[%s10159_s5 + $0xc4] sm:$0xf]  ;;  %v7661_v10 = vor.u32 %v8194_v2, %v7660_v1 }
 0x347   :  { %v7669_v11 = vor.u32 %v8195_v4, %v7668_v3  ;;  %v7697_v12 = vor.u32 %v8169_v5, %v7694_v6  ;;  %v8170_v6 = vld [vmem:[%s10159_s5 + $0xcc] sm:$0xf] }
 0x353   :  { %7597 = vmatmul.msk.bf16.vlgmr.msra.gmra.mxu3 %vm4522_vm12, %v9691_v17  ;;  %7598 = vmatmul.msk.bf16.vlgmr.msrb.gmra.mxu2 %vm4522_vm12, %v9691_v17 }
 0x354   :  { %7600 = vmatmul.msk.bf16.vlgmr.msrb.gmra.mxu1 %vm4522_vm12, %v9691_v17  ;;  %7603 = vmatmul.msk.bf16.vlgmr.msrb.gmra.mxu0 %vm4522_vm12, %v9691_v17 }
 0x355   :  { %5068 = vmatpush.bf16.msra.mxu3 %v7577_v14  ;;  %5081 = vmatpush.bf16.msrb.mxu2 %v7581_v15  ;;  %v4400_v15 = vld [vmem:[%s10160_s6] sm:$0xff] }
 0x356   :  { %5107 = vmatpush.bf16.msrb.mxu1 %v7589_v16  ;;  %5324 = vmatpush.bf16.msrb.mxu0 %v7617_v18  ;;  %v4413_v19 = vperm.slane %v4400_v15, 3  ;;  %v4412_v20 = vperm.slane %v4400_v15, 2  ;;  %v4415_v21 = vperm.slane %v4400_v15, 5  ;;  %v4410_v22 = vperm.slane %v4400_v15, 0 }
 0x357   :  { %v4411_v23 = vperm.slane %v4400_v15, 1  ;;  %v4414_v24 = vperm.slane %v4400_v15, 4  ;;  %v4416_v47 = vperm.slane %v4400_v15, 6  ;;  %v4417_v49 = vperm.slane %v4400_v15, 7 }
 0x363   :  { %7601 = vmatmul.msk.bf16.vlgmr.msrb.gmra.mxu3 %vm4522_vm12, %v9691_v17  ;;  %7602 = vmatmul.msk.bf16.vlgmr.msra.gmra.mxu2 %vm4522_vm12, %v9691_v17 }
 0x364   :  { %7604 = vmatmul.msk.bf16.vlgmr.msra.gmra.mxu1 %vm4522_vm12, %v9691_v17  ;;  %7607 = vmatmul.msk.bf16.vlgmr.msra.gmra.mxu0 %vm4522_vm12, %v9691_v17 }
 0x365   :  { %5120 = vmatpush.bf16.msrb.mxu3 %v7593_v27  ;;  %5311 = vmatpush.bf16.msra.mxu2 %v7613_v28 }
 0x366   :  { %5337 = vmatpush.bf16.msra.mxu1 %v7621_v29  ;;  %5376 = vmatpush.bf16.msra.mxu0 %v7633_v30  ;;  %v7692_v29 = vld [vmem:[%s10159_s5 + $0xc0] sm:$0xf]  ;;  %v8196_v30 = vld [vmem:[%s10159_s5 + $0x194] sm:$0xf0] }
 0x367   :  { %v7693_v43 = vor.u32 %v8196_v30, %v7692_v29 }
 0x373   :  { %7605 = vmatmul.msk.bf16.vlgmr.msra.gmra.mxu3 %vm4522_vm12, %v9691_v17  ;;  %7606 = vmatmul.msk.bf16.vlgmr.msrb.gmra.mxu2 %vm4522_vm12, %v9691_v17 }
 0x374   :  { %7608 = vmatmul.msk.bf16.vlgmr.msrb.gmra.mxu1 %vm4522_vm12, %v9691_v17  ;;  %7675 = vmatmul.msk.bf16.vlgmr.msrb.gmra.mxu0 %vm4522_vm12, %v9691_v17 }
 0x375   :  { %5350 = vmatpush.bf16.msra.mxu3 %v7625_v39  ;;  %5363 = vmatpush.bf16.msrb.mxu2 %v7629_v40 }
 0x376   :  { %5389 = vmatpush.bf16.msrb.mxu1 %v7637_v41  ;;  %5428 = vmatpush.bf16.msrb.mxu0 %v7649_v42  ;;  %v7673_v42 = vor.u32 %v8168_v25, %v7670_v26  ;;  %v4401_v25 = vld [vmem:[%s10160_s6 + $0x8] sm:$0xff] }
 0x377   :  { %v4421_v26 = vperm.slane %v4401_v25, 3  ;;  %v4422_v29 = vperm.slane %v4401_v25, 4  ;;  %v4423_v33 = vperm.slane %v4401_v25, 5 }
 0x381   :  { %v9949_v51 = vpop.f32.mrf.mxu1  ;;  %v9951_v52 = vpop.f32.mrf.mxu0 }
 0x382   :  { %v4562_v36 = vadd.f32 %v9949_v51, %v4412_v20  ;;  %v4601_v46 = vadd.f32 %v9951_v52, %v4415_v21 }
 0x383   :  { %7609 = vmatmul.msk.bf16.vlgmr.msrb.gmra.mxu3 %vm4522_vm12, %v9691_v17  ;;  %7674 = vmatmul.msk.bf16.vlgmr.msra.gmra.mxu2 %vm4522_vm12, %v9691_v17 }
 0x384   :  { %7676 = vmatmul.msk.bf16.vlgmr.msra.gmra.mxu1 %vm4522_vm12, %v9691_v17  ;;  %7679 = vmatmul.msk.bf16.vlgmr.msra.gmra.mxu0 %vm4522_vm12, %v9691_v17 }
 0x385   :  { %5402 = vmatpush.bf16.msrb.mxu3 %v7641_v53  ;;  %5415 = vmatpush.bf16.msra.mxu2 %v7645_v54 }
 0x386   :  { %v4535_v57 = vpop.f32.mrf.mxu3  ;;  %v4548_v58 = vpop.f32.mrf.mxu2  ;;  %5441 = vmatpush.bf16.msra.mxu1 %v7653_v55  ;;  %5480 = vmatpush.bf16.msra.mxu0 %v7665_v56 }
 0x387   :  { %v4536_v37 = vadd.f32 %v4535_v57, %v4410_v22  ;;  %v4549_v38 = vadd.f32 %v4548_v58, %v4411_v23 }
 0x389   :  { %v4563_v59 = vpop.f32.mrf.mxu1  ;;  %v4602_v60 = vpop.f32.mrf.mxu0  ;;  %v4734_v50 = vpack.c.bf16 %v4549_v38, %v4536_v37 }
 0x38b   :  { %v4750_v58 = vrot.slane %v4734_v50, 3 }
 0x38d   :  { %v4767_v3 = vsel %vm4764_vm14, %v4734_v50, %v4750_v58 }
 0x38e   :  { %v4537_v63 = vpop.f32.mrf.mxu3  ;;  %v4550_v0 = vpop.f32.mrf.mxu2 }
 0x391   :  { %v4613_v7 = vpop.f32.mrf.mxu1  ;;  %v9985_v8 = vpop.f32.mrf.mxu0 }
 0x392   :  { %v4614_v54 = vadd.f32 %v4613_v7, %v4416_v47 }
 0x393   :  { %7677 = vmatmul.msk.bf16.vlgmr.msra.gmra.mxu3 %vm4522_vm12, %v9691_v17  ;;  %7678 = vmatmul.msk.bf16.vlgmr.msrb.gmra.mxu2 %vm4522_vm12, %v9691_v17 }
 0x394   :  { %7680 = vmatmul.msk.bf16.vlgmr.msrb.gmra.mxu1 %vm4522_vm12, %v9691_v17  ;;  %7683 = vmatmul.msk.bf16.vlgmr.msrb.gmra.mxu0 %vm4522_vm12, %v9691_v17 }
 0x395   :  { %5454 = vmatpush.bf16.msra.mxu3 %v7657_v9  ;;  %5467 = vmatpush.bf16.msrb.mxu2 %v7661_v10 }
 0x396   :  { %v4574_v13 = vpop.f32.mrf.mxu3  ;;  %v4587_v14 = vpop.f32.mrf.mxu2  ;;  %5493 = vmatpush.bf16.msrb.mxu1 %v7669_v11  ;;  %5639 = vmatpush.bf16.msrb.mxu0 %v7697_v12  ;;  %v7702_v12 = vld [vmem:[%s10159_s5 + $0x1a0] sm:$0xf0] }
 0x397   :  { %v4575_v32 = vadd.f32 %v4574_v13, %v4413_v19  ;;  %v4588_v39 = vadd.f32 %v4587_v14, %v4414_v24  ;;  %v7708_v13 = vld [vmem:[%s10159_s5 + $0xd0] sm:$0xf]  ;;  %v8198_v14 = vld [vmem:[%s10159_s5 + $0x1a4] sm:$0xf0]  ;;  %v7705_v19 = vor.u32 %v8170_v6, %v7702_v12 }
 0x398   :  { %v7709_v20 = vor.u32 %v8198_v14, %v7708_v13  ;;  %v4402_v12 = vld [vmem:[%s10160_s6 + $0x10] sm:$0xff] }
 0x399   :  { %v4615_v16 = vpop.f32.mrf.mxu1  ;;  %v4654_v18 = vpop.f32.mrf.mxu0  ;;  %v4735_v48 = vpack.c.bf16 %v4575_v32, %v4562_v36  ;;  %v4736_v51 = vpack.c.bf16 %v4601_v46, %v4588_v39  ;;  %v4419_v32 = vperm.slane %v4401_v25, 1  ;;  %v4425_v46 = vperm.slane %v4401_v25, 7 }
 0x39a   :  { %v4809_v13 = vperm.slane %v4402_v12, 3  ;;  %v4808_v14 = vperm.slane %v4402_v12, 2 }
 0x39b   :  { %v4751_v55 = vrot.slane %v4735_v48, 6  ;;  %v4752_v56 = vrot.slane %v4735_v48, 1  ;;  %v4753_v59 = vrot.slane %v4736_v51, 4  ;;  %v4754_v60 = vrot.slane %v4736_v51, 7 }
 0x39d   :  { %v4771_v0 = vsel %vm4768_vm13, %v4751_v55, %v4752_v56  ;;  %v4777_v4 = vsel %vm4774_vm2, %v4753_v59, %v4754_v60 }
 0x39e   :  { %v4576_v27 = vpop.f32.mrf.mxu3  ;;  %v4589_v28 = vpop.f32.mrf.mxu2  ;;  %v4773_v7 = vsel %vm4772_vm15, %v4767_v3, %v4771_v0 }
 0x39f   :  { %v4420_v27 = vperm.slane %v4401_v25, 2  ;;  %v4418_v28 = vperm.slane %v4401_v25, 0 }
 0x3a1   :  { %v10023_v40 = vpop.f32.mrf.mxu1  ;;  %v10025_v41 = vpop.f32.mrf.mxu0 }
 0x3a2   :  { %v4666_v35 = vadd.f32 %v10023_v40, %v4420_v27 }
 0x3a3   :  { %7681 = vmatmul.msk.bf16.vlgmr.msrb.gmra.mxu3 %vm4522_vm12, %v9691_v17  ;;  %7682 = vmatmul.msk.bf16.vlgmr.msra.gmra.mxu2 %vm4522_vm12, %v9691_v17 }
 0x3a4   :  { %7684 = vmatmul.msk.bf16.vlgmr.msra.gmra.mxu1 %vm4522_vm12, %v9691_v17  ;;  %7687 = vmatmul.msk.bf16.vlgmr.msra.gmra.mxu0 %vm4522_vm12, %v9691_v17 }
 0x3a5   :  { %5506 = vmatpush.bf16.msrb.mxu3 %v7673_v42  ;;  %5626 = vmatpush.bf16.msra.mxu2 %v7693_v43  ;;  %v4424_v42 = vperm.slane %v4401_v25, 6  ;;  %v4653_v43 = vadd.f32 %v9985_v8, %v4419_v32  ;;  %v4813_v32 = vperm.slane %v4402_v12, 7 }
 0x3a6   :  { %v4626_v52 = vpop.f32.mrf.mxu3  ;;  %v4639_v53 = vpop.f32.mrf.mxu2  ;;  %5652 = vmatpush.bf16.msra.mxu1 %v7701_v44  ;;  %5691 = vmatpush.bf16.msra.mxu0 %v7713_v45  ;;  %v4705_v44 = vadd.f32 %v10025_v41, %v4423_v33 }
 0x3a7   :  { %v4627_v57 = vadd.f32 %v4626_v52, %v4417_v49  ;;  %v4640_v36 = vadd.f32 %v4639_v53, %v4418_v28  ;;  %v4812_v28 = vperm.slane %v4402_v12, 6 }
 0x3a9   :  { %v4737_v61 = vpack.c.bf16 %v4627_v57, %v4614_v54  ;;  %v4667_v62 = vpop.f32.mrf.mxu1  ;;  %v4706_v63 = vpop.f32.mrf.mxu0  ;;  %v4738_v40 = vpack.c.bf16 %v4653_v43, %v4640_v36 }
 0x3ab   :  { %v4755_v1 = vrot.slane %v4737_v61, 2  ;;  %v4756_v2 = vrot.slane %v4737_v61, 5  ;;  %v4757_v52 = vrot.slane %v4738_v40, 3 }
 0x3ad   :  { %v4781_v5 = vsel %vm4778_vm3, %v4755_v1, %v4756_v2  ;;  %v4787_v61 = vsel %vm4764_vm14, %v4738_v40, %v4757_v52 }
 0x3ae   :  { %v4783_v9 = vsel %vm4782_vm4, %v4777_v4, %v4781_v5  ;;  %v4628_v10 = vpop.f32.mrf.mxu3  ;;  %v4641_v11 = vpop.f32.mrf.mxu2 }
 0x3af   :  { %v4784_v15 = vsel %vm3568_vm1, %v4773_v7, %v4783_v9 }
 0x3b0   :  { %4802 = vst [vmem:[#allocation2] sm:$0xff] %v4784_v15  ;;  %v4806_v15 = vperm.slane %v4402_v12, 0 }
 0x3b1   :  { %v4717_v16 = vpop.f32.mrf.mxu1  ;;  %v10055_v18 = vpop.f32.mrf.mxu0 }
 0x3b2   :  { %v4718_v49 = vadd.f32 %v4717_v16, %v4424_v42  ;;  %v4810_v16 = vperm.slane %v4402_v12, 4 }
 0x3b3   :  { %7685 = vmatmul.msk.bf16.vlgmr.msra.gmra.mxu3 %vm4522_vm12, %v9691_v17  ;;  %7686 = vmatmul.msk.bf16.vlgmr.msrb.gmra.mxu2 %vm4522_vm12, %v9691_v17 }
 0x3b4   :  { %7688 = vmatmul.msk.bf16.vlgmr.msrb.gmra.mxu1 %vm4522_vm12, %v9691_v17  ;;  %7715 = vmatmul.msk.bf16.vlgmr.msrb.gmra.mxu0 %vm4522_vm12, %v9691_v17 }
 0x3b5   :  { %5665 = vmatpush.bf16.msra.mxu3 %v7705_v19  ;;  %5678 = vmatpush.bf16.msrb.mxu2 %v7709_v20 }
 0x3b6   :  { %v4678_v21 = vpop.f32.mrf.mxu3  ;;  %v4691_v22 = vpop.f32.mrf.mxu2 }
 0x3b7   :  { %v4679_v34 = vadd.f32 %v4678_v21, %v4421_v26  ;;  %v4692_v37 = vadd.f32 %v4691_v22, %v4422_v29  ;;  %v4807_v21 = vperm.slane %v4402_v12, 1  ;;  %v4811_v22 = vperm.slane %v4402_v12, 5 }
 0x3b9   :  { %v4719_v23 = vpop.f32.mrf.mxu1  ;;  %v4942_v24 = vpop.f32.mrf.mxu0  ;;  %v4739_v45 = vpack.c.bf16 %v4679_v34, %v4666_v35  ;;  %v4740_v47 = vpack.c.bf16 %v4705_v44, %v4692_v37  ;;  %v4941_v29 = vadd.f32 %v10055_v18, %v4807_v21 }
 0x3bb   :  { %v4758_v41 = vrot.slane %v4739_v45, 6  ;;  %v4759_v50 = vrot.slane %v4739_v45, 1  ;;  %v4760_v53 = vrot.slane %v4740_v47, 4  ;;  %v4761_v54 = vrot.slane %v4740_v47, 7 }
 0x3bd   :  { %v4790_v58 = vsel %vm4768_vm13, %v4758_v41, %v4759_v50  ;;  %v4794_v62 = vsel %vm4774_vm2, %v4760_v53, %v4761_v54 }
 0x3be   :  { %v4680_v30 = vpop.f32.mrf.mxu3  ;;  %v4693_v31 = vpop.f32.mrf.mxu2  ;;  %v4791_v0 = vsel %vm4772_vm15, %v4787_v61, %v4790_v58 }
 0x3c1   :  { %v4953_v38 = vpop.f32.mrf.mxu1  ;;  %v4992_v39 = vpop.f32.mrf.mxu0 }
 0x3c2   :  { %v4954_v24 = vadd.f32 %v4953_v38, %v4808_v14  ;;  %v4993_v30 = vadd.f32 %v4992_v39, %v4811_v22 }
 0x3c3   :  { %7689 = vmatmul.msk.bf16.vlgmr.msrb.gmra.mxu3 %vm4522_vm12, %v9691_v17  ;;  %7714 = vmatmul.msk.bf16.vlgmr.msra.gmra.mxu2 %vm4522_vm12, %v9691_v17 }
 0x3c4   :  { %7716 = vmatmul.msk.bf16.vlgmr.msra.gmra.mxu1 %vm4522_vm12, %v9691_v17  ;;  %7719 = vmatmul.msk.bf16.vlgmr.msra.gmra.mxu0 %vm4522_vm12, %v9691_v17 }
 0x3c6   :  { %v4730_v48 = vpop.f32.mrf.mxu3  ;;  %v4927_v8 = vpop.f32.mrf.mxu2 }
 0x3c7   :  { %v4731_v51 = vadd.f32 %v4730_v48, %v4425_v46  ;;  %v4928_v25 = vadd.f32 %v4927_v8, %v4806_v15 }
 0x3c9   :  { %v4741_v55 = vpack.c.bf16 %v4731_v51, %v4718_v49  ;;  %v4955_v56 = vpop.f32.mrf.mxu1  ;;  %v4994_v57 = vpop.f32.mrf.mxu0  ;;  %v5126_v33 = vpack.c.bf16 %v4941_v29, %v4928_v25 }
 0x3cb   :  { %v4762_v59 = vrot.slane %v4741_v55, 2  ;;  %v4763_v60 = vrot.slane %v4741_v55, 5  ;;  %v5142_v45 = vrot.slane %v5126_v33, 3 }
 0x3cd   :  { %v4797_v63 = vsel %vm4778_vm3, %v4762_v59, %v4763_v60  ;;  %v5158_v49 = vsel %vm4764_vm14, %v5126_v33, %v5142_v45 }
 0x3ce   :  { %v4798_v1 = vsel %vm4782_vm4, %v4794_v62, %v4797_v63  ;;  %v4732_v2 = vpop.f32.mrf.mxu3  ;;  %v4929_v3 = vpop.f32.mrf.mxu2  ;;  %v4403_v62 = vld [vmem:[%s10160_s6 + $0x18] sm:$0xff] }
 0x3cf   :  { %v4799_v4 = vsel %vm3568_vm1, %v4791_v0, %v4798_v1  ;;  %v4817_v63 = vperm.slane %v4403_v62, 3  ;;  %v4816_v0 = vperm.slane %v4403_v62, 2  ;;  %v4814_v1 = vperm.slane %v4403_v62, 0 }
 0x3d0   :  { %4803 = vst [vmem:[#allocation2 + $0x8] sm:$0xff] %v4799_v4  ;;  %v4818_v2 = vperm.slane %v4403_v62, 4  ;;  %v4820_v15 = vperm.slane %v4403_v62, 6  ;;  %v4821_v21 = vperm.slane %v4403_v62, 7 }
 0x3d1   :  { %v5005_v5 = vpop.f32.mrf.mxu1  ;;  %v10086_v6 = vpop.f32.mrf.mxu0 }
 0x3d2   :  { %v5006_v37 = vadd.f32 %v5005_v5, %v4812_v28  ;;  %v4815_v5 = vperm.slane %v4403_v62, 1 }
 0x3d3   :  { %7717 = vmatmul.msk.bf16.vlgmr.msra.gmra.mxu3 %vm4522_vm12, %v9691_v17  ;;  %7718 = vmatmul.msk.bf16.vlgmr.msrb.gmra.mxu2 %vm4522_vm12, %v9691_v17 }
 0x3d6   :  { %v4966_v7 = vpop.f32.mrf.mxu3  ;;  %v4979_v9 = vpop.f32.mrf.mxu2 }
 0x3d7   :  { %v4967_v23 = vadd.f32 %v4966_v7, %v4809_v13  ;;  %v4980_v17 = vadd.f32 %v4979_v9, %v4810_v16  ;;  %v4819_v7 = vperm.slane %v4403_v62, 5  ;;  %v5045_v16 = vadd.f32 %v10086_v6, %v4815_v5 }
 0x3d9   :  { %v5007_v10 = vpop.f32.mrf.mxu1  ;;  %v5046_v11 = vpop.f32.mrf.mxu0  ;;  %v5127_v31 = vpack.c.bf16 %v4967_v23, %v4954_v24  ;;  %v5128_v34 = vpack.c.bf16 %v4993_v30, %v4980_v17 }
 0x3db   :  { %v5143_v42 = vrot.slane %v5127_v31, 6  ;;  %v5144_v43 = vrot.slane %v5127_v31, 1  ;;  %v5145_v38 = vrot.slane %v5128_v34, 4  ;;  %v5146_v46 = vrot.slane %v5128_v34, 7 }
 0x3dd   :  { %v5161_v8 = vsel %vm4768_vm13, %v5143_v42, %v5144_v43  ;;  %v5165_v41 = vsel %vm4774_vm2, %v5145_v38, %v5146_v46 }
 0x3de   :  { %v4968_v19 = vpop.f32.mrf.mxu3  ;;  %v4981_v20 = vpop.f32.mrf.mxu2  ;;  %v5162_v51 = vsel %vm4772_vm15, %v5158_v49, %v5161_v8 }
 0x3e1   :  { %v5057_v26 = vpop.f32.mrf.mxu1  ;;  %v5096_v27 = vpop.f32.mrf.mxu0 }
 0x3e2   :  { %v5058_v10 = vadd.f32 %v5057_v26, %v4816_v0  ;;  %v5097_v19 = vadd.f32 %v5096_v27, %v4819_v7 }
 0x3e6   :  { %v5018_v35 = vpop.f32.mrf.mxu3  ;;  %v5031_v36 = vpop.f32.mrf.mxu2 }
 0x3e7   :  { %v5019_v44 = vadd.f32 %v5018_v35, %v4813_v32  ;;  %v5032_v11 = vadd.f32 %v5031_v36, %v4814_v1 }
 0x3e9   :  { %v5129_v40 = vpack.c.bf16 %v5019_v44, %v5006_v37  ;;  %v5059_v47 = vpop.f32.mrf.mxu1  ;;  %v5098_v48 = vpop.f32.mrf.mxu0  ;;  %v5130_v22 = vpack.c.bf16 %v5045_v16, %v5032_v11 }
 0x3eb   :  { %v5147_v18 = vrot.slane %v5129_v40, 2  ;;  %v5148_v39 = vrot.slane %v5129_v40, 5  ;;  %v5149_v31 = vrot.slane %v5130_v22, 3 }
 0x3ed   :  { %v5168_v50 = vsel %vm4778_vm3, %v5147_v18, %v5148_v39  ;;  %v5173_v37 = vsel %vm4764_vm14, %v5130_v22, %v5149_v31 }
 0x3ee   :  { %v5169_v52 = vsel %vm4782_vm4, %v5165_v41, %v5168_v50  ;;  %v5020_v53 = vpop.f32.mrf.mxu3  ;;  %v5033_v54 = vpop.f32.mrf.mxu2  ;;  %v4404_v41 = vld [vmem:[%s10160_s6 + $0x20] sm:$0xff] }
 0x3ef   :  { %v5170_v55 = vsel %vm3568_vm1, %v5162_v51, %v5169_v52  ;;  %v5195_v50 = vperm.slane %v4404_v41, 3  ;;  %v5194_v51 = vperm.slane %v4404_v41, 2  ;;  %v5192_v52 = vperm.slane %v4404_v41, 0 }
 0x3f0   :  { %5188 = vst [vmem:[#allocation2 + $0x10] sm:$0xff] %v5170_v55  ;;  %v5196_v53 = vperm.slane %v4404_v41, 4  ;;  %v5198_v1 = vperm.slane %v4404_v41, 6  ;;  %v5199_v5 = vperm.slane %v4404_v41, 7 }
 0x3f1   :  { %v5109_v56 = vpop.f32.mrf.mxu1  ;;  %v10103_v57 = vpop.f32.mrf.mxu0 }
 0x3f2   :  { %v5110_v17 = vadd.f32 %v5109_v56, %v4820_v15  ;;  %v5193_v56 = vperm.slane %v4404_v41, 1 }
 0x3f6   :  { %v5070_v58 = vpop.f32.mrf.mxu3  ;;  %v5083_v59 = vpop.f32.mrf.mxu2 }
 0x3f7   :  { %v5071_v9 = vadd.f32 %v5070_v58, %v4817_v63  ;;  %v5084_v12 = vadd.f32 %v5083_v59, %v4818_v2  ;;  %v5197_v58 = vperm.slane %v4404_v41, 5  ;;  %v5327_v2 = vadd.f32 %v10103_v57, %v5193_v56 }
 0x3f9   :  { %v5111_v60 = vpop.f32.mrf.mxu1  ;;  %v5328_v61 = vpop.f32.mrf.mxu0  ;;  %v5131_v20 = vpack.c.bf16 %v5071_v9, %v5058_v10  ;;  %v5132_v23 = vpack.c.bf16 %v5097_v19, %v5084_v12 }
 0x3fb   :  { %v5150_v28 = vrot.slane %v5131_v20, 6  ;;  %v5151_v29 = vrot.slane %v5131_v20, 1  ;;  %v5152_v26 = vrot.slane %v5132_v23, 4  ;;  %v5153_v32 = vrot.slane %v5132_v23, 7 }
 0x3fd   :  { %v5176_v36 = vsel %vm4768_vm13, %v5150_v28, %v5151_v29  ;;  %v5180_v42 = vsel %vm4774_vm2, %v5152_v26, %v5153_v32 }
 0x3fe   :  { %v5072_v3 = vpop.f32.mrf.mxu3  ;;  %v5085_v4 = vpop.f32.mrf.mxu2  ;;  %v5177_v44 = vsel %vm4772_vm15, %v5173_v37, %v5176_v36 }
 0x401   :  { %v5339_v13 = vpop.f32.mrf.mxu1  ;;  %v5378_v14 = vpop.f32.mrf.mxu0 }
 0x402   :  { %v5340_v60 = vadd.f32 %v5339_v13, %v5194_v51  ;;  %v5379_v3 = vadd.f32 %v5378_v14, %v5197_v58 }
 0x406   :  { %v5122_v24 = vpop.f32.mrf.mxu3  ;;  %v5313_v25 = vpop.f32.mrf.mxu2 }
 0x407   :  { %v5123_v30 = vadd.f32 %v5122_v24, %v4821_v21  ;;  %v5314_v61 = vadd.f32 %v5313_v25, %v5192_v52 }
 0x409   :  { %v5133_v33 = vpack.c.bf16 %v5123_v30, %v5110_v17  ;;  %v5341_v34 = vpop.f32.mrf.mxu1  ;;  %v5380_v35 = vpop.f32.mrf.mxu0  ;;  %v5512_v7 = vpack.c.bf16 %v5327_v2, %v5314_v61 }
 0x40b   :  { %v5154_v6 = vrot.slane %v5133_v33, 2  ;;  %v5155_v27 = vrot.slane %v5133_v33, 5  ;;  %v5528_v20 = vrot.slane %v5512_v7, 3 }
 0x40d   :  { %v5183_v43 = vsel %vm4778_vm3, %v5154_v6, %v5155_v27  ;;  %v5544_v17 = vsel %vm4764_vm14, %v5512_v7, %v5528_v20 }
 0x40e   :  { %v5184_v45 = vsel %vm4782_vm4, %v5180_v42, %v5183_v43  ;;  %v5124_v38 = vpop.f32.mrf.mxu3  ;;  %v5315_v46 = vpop.f32.mrf.mxu2  ;;  %v4405_v42 = vld [vmem:[%s10160_s6 + $0x28] sm:$0xff] }
 0x40f   :  { %v5185_v40 = vsel %vm3568_vm1, %v5177_v44, %v5184_v45  ;;  %v5203_v43 = vperm.slane %v4405_v42, 3  ;;  %v5202_v44 = vperm.slane %v4405_v42, 2  ;;  %v5200_v45 = vperm.slane %v4405_v42, 0 }
 0x410   :  { %5189 = vst [vmem:[#allocation2 + $0x18] sm:$0xff] %v5185_v40  ;;  %v5204_v38 = vperm.slane %v4405_v42, 4  ;;  %v5206_v52 = vperm.slane %v4405_v42, 6  ;;  %v5207_v56 = vperm.slane %v4405_v42, 7 }
 0x411   :  { %v5391_v47 = vpop.f32.mrf.mxu1  ;;  %v10116_v48 = vpop.f32.mrf.mxu0 }
 0x412   :  { %v5392_v12 = vadd.f32 %v5391_v47, %v5198_v1  ;;  %v5201_v47 = vperm.slane %v4405_v42, 1 }
 0x416   :  { %v5352_v8 = vpop.f32.mrf.mxu3  ;;  %v5365_v18 = vpop.f32.mrf.mxu2 }
 0x417   :  { %v5353_v59 = vadd.f32 %v5352_v8, %v5195_v50  ;;  %v5366_v62 = vadd.f32 %v5365_v18, %v5196_v53  ;;  %v5205_v8 = vperm.slane %v4405_v42, 5  ;;  %v5431_v53 = vadd.f32 %v10116_v48, %v5201_v47  ;;  %v4406_v48 = vld [vmem:[%s10160_s6 + $0x30] sm:$0x3f]  ;;  %s8238_s6 = smov [#allocation2]  }
 0x418   :  { %s5735_s27 = sshll.u32 %s8238_s6, 4  ;;  %s5736_s27 = int_to_ptr.vmem [resolvable:$true] %s5735_s27 }
 0x419   :  { %v5393_v39 = vpop.f32.mrf.mxu1  ;;  %v5432_v49 = vpop.f32.mrf.mxu0  ;;  %v5513_v4 = vpack.c.bf16 %v5353_v59, %v5340_v60  ;;  %v5514_v9 = vpack.c.bf16 %v5379_v3, %v5366_v62 }
 0x41b   :  { %v5529_v15 = vrot.slane %v5513_v4, 6  ;;  %v5530_v16 = vrot.slane %v5513_v4, 1  ;;  %v5531_v13 = vrot.slane %v5514_v9, 4  ;;  %v5532_v21 = vrot.slane %v5514_v9, 7 }
 0x41d   :  { %v5547_v25 = vsel %vm4768_vm13, %v5529_v15, %v5530_v16  ;;  %v5551_v28 = vsel %vm4774_vm2, %v5531_v13, %v5532_v21  ;;  %v5577_v15 = vperm.slane %v4406_v48, 0  ;;  %v5578_v13 = vperm.slane %v4406_v48, 1 }
 0x41e   :  { %v5354_v54 = vpop.f32.mrf.mxu3  ;;  %v5367_v55 = vpop.f32.mrf.mxu2  ;;  %v5548_v30 = vsel %vm4772_vm15, %v5544_v17, %v5547_v25  ;;  %v5579_v17 = vperm.slane %v4406_v48, 2 }
 0x421   :  { %v5443_v63 = vpop.f32.mrf.mxu1  ;;  %v5482_v0 = vpop.f32.mrf.mxu0 }
 0x422   :  { %v5444_v39 = vadd.f32 %v5443_v63, %v5202_v44  ;;  %v5483_v54 = vadd.f32 %v5482_v0, %v5205_v8 }
 0x426   :  { %v5404_v10 = vpop.f32.mrf.mxu3  ;;  %v5417_v11 = vpop.f32.mrf.mxu2 }
 0x427   :  { %v5405_v19 = vadd.f32 %v5404_v10, %v5199_v5  ;;  %v5418_v49 = vadd.f32 %v5417_v11, %v5200_v45 }
 0x429   :  { %v5515_v22 = vpack.c.bf16 %v5405_v19, %v5392_v12  ;;  %v5445_v23 = vpop.f32.mrf.mxu1  ;;  %v5484_v24 = vpop.f32.mrf.mxu0  ;;  %v5516_v58 = vpack.c.bf16 %v5431_v53, %v5418_v49 }
 0x42b   :  { %v5533_v57 = vrot.slane %v5515_v22, 2  ;;  %v5534_v14 = vrot.slane %v5515_v22, 5  ;;  %v5535_v4 = vrot.slane %v5516_v58, 3 }
 0x42d   :  { %v5554_v29 = vsel %vm4778_vm3, %v5533_v57, %v5534_v14  ;;  %v5559_v16 = vsel %vm4764_vm14, %v5516_v58, %v5535_v4 }
 0x42e   :  { %v5555_v31 = vsel %vm4782_vm4, %v5551_v28, %v5554_v29  ;;  %v5406_v26 = vpop.f32.mrf.mxu3  ;;  %v5419_v32 = vpop.f32.mrf.mxu2  ;;  %v5582_v28 = vperm.slane %v4406_v48, 5  ;;  %v5580_v29 = vperm.slane %v4406_v48, 3 }
 0x42f   :  { %v5556_v33 = vsel %vm3568_vm1, %v5548_v30, %v5555_v31  ;;  %v5581_v30 = vperm.slane %v4406_v48, 4 }
 0x430   :  { %5574 = vst [vmem:[#allocation2 + $0x20] sm:$0xff] %v5556_v33 }
 0x431   :  { %v5495_v34 = vpop.f32.mrf.mxu1  ;;  %v5641_v35 = vpop.f32.mrf.mxu0 }
 0x432   :  { %v5496_v62 = vadd.f32 %v5495_v34, %v5206_v52  ;;  %v5642_v14 = vadd.f32 %v5641_v35, %v5578_v13 }
 0x436   :  { %v5456_v36 = vpop.f32.mrf.mxu3  ;;  %v5469_v6 = vpop.f32.mrf.mxu2 }
 0x437   :  { %v5457_v18 = vadd.f32 %v5456_v36, %v5203_v43  ;;  %v5470_v41 = vadd.f32 %v5469_v6, %v5204_v38 }
 0x439   :  { %v5497_v27 = vpop.f32.mrf.mxu1  ;;  %v5643_v37 = vpop.f32.mrf.mxu0  ;;  %v5517_v55 = vpack.c.bf16 %v5457_v18, %v5444_v39  ;;  %v5518_v59 = vpack.c.bf16 %v5483_v54, %v5470_v41 }
 0x43b   :  { %v5536_v1 = vrot.slane %v5517_v55, 6  ;;  %v5537_v2 = vrot.slane %v5517_v55, 1  ;;  %v5538_v63 = vrot.slane %v5518_v59, 4  ;;  %v5539_v5 = vrot.slane %v5518_v59, 7 }
 0x43d   :  { %v5562_v0 = vsel %vm4768_vm13, %v5536_v1, %v5537_v2  ;;  %v5566_v19 = vsel %vm4774_vm2, %v5538_v63, %v5539_v5 }
 0x43e   :  { %v5458_v46 = vpop.f32.mrf.mxu3  ;;  %v5471_v40 = vpop.f32.mrf.mxu2  ;;  %v5563_v21 = vsel %vm4772_vm15, %v5559_v16, %v5562_v0 }
 0x441   :  { %v5654_v50 = vpop.f32.mrf.mxu1  ;;  %v5693_v51 = vpop.f32.mrf.mxu0 }
 0x442   :  { %v5655_v33 = vadd.f32 %v5654_v50, %v5579_v17  ;;  %v5694_v34 = vadd.f32 %v5693_v51, %v5582_v28 }
 0x446   :  { %v5508_v60 = vpop.f32.mrf.mxu3  ;;  %v5628_v61 = vpop.f32.mrf.mxu2 }
 0x447   :  { %v5509_v3 = vadd.f32 %v5508_v60, %v5207_v56  ;;  %v5629_v57 = vadd.f32 %v5628_v61, %v5577_v15 }
 0x449   :  { %v5519_v7 = vpack.c.bf16 %v5509_v3, %v5496_v62  ;;  %v5656_v9 = vpop.f32.mrf.mxu1  ;;  %v5695_v10 = vpop.f32.mrf.mxu0  ;;  %v5697_v31 = vpack.c.bf16 %v5642_v14, %v5629_v57 }
 0x44b   :  { %v5540_v11 = vrot.slane %v5519_v7, 2  ;;  %v5541_v12 = vrot.slane %v5519_v7, 5  ;;  %v5703_v27 = vrot.slane %v5697_v31, 3 }
 0x44d   :  { %v5569_v20 = vsel %vm4778_vm3, %v5540_v11, %v5541_v12  ;;  %v5710_v38 = vsel %vm4764_vm14, %v5697_v31, %v5703_v27 }
 0x44e   :  { %v5570_v22 = vsel %vm4782_vm4, %v5566_v19, %v5569_v20  ;;  %v5510_v23 = vpop.f32.mrf.mxu3  ;;  %v5630_v24 = vpop.f32.mrf.mxu2 }
 0x44f   :  { %v5571_v25 = vsel %vm3568_vm1, %v5563_v21, %v5570_v22  ;;  %vm5725_vm1 = vmor %vm5713_vm7, %vm5724_vm8 }
 0x450   :  { %5575 = vst [vmem:[#allocation2 + $0x28] sm:$0xff] %v5571_v25  ;;  %vm5726_vm10 = vmor %vm4774_vm2, %vm5725_vm1 }
 0x451   :  { %vm5728_vm12 = vmor %vm5727_vm11, %vm5726_vm10 }
 0x456   :  { %v5667_v26 = vpop.f32.mrf.mxu3  ;;  %v5680_v32 = vpop.f32.mrf.mxu2 }
 0x457   :  { %v5668_v36 = vadd.f32 %v5667_v26, %v5580_v29  ;;  %v5681_v6 = vadd.f32 %v5680_v32, %v5581_v30 }
 0x459   :  { %v5698_v37 = vpack.c.bf16 %v5668_v36, %v5655_v33  ;;  %v5699_v42 = vpack.c.bf16 %v5694_v34, %v5681_v6 }
 0x45b   :  { %v5704_v35 = vrot.slane %v5698_v37, 6  ;;  %v5705_v43 = vrot.slane %v5698_v37, 1  ;;  %v5706_v44 = vrot.slane %v5699_v42, 4  ;;  %v5707_v45 = vrot.slane %v5699_v42, 7 }
 0x45d   :  { %v5712_v46 = vsel %vm4772_vm15, %v5710_v38, %v5704_v35  ;;  %v5716_v40 = vsel %vm5713_vm7, %v5705_v43, %v5706_v44 }
 0x45e   :  { %v5719_v47 = vsel %vm5717_vm9, %v5716_v40, %v5707_v45  ;;  %v5669_v8 = vpop.f32.mrf.mxu3  ;;  %v5682_v18 = vpop.f32.mrf.mxu2 }
 0x45f   :  { %v5720_v39 = vsel %vm3567_vm0, %v5712_v46, %v5719_v47 }
 0x460   :  { %5729 = vst.msk [vmem:[#allocation2 + $0x30] sm:$0x3f] %vm5728_vm12, %v5720_v39 }
 0x461   :  { %5740 = dma.vmem_to_hbm [thread:$0]  %s5736_s27, 864, %s5738_s30, [#allocation3]  }
 0x462   :  { %8235 = dma.done.wait [#allocation3], 864  }
 0x463   :  { %8236 = vsyncadd [#allocation3], 4294966432 }
 0x464   :  { %5745 = vsyncpa [#allocation3], 1 }

</bundles_post_ra>
